<compile_context>
chip_gen: v7x
topology: tpu7x:2x2x1
jax: 0.10.0
libtpu: 0.0.40
codegen_flags: <defaults>
</compile_context>

<pallas_src>
import functools

import numpy as np
import jax
import jax.numpy as jnp
from jax.experimental import pallas as pl
from jax.experimental.pallas import tpu as pltpu

LANES = 128  # TPU lane width; channel dims are zero-padded to a multiple of it.


def _round_up(x, m):
    return (x + m - 1) // m * m


# ----------------------------------------------------------------------------
# Pallas kernels
# ----------------------------------------------------------------------------
def conv_block_kernel(*refs, num_layers, height, width):
    """Fused (Conv3x3(pad=1) -> ReLU)*num_layers -> MaxPool2x2 for one image.

    Activation layout ("padded-flat"): 2D (rows, C) where rows enumerate the
    spatially zero-padded image row-major (row = y*(W+2) + x) plus 2 slack
    rows so every 3x3 tap is a contiguous, in-bounds row slab.  C = lanes.

    refs = (x, mask, w0, b0, ..., w{L-1}, b{L-1}, out, acc, buf0[, buf1])
      x    : ((H+2)*(W+2)+2, C)     padded-flat input activation
      mask : (H*(W+2), 1)           1.0 on real columns, 0.0 on pad columns
      w_l  : (9, C, C)              tap-major 3x3 weights (channel padded)
      b_l  : (1, C)
      out  : ((H/2+2)*(W/2+2)+2, C) padded-flat pooled output
      acc  : (H*(W+2), C) f32       conv accumulator / pool source (VMEM)
      buf_i: same shape as x        ping-pong buffers for intermediate layers
    """
    x_ref = refs[0]
    mask_ref = refs[1]
    wb = refs[2:2 + 2 * num_layers]
    o_ref = refs[2 + 2 * num_layers]
    acc_ref = refs[3 + 2 * num_layers]
    bufs = refs[4 + 2 * num_layers:]

    h, w = height, width
    wp = w + 2
    hw = h * wp                      # accumulator rows (2 pad cols per row)
    ho, wo = h // 2, w // 2
    wop = wo + 2

    # Zero intermediate buffers / output once: their untouched border and
    # slack rows ARE the zero padding for the next conv layer / next block.
    for buf in bufs:
        buf[...] = jnp.zeros_like(buf)
    o_ref[...] = jnp.zeros_like(o_ref)

    src = x_ref
    for l in range(num_layers):
        w_ref = wb[2 * l]
        b_ref = wb[2 * l + 1]
        # In-kernel im2col: 3x3 conv = 9 shifted contiguous row slabs, each one
        # MXU matmul accumulated into the f32 VMEM scratch.
        for t in range(9):
            kh, kw = t // 3, t % 3
            slab = src[pl.ds(kh * wp + kw, hw), :]
            contrib = jnp.dot(slab, w_ref[t],
                              preferred_element_type=jnp.float32)
            if t == 0:
                acc_ref[...] = contrib
            else:
                acc_ref[...] += contrib
        # Bias + ReLU epilogue in f32; the mask zeroes the horizontal padding
        # columns so the zero-padding invariant survives into the next layer.
        y = jnp.maximum(acc_ref[...] + b_ref[...], 0.0) * mask_ref[...]
        if l + 1 < num_layers:
            dst = bufs[l % len(bufs)]
            dst[pl.ds(wp + 1, hw), :] = y       # interior write; border stays 0
            src = dst
        else:
            acc_ref[...] = y                    # reuse acc as the pool source

    # Fused 2x2 / stride-2 max-pool epilogue (VPU, data resident in VMEM),
    # emitted directly in the next block's padded-flat layout.
    for io in range(ho):
        r0 = (2 * io) * wp
        r1 = (2 * io + 1) * wp
        m = jnp.maximum(
            jnp.maximum(acc_ref[pl.ds(r0, wo, stride=2), :],
                        acc_ref[pl.ds(r0 + 1, wo, stride=2), :]),
            jnp.maximum(acc_ref[pl.ds(r1, wo, stride=2), :],
                        acc_ref[pl.ds(r1 + 1, wo, stride=2), :]))
        o_ref[pl.ds((io + 1) * wop + 1, wo), :] = m.astype(o_ref.dtype)


def matmul_bias_act_kernel(x_ref, w_ref, b_ref, o_ref, *, relu):
    """o = x @ w + b (f32 accumulate on the MXU), optional fused ReLU."""
    y = jnp.dot(x_ref[...], w_ref[...], preferred_element_type=jnp.float32)
    y = y + b_ref[...]
    if relu:
        y = jnp.maximum(y, 0.0)
    o_ref[...] = y.astype(o_ref.dtype)


# ----------------------------------------------------------------------------
# Layer wrappers (pallas_call plumbing)
# ----------------------------------------------------------------------------
def conv_block(x_flat, layer_params, h, w):
    """Run one fused conv block.  x_flat: (N, (h+2)*(w+2)+2, C) padded-flat."""
    n, p_in, lanes = x_flat.shape
    wp = w + 2
    assert p_in == (h + 2) * wp + 2
    ho, wo = h // 2, w // 2
    p_out = (ho + 2) * (wo + 2) + 2
    nl = len(layer_params)

    # 0/1 mask for the two horizontal padding columns of every flat row.
    mask = jnp.asarray(
        (np.arange(h * wp) % wp < w).astype(np.float32).reshape(h * wp, 1))

    in_specs = [pl.BlockSpec((None, p_in, lanes), lambda bi: (bi, 0, 0)),
                pl.BlockSpec((h * wp, 1), lambda bi: (0, 0))]
    args = [x_flat, mask]
    for (w9, bv) in layer_params:
        in_specs.append(pl.BlockSpec(w9.shape, lambda bi: (0, 0, 0)))
        in_specs.append(pl.BlockSpec(bv.shape, lambda bi: (0, 0)))
        args += [w9, bv]

    n_bufs = min(nl - 1, 2)
    scratch = [pltpu.VMEM((h * wp, lanes), jnp.float32)]
    scratch += [pltpu.VMEM((p_in, lanes), jnp.float32) for _ in range(n_bufs)]

    return pl.pallas_call(
        functools.partial(conv_block_kernel, num_layers=nl, height=h, width=w),
        out_shape=jax.ShapeDtypeStruct((n, p_out, lanes), jnp.float32),
        grid_spec=pltpu.PrefetchScalarGridSpec(
            num_scalar_prefetch=0,
            grid=(n,),
            in_specs=in_specs,
            out_specs=pl.BlockSpec((None, p_out, lanes), lambda bi: (bi, 0, 0)),
            scratch_shapes=scratch),
        compiler_params=pltpu.CompilerParams(
            dimension_semantics=("parallel",)),
    )(*args)


def linear_layer(x, w, b, *, relu, tm=512):
    """y = x @ w + b (+ReLU), row-tiled grid; weights/bias pinned across tiles."""
    m, k = x.shape
    n = w.shape[1]
    tm = min(tm, _round_up(m, 8))
    mp = _round_up(m, tm)
    xp = jnp.pad(x, ((0, mp - m), (0, 0))) if mp != m else x
    out = pl.pallas_call(
        functools.partial(matmul_bias_act_kernel, relu=relu),
        out_shape=jax.ShapeDtypeStruct((mp, n), jnp.float32),
        grid_spec=pltpu.PrefetchScalarGridSpec(
            num_scalar_prefetch=0,
            grid=(mp // tm,),
            in_specs=[pl.BlockSpec((tm, k), lambda i: (i, 0)),
                      pl.BlockSpec((k, n), lambda i: (0, 0)),
                      pl.BlockSpec((1, n), lambda i: (0, 0))],
            out_specs=pl.BlockSpec((tm, n), lambda i: (i, 0))),
        compiler_params=pltpu.CompilerParams(
            dimension_semantics=("parallel",)),
    )(xp, w, b)
    return out[:m] if mp != m else out


# ----------------------------------------------------------------------------
# Parameter init (PyTorch layouts) and one-time re-layout for the kernels
# ----------------------------------------------------------------------------
def init_params(key, in_size, filters, pool_every, hidden_dims, out_classes):
    c, h, w = in_size
    keys = iter(jax.random.split(key, 2 * (len(filters) + len(hidden_dims) + 1)))
    conv_params = []
    in_c = c
    for f in filters:
        wk = jax.random.normal(next(keys), (3, 3, in_c, f), jnp.float32) * 0.1
        bk = jax.random.normal(next(keys), (1, f), jnp.float32) * 0.01
        conv_params.append((wk, bk))
        in_c = f
    hh, ww = h, w
    for i, _ in enumerate(filters):
        if (i + 1) % pool_every == 0:
            hh, ww = hh // 2, ww // 2
    if len(filters) % pool_every != 0:
        hh, ww = hh // 2, ww // 2
    flat = in_c * hh * ww
    lin_params = []
    in_dim = flat
    for d in hidden_dims:
        wk = jax.random.normal(next(keys), (in_dim, d), jnp.float32) * 0.05
        bk = jax.random.normal(next(keys), (1, d), jnp.float32) * 0.01
        lin_params.append((wk, bk))
        in_dim = d
    wk = jax.random.normal(next(keys), (in_dim, out_classes), jnp.float32) * 0.05
    bk = jax.random.normal(next(keys), (1, out_classes), jnp.float32) * 0.01
    lin_params.append((wk, bk))
    return {"conv": conv_params, "linear": lin_params}


def prepare_params(params, in_size, pool_every):
    """One-time (trace-time) re-layout of the PyTorch-style parameters:
       conv weights -> tap-major (9, C, C) with channels zero-padded to 128,
       conv layers grouped into pool blocks, PyTorch's NCHW flatten + the
       padded-flat feature layout folded into the first Linear weight's rows,
       and all Linear in/out dims zero-padded to multiples of 128."""
    c_in, h, w = in_size
    lanes = _round_up(max([c_in] + [wc.shape[-1] for wc, _ in params["conv"]]),
                      LANES)

    conv_prepared = []
    for (wc, bc) in params["conv"]:
        wk = jnp.pad(wc, ((0, 0), (0, 0),
                          (0, lanes - wc.shape[2]), (0, lanes - wc.shape[3])))
        bk = jnp.pad(bc, ((0, 0), (0, lanes - bc.shape[1])))
        conv_prepared.append((wk.reshape(9, lanes, lanes), bk))
    blocks = [conv_prepared[i:i + pool_every]
              for i in range(0, len(conv_prepared), pool_every)]

    hf, wf = h, w
    for _ in blocks:                 # every block ends with one 2x2 max-pool
        hf, wf = hf // 2, wf // 2
    f_last = params["conv"][-1][0].shape[-1]

    lin = params["linear"]
    w0, b0 = lin[0]
    hid0 = w0.shape[1]
    # Rows of w0 are indexed in PyTorch view(N,-1) order (c, y, x); re-index
    # them to the kernel's padded-flat NHWC layout.  Padded channels, border
    # and slack rows get zero weights (the runtime flatten becomes a reshape).
    w0_chw = w0.reshape(f_last, hf, wf, hid0)
    w0_full = jnp.zeros(((hf + 2), (wf + 2), lanes, hid0), w0.dtype)
    w0_full = w0_full.at[1:1 + hf, 1:1 + wf, :f_last, :].set(
        jnp.transpose(w0_chw, (1, 2, 0, 3)))
    w0_full = w0_full.reshape((hf + 2) * (wf + 2) * lanes, hid0)
    w0_full = jnp.pad(w0_full, ((0, 2 * lanes), (0, 0)))      # slack rows
    hid0_p = _round_up(hid0, LANES)
    lin_prepared = [(jnp.pad(w0_full, ((0, 0), (0, hid0_p - hid0))),
                     jnp.pad(b0, ((0, 0), (0, hid0_p - hid0))))]
    prev = hid0
    for (wl, bl) in lin[1:]:
        out_d = wl.shape[1]
        out_p = _round_up(out_d, LANES)
        wlp = jnp.pad(wl, ((0, _round_up(prev, LANES) - prev),
                           (0, out_p - out_d)))
        blp = jnp.pad(bl, ((0, 0), (0, out_p - out_d)))
        lin_prepared.append((wlp, blp))
        prev = out_d
    return {"conv_blocks": blocks, "linear": lin_prepared, "lanes": lanes,
            "out_classes": lin[-1][0].shape[1]}


# ----------------------------------------------------------------------------
# Full forward pass (matches ConvClassifier.forward)
# ----------------------------------------------------------------------------
def conv_classifier_forward(x_nchw, prep):
    n, c, h, w = x_nchw.shape
    lanes = prep["lanes"]
    # Boundary glue (tiny, XLA): NCHW -> NHWC, lane-pad channels, spatial
    # zero-pad, flatten rows to the kernels' padded-flat layout (+2 slack rows).
    x = jnp.transpose(x_nchw, (0, 2, 3, 1))
    x = jnp.pad(x, ((0, 0), (1, 1), (1, 1), (0, lanes - c)))
    x = x.reshape(n, (h + 2) * (w + 2), lanes)
    x = jnp.pad(x, ((0, 0), (0, 2), (0, 0)))

    hh, ww = h, w
    for blk in prep["conv_blocks"]:
        x = conv_block(x, blk, hh, ww)
        hh, ww = hh // 2, ww // 2

    # PyTorch's features.view(N, -1) is folded into the first Linear weight,
    # so a plain (layout-preserving) reshape suffices here.
    feats = x.reshape(n, -1)
    lin = prep["linear"]
    for j, (wl, bl) in enumerate(lin):
        feats = linear_layer(feats, wl, bl, relu=(j < len(lin) - 1))
    return feats[:, :prep["out_classes"]]


# ----------------------------------------------------------------------------
# Pure-JAX reference (for correctness check)
# ----------------------------------------------------------------------------
def reference_forward(x_nchw, params, pool_every):
    n = x_nchw.shape[0]
    x = jnp.transpose(x_nchw, (0, 2, 3, 1))
    for i, (w, b) in enumerate(params["conv"]):
        x = jax.lax.conv_general_dilated(
            x, w, window_strides=(1, 1), padding=((1, 1), (1, 1)),
            dimension_numbers=("NHWC", "HWIO", "NHWC"))
        x = jnp.maximum(x + b[0], 0.0)
        if (i + 1) % pool_every == 0:
            x = jax.lax.reduce_window(x, -jnp.inf, jax.lax.max,
                                      (1, 2, 2, 1), (1, 2, 2, 1), "VALID")
    if len(params["conv"]) % pool_every != 0:
        x = jax.lax.reduce_window(x, -jnp.inf, jax.lax.max,
                                  (1, 2, 2, 1), (1, 2, 2, 1), "VALID")
    feats = jnp.transpose(x, (0, 3, 1, 2)).reshape(n, -1)
    for j, (w, b) in enumerate(params["linear"]):
        feats = feats @ w + b
        if j < len(params["linear"]) - 1:
            feats = jnp.maximum(feats, 0.0)
    return feats


# ----------------------------------------------------------------------------
if __name__ == "__main__":
    in_size = (4, 16, 16)        # (C, H, W)
    out_classes = 10
    filters = [8, 8]             # N conv layers
    pool_every = 2               # P
    hidden_dims = [32]           # M hidden linear layers
    batch = 2

    key = jax.random.PRNGKey(0)
    kp, kx = jax.random.split(key)
    params = init_params(kp, in_size, filters, pool_every, hidden_dims,
                         out_classes)
    x = jax.random.normal(kx, (batch,) + in_size, jnp.float32)  # NCHW input

    prep = prepare_params(params, in_size, pool_every)  # one-time re-layout
    out = conv_classifier_forward(x, prep)
    out = jax.block_until_ready(out)

    ref = reference_forward(x, params, pool_every)
    assert out.shape == (batch, out_classes), out.shape
    assert jnp.allclose(out, ref, atol=1e-3, rtol=1e-3), \
        "mismatch vs JAX reference"

    print("KERNEL_OK")
</pallas_src>

<mosaic_0001>
module attributes {stable_mosaic.version = 11 : i64} {
  func.func @conv_block_kernel(%arg0: i32, %arg1: memref<1x326x128xf32, #tpu.memory_space<vmem>>, %arg2: memref<288x1xf32, #tpu.memory_space<vmem>>, %arg3: memref<9x128x128xf32, #tpu.memory_space<vmem>>, %arg4: memref<1x128xf32, #tpu.memory_space<vmem>>, %arg5: memref<9x128x128xf32, #tpu.memory_space<vmem>>, %arg6: memref<1x128xf32, #tpu.memory_space<vmem>>, %arg7: memref<1x102x128xf32, #tpu.memory_space<vmem>>, %arg8: memref<288x128xf32, #tpu.memory_space<vmem>>, %arg9: memref<326x128xf32, #tpu.memory_space<vmem>>) attributes {dimension_semantics = [#tpu.dimension_semantics<parallel>], iteration_bounds = array<i64: 2>, scalar_prefetch = 0 : i64, scratch_operands = 2 : i64, tpu.core_type = #tpu.core_type<tc>, window_params = [{transform_indices = @transform_0, window_bounds = array<i64: 1, 326, 128>}, {pipeline_mode = #tpu.pipeline_mode<synchronous>, transform_indices = @transform_1, window_bounds = array<i64: 288, 1>}, {pipeline_mode = #tpu.pipeline_mode<synchronous>, transform_indices = @transform_2, window_bounds = array<i64: 9, 128, 128>}, {pipeline_mode = #tpu.pipeline_mode<synchronous>, transform_indices = @transform_3, window_bounds = array<i64: 1, 128>}, {pipeline_mode = #tpu.pipeline_mode<synchronous>, transform_indices = @transform_4, window_bounds = array<i64: 9, 128, 128>}, {pipeline_mode = #tpu.pipeline_mode<synchronous>, transform_indices = @transform_5, window_bounds = array<i64: 1, 128>}, {transform_indices = @transform_6, window_bounds = array<i64: 1, 102, 128>}]} {
    %cst = arith.constant 0.000000e+00 : f32
    %0 = vector.broadcast %cst : f32 to vector<326x128xf32>
    %c0 = arith.constant 0 : index
    %c0_0 = arith.constant 0 : index
    %1 = vector.load %arg9[%c0, %c0_0] : memref<326x128xf32, #tpu.memory_space<vmem>>, vector<326x128xf32>
    tpu.vector_store %arg9[%c0, %c0_0], %0 {strides = array<i32>} : memref<326x128xf32, #tpu.memory_space<vmem>>, vector<326x128xf32>,
    %cst_1 = arith.constant 0.000000e+00 : f32
    %2 = vector.broadcast %cst_1 : f32 to vector<102x128xf32>
    %c0_2 = arith.constant 0 : index
    %c0_3 = arith.constant 0 : index
    %c0_4 = arith.constant 0 : index
    %3 = vector.load %arg7[%c0_2, %c0_3, %c0_4] : memref<1x102x128xf32, #tpu.memory_space<vmem>>, vector<1x102x128xf32>
    %4 = vector.shape_cast %3 : vector<1x102x128xf32> to vector<102x128xf32>
    %5 = vector.shape_cast %2 : vector<102x128xf32> to vector<1x102x128xf32>
    tpu.vector_store %arg7[%c0_2, %c0_3, %c0_4], %5 {strides = array<i32>} : memref<1x102x128xf32, #tpu.memory_space<vmem>>, vector<1x102x128xf32>,
    %c0_5 = arith.constant 0 : index
    %c0_6 = arith.constant 0 : index
    %c0_7 = arith.constant 0 : index
    %6 = vector.load %arg1[%c0_5, %c0_6, %c0_7] : memref<1x326x128xf32, #tpu.memory_space<vmem>>, vector<1x288x128xf32>
    %7 = vector.shape_cast %6 : vector<1x288x128xf32> to vector<288x128xf32>
    %c0_8 = arith.constant 0 : index
    %c0_9 = arith.constant 0 : index
    %c0_10 = arith.constant 0 : index
    %8 = vector.load %arg3[%c0_8, %c0_9, %c0_10] : memref<9x128x128xf32, #tpu.memory_space<vmem>>, vector<1x128x128xf32>
    %9 = vector.shape_cast %8 : vector<1x128x128xf32> to vector<128x128xf32>
    %cst_11 = arith.constant dense<0.000000e+00> : vector<288x128xf32>
    %10 = tpu.matmul %7, %9, %cst_11 {dimension_numbers = #tpu.dot_dimension_numbers<[1], [0], [0], [1], [0, 0, 1, 1], [], []>} : vector<288x128xf32>, vector<128x128xf32>, vector<288x128xf32> -> vector<288x128xf32>
    %c0_12 = arith.constant 0 : index
    %c0_13 = arith.constant 0 : index
    %11 = vector.load %arg8[%c0_12, %c0_13] : memref<288x128xf32, #tpu.memory_space<vmem>>, vector<288x128xf32>
    tpu.vector_store %arg8[%c0_12, %c0_13], %10 {strides = array<i32>} : memref<288x128xf32, #tpu.memory_space<vmem>>, vector<288x128xf32>,
    %c0_14 = arith.constant 0 : index
    %c1 = arith.constant 1 : index
    %c0_15 = arith.constant 0 : index
    %12 = vector.load %arg1[%c0_14, %c1, %c0_15] : memref<1x326x128xf32, #tpu.memory_space<vmem>>, vector<1x288x128xf32>
    %13 = vector.shape_cast %12 : vector<1x288x128xf32> to vector<288x128xf32>
    %c1_16 = arith.constant 1 : index
    %c0_17 = arith.constant 0 : index
    %c0_18 = arith.constant 0 : index
    %14 = vector.load %arg3[%c1_16, %c0_17, %c0_18] : memref<9x128x128xf32, #tpu.memory_space<vmem>>, vector<1x128x128xf32>
    %15 = vector.shape_cast %14 : vector<1x128x128xf32> to vector<128x128xf32>
    %cst_19 = arith.constant dense<0.000000e+00> : vector<288x128xf32>
    %16 = tpu.matmul %13, %15, %cst_19 {dimension_numbers = #tpu.dot_dimension_numbers<[1], [0], [0], [1], [0, 0, 1, 1], [], []>} : vector<288x128xf32>, vector<128x128xf32>, vector<288x128xf32> -> vector<288x128xf32>
    %c0_20 = arith.constant 0 : index
    %c0_21 = arith.constant 0 : index
    %17 = vector.load %arg8[%c0_20, %c0_21] : memref<288x128xf32, #tpu.memory_space<vmem>>, vector<288x128xf32>
    %18 = arith.addf %17, %16 : vector<288x128xf32>
    %c0_22 = arith.constant 0 : index
    %c0_23 = arith.constant 0 : index
    %19 = vector.load %arg8[%c0_22, %c0_23] : memref<288x128xf32, #tpu.memory_space<vmem>>, vector<288x128xf32>
    tpu.vector_store %arg8[%c0_22, %c0_23], %18 {strides = array<i32>} : memref<288x128xf32, #tpu.memory_space<vmem>>, vector<288x128xf32>,
    %c0_24 = arith.constant 0 : index
    %c2 = arith.constant 2 : index
    %c0_25 = arith.constant 0 : index
    %20 = vector.load %arg1[%c0_24, %c2, %c0_25] : memref<1x326x128xf32, #tpu.memory_space<vmem>>, vector<1x288x128xf32>
    %21 = vector.shape_cast %20 : vector<1x288x128xf32> to vector<288x128xf32>
    %c2_26 = arith.constant 2 : index
    %c0_27 = arith.constant 0 : index
    %c0_28 = arith.constant 0 : index
    %22 = vector.load %arg3[%c2_26, %c0_27, %c0_28] : memref<9x128x128xf32, #tpu.memory_space<vmem>>, vector<1x128x128xf32>
    %23 = vector.shape_cast %22 : vector<1x128x128xf32> to vector<128x128xf32>
    %cst_29 = arith.constant dense<0.000000e+00> : vector<288x128xf32>
    %24 = tpu.matmul %21, %23, %cst_29 {dimension_numbers = #tpu.dot_dimension_numbers<[1], [0], [0], [1], [0, 0, 1, 1], [], []>} : vector<288x128xf32>, vector<128x128xf32>, vector<288x128xf32> -> vector<288x128xf32>
    %c0_30 = arith.constant 0 : index
    %c0_31 = arith.constant 0 : index
    %25 = vector.load %arg8[%c0_30, %c0_31] : memref<288x128xf32, #tpu.memory_space<vmem>>, vector<288x128xf32>
    %26 = arith.addf %25, %24 : vector<288x128xf32>
    %c0_32 = arith.constant 0 : index
    %c0_33 = arith.constant 0 : index
    %27 = vector.load %arg8[%c0_32, %c0_33] : memref<288x128xf32, #tpu.memory_space<vmem>>, vector<288x128xf32>
    tpu.vector_store %arg8[%c0_32, %c0_33], %26 {strides = array<i32>} : memref<288x128xf32, #tpu.memory_space<vmem>>, vector<288x128xf32>,
    %c0_34 = arith.constant 0 : index
    %c18 = arith.constant 18 : index
    %c0_35 = arith.constant 0 : index
    %28 = vector.load %arg1[%c0_34, %c18, %c0_35] : memref<1x326x128xf32, #tpu.memory_space<vmem>>, vector<1x288x128xf32>
    %29 = vector.shape_cast %28 : vector<1x288x128xf32> to vector<288x128xf32>
    %c3 = arith.constant 3 : index
    %c0_36 = arith.constant 0 : index
    %c0_37 = arith.constant 0 : index
    %30 = vector.load %arg3[%c3, %c0_36, %c0_37] : memref<9x128x128xf32, #tpu.memory_space<vmem>>, vector<1x128x128xf32>
    %31 = vector.shape_cast %30 : vector<1x128x128xf32> to vector<128x128xf32>
    %cst_38 = arith.constant dense<0.000000e+00> : vector<288x128xf32>
    %32 = tpu.matmul %29, %31, %cst_38 {dimension_numbers = #tpu.dot_dimension_numbers<[1], [0], [0], [1], [0, 0, 1, 1], [], []>} : vector<288x128xf32>, vector<128x128xf32>, vector<288x128xf32> -> vector<288x128xf32>
    %c0_39 = arith.constant 0 : index
    %c0_40 = arith.constant 0 : index
    %33 = vector.load %arg8[%c0_39, %c0_40] : memref<288x128xf32, #tpu.memory_space<vmem>>, vector<288x128xf32>
    %34 = arith.addf %33, %32 : vector<288x128xf32>
    %c0_41 = arith.constant 0 : index
    %c0_42 = arith.constant 0 : index
    %35 = vector.load %arg8[%c0_41, %c0_42] : memref<288x128xf32, #tpu.memory_space<vmem>>, vector<288x128xf32>
    tpu.vector_store %arg8[%c0_41, %c0_42], %34 {strides = array<i32>} : memref<288x128xf32, #tpu.memory_space<vmem>>, vector<288x128xf32>,
    %c0_43 = arith.constant 0 : index
    %c19 = arith.constant 19 : index
    %c0_44 = arith.constant 0 : index
    %36 = vector.load %arg1[%c0_43, %c19, %c0_44] : memref<1x326x128xf32, #tpu.memory_space<vmem>>, vector<1x288x128xf32>
    %37 = vector.shape_cast %36 : vector<1x288x128xf32> to vector<288x128xf32>
    %c4 = arith.constant 4 : index
    %c0_45 = arith.constant 0 : index
    %c0_46 = arith.constant 0 : index
    %38 = vector.load %arg3[%c4, %c0_45, %c0_46] : memref<9x128x128xf32, #tpu.memory_space<vmem>>, vector<1x128x128xf32>
    %39 = vector.shape_cast %38 : vector<1x128x128xf32> to vector<128x128xf32>
    %cst_47 = arith.constant dense<0.000000e+00> : vector<288x128xf32>
    %40 = tpu.matmul %37, %39, %cst_47 {dimension_numbers = #tpu.dot_dimension_numbers<[1], [0], [0], [1], [0, 0, 1, 1], [], []>} : vector<288x128xf32>, vector<128x128xf32>, vector<288x128xf32> -> vector<288x128xf32>
    %c0_48 = arith.constant 0 : index
    %c0_49 = arith.constant 0 : index
    %41 = vector.load %arg8[%c0_48, %c0_49] : memref<288x128xf32, #tpu.memory_space<vmem>>, vector<288x128xf32>
    %42 = arith.addf %41, %40 : vector<288x128xf32>
    %c0_50 = arith.constant 0 : index
    %c0_51 = arith.constant 0 : index
    %43 = vector.load %arg8[%c0_50, %c0_51] : memref<288x128xf32, #tpu.memory_space<vmem>>, vector<288x128xf32>
    tpu.vector_store %arg8[%c0_50, %c0_51], %42 {strides = array<i32>} : memref<288x128xf32, #tpu.memory_space<vmem>>, vector<288x128xf32>,
    %c0_52 = arith.constant 0 : index
    %c20 = arith.constant 20 : index
    %c0_53 = arith.constant 0 : index
    %44 = vector.load %arg1[%c0_52, %c20, %c0_53] : memref<1x326x128xf32, #tpu.memory_space<vmem>>, vector<1x288x128xf32>
    %45 = vector.shape_cast %44 : vector<1x288x128xf32> to vector<288x128xf32>
    %c5 = arith.constant 5 : index
    %c0_54 = arith.constant 0 : index
    %c0_55 = arith.constant 0 : index
    %46 = vector.load %arg3[%c5, %c0_54, %c0_55] : memref<9x128x128xf32, #tpu.memory_space<vmem>>, vector<1x128x128xf32>
    %47 = vector.shape_cast %46 : vector<1x128x128xf32> to vector<128x128xf32>
    %cst_56 = arith.constant dense<0.000000e+00> : vector<288x128xf32>
    %48 = tpu.matmul %45, %47, %cst_56 {dimension_numbers = #tpu.dot_dimension_numbers<[1], [0], [0], [1], [0, 0, 1, 1], [], []>} : vector<288x128xf32>, vector<128x128xf32>, vector<288x128xf32> -> vector<288x128xf32>
    %c0_57 = arith.constant 0 : index
    %c0_58 = arith.constant 0 : index
    %49 = vector.load %arg8[%c0_57, %c0_58] : memref<288x128xf32, #tpu.memory_space<vmem>>, vector<288x128xf32>
    %50 = arith.addf %49, %48 : vector<288x128xf32>
    %c0_59 = arith.constant 0 : index
    %c0_60 = arith.constant 0 : index
    %51 = vector.load %arg8[%c0_59, %c0_60] : memref<288x128xf32, #tpu.memory_space<vmem>>, vector<288x128xf32>
    tpu.vector_store %arg8[%c0_59, %c0_60], %50 {strides = array<i32>} : memref<288x128xf32, #tpu.memory_space<vmem>>, vector<288x128xf32>,
    %c0_61 = arith.constant 0 : index
    %c36 = arith.constant 36 : index
    %c0_62 = arith.constant 0 : index
    %52 = vector.load %arg1[%c0_61, %c36, %c0_62] : memref<1x326x128xf32, #tpu.memory_space<vmem>>, vector<1x288x128xf32>
    %53 = vector.shape_cast %52 : vector<1x288x128xf32> to vector<288x128xf32>
    %c6 = arith.constant 6 : index
    %c0_63 = arith.constant 0 : index
    %c0_64 = arith.constant 0 : index
    %54 = vector.load %arg3[%c6, %c0_63, %c0_64] : memref<9x128x128xf32, #tpu.memory_space<vmem>>, vector<1x128x128xf32>
    %55 = vector.shape_cast %54 : vector<1x128x128xf32> to vector<128x128xf32>
    %cst_65 = arith.constant dense<0.000000e+00> : vector<288x128xf32>
    %56 = tpu.matmul %53, %55, %cst_65 {dimension_numbers = #tpu.dot_dimension_numbers<[1], [0], [0], [1], [0, 0, 1, 1], [], []>} : vector<288x128xf32>, vector<128x128xf32>, vector<288x128xf32> -> vector<288x128xf32>
    %c0_66 = arith.constant 0 : index
    %c0_67 = arith.constant 0 : index
    %57 = vector.load %arg8[%c0_66, %c0_67] : memref<288x128xf32, #tpu.memory_space<vmem>>, vector<288x128xf32>
    %58 = arith.addf %57, %56 : vector<288x128xf32>
    %c0_68 = arith.constant 0 : index
    %c0_69 = arith.constant 0 : index
    %59 = vector.load %arg8[%c0_68, %c0_69] : memref<288x128xf32, #tpu.memory_space<vmem>>, vector<288x128xf32>
    tpu.vector_store %arg8[%c0_68, %c0_69], %58 {strides = array<i32>} : memref<288x128xf32, #tpu.memory_space<vmem>>, vector<288x128xf32>,
    %c0_70 = arith.constant 0 : index
    %c37 = arith.constant 37 : index
    %c0_71 = arith.constant 0 : index
    %60 = vector.load %arg1[%c0_70, %c37, %c0_71] : memref<1x326x128xf32, #tpu.memory_space<vmem>>, vector<1x288x128xf32>
    %61 = vector.shape_cast %60 : vector<1x288x128xf32> to vector<288x128xf32>
    %c7 = arith.constant 7 : index
    %c0_72 = arith.constant 0 : index
    %c0_73 = arith.constant 0 : index
    %62 = vector.load %arg3[%c7, %c0_72, %c0_73] : memref<9x128x128xf32, #tpu.memory_space<vmem>>, vector<1x128x128xf32>
    %63 = vector.shape_cast %62 : vector<1x128x128xf32> to vector<128x128xf32>
    %cst_74 = arith.constant dense<0.000000e+00> : vector<288x128xf32>
    %64 = tpu.matmul %61, %63, %cst_74 {dimension_numbers = #tpu.dot_dimension_numbers<[1], [0], [0], [1], [0, 0, 1, 1], [], []>} : vector<288x128xf32>, vector<128x128xf32>, vector<288x128xf32> -> vector<288x128xf32>
    %c0_75 = arith.constant 0 : index
    %c0_76 = arith.constant 0 : index
    %65 = vector.load %arg8[%c0_75, %c0_76] : memref<288x128xf32, #tpu.memory_space<vmem>>, vector<288x128xf32>
    %66 = arith.addf %65, %64 : vector<288x128xf32>
    %c0_77 = arith.constant 0 : index
    %c0_78 = arith.constant 0 : index
    %67 = vector.load %arg8[%c0_77, %c0_78] : memref<288x128xf32, #tpu.memory_space<vmem>>, vector<288x128xf32>
    tpu.vector_store %arg8[%c0_77, %c0_78], %66 {strides = array<i32>} : memref<288x128xf32, #tpu.memory_space<vmem>>, vector<288x128xf32>,
    %c0_79 = arith.constant 0 : index
    %c38 = arith.constant 38 : index
    %c0_80 = arith.constant 0 : index
    %68 = vector.load %arg1[%c0_79, %c38, %c0_80] : memref<1x326x128xf32, #tpu.memory_space<vmem>>, vector<1x288x128xf32>
    %69 = vector.shape_cast %68 : vector<1x288x128xf32> to vector<288x128xf32>
    %c8 = arith.constant 8 : index
    %c0_81 = arith.constant 0 : index
    %c0_82 = arith.constant 0 : index
    %70 = vector.load %arg3[%c8, %c0_81, %c0_82] : memref<9x128x128xf32, #tpu.memory_space<vmem>>, vector<1x128x128xf32>
    %71 = vector.shape_cast %70 : vector<1x128x128xf32> to vector<128x128xf32>
    %cst_83 = arith.constant dense<0.000000e+00> : vector<288x128xf32>
    %72 = tpu.matmul %69, %71, %cst_83 {dimension_numbers = #tpu.dot_dimension_numbers<[1], [0], [0], [1], [0, 0, 1, 1], [], []>} : vector<288x128xf32>, vector<128x128xf32>, vector<288x128xf32> -> vector<288x128xf32>
    %c0_84 = arith.constant 0 : index
    %c0_85 = arith.constant 0 : index
    %73 = vector.load %arg8[%c0_84, %c0_85] : memref<288x128xf32, #tpu.memory_space<vmem>>, vector<288x128xf32>
    %74 = arith.addf %73, %72 : vector<288x128xf32>
    %c0_86 = arith.constant 0 : index
    %c0_87 = arith.constant 0 : index
    %75 = vector.load %arg8[%c0_86, %c0_87] : memref<288x128xf32, #tpu.memory_space<vmem>>, vector<288x128xf32>
    tpu.vector_store %arg8[%c0_86, %c0_87], %74 {strides = array<i32>} : memref<288x128xf32, #tpu.memory_space<vmem>>, vector<288x128xf32>,
    %c0_88 = arith.constant 0 : index
    %c0_89 = arith.constant 0 : index
    %76 = vector.load %arg8[%c0_88, %c0_89] : memref<288x128xf32, #tpu.memory_space<vmem>>, vector<288x128xf32>
    %c0_90 = arith.constant 0 : index
    %c0_91 = arith.constant 0 : index
    %77 = vector.load %arg4[%c0_90, %c0_91] : memref<1x128xf32, #tpu.memory_space<vmem>>, vector<1x128xf32>
    %78 = vector.broadcast %77 : vector<1x128xf32> to vector<288x128xf32>
    %79 = arith.addf %76, %78 : vector<288x128xf32>
    %cst_92 = arith.constant 0.000000e+00 : f32
    %80 = vector.broadcast %cst_92 : f32 to vector<288x128xf32>
    %81 = arith.maximumf %79, %80 : vector<288x128xf32>
    %c0_93 = arith.constant 0 : index
    %c0_94 = arith.constant 0 : index
    %82 = vector.load %arg2[%c0_93, %c0_94] : memref<288x1xf32, #tpu.memory_space<vmem>>, vector<288x1xf32>
    %83 = vector.broadcast %82 : vector<288x1xf32> to vector<288x128xf32>
    %84 = arith.mulf %81, %83 : vector<288x128xf32>
    %c19_95 = arith.constant 19 : index
    %c0_96 = arith.constant 0 : index
    %85 = vector.load %arg9[%c19_95, %c0_96] : memref<326x128xf32, #tpu.memory_space<vmem>>, vector<288x128xf32>
    tpu.vector_store %arg9[%c19_95, %c0_96], %84 {strides = array<i32>} : memref<326x128xf32, #tpu.memory_space<vmem>>, vector<288x128xf32>,
    %c0_97 = arith.constant 0 : index
    %c0_98 = arith.constant 0 : index
    %86 = vector.load %arg9[%c0_97, %c0_98] : memref<326x128xf32, #tpu.memory_space<vmem>>, vector<288x128xf32>
    %c0_99 = arith.constant 0 : index
    %c0_100 = arith.constant 0 : index
    %c0_101 = arith.constant 0 : index
    %87 = vector.load %arg5[%c0_99, %c0_100, %c0_101] : memref<9x128x128xf32, #tpu.memory_space<vmem>>, vector<1x128x128xf32>
    %88 = vector.shape_cast %87 : vector<1x128x128xf32> to vector<128x128xf32>
    %cst_102 = arith.constant dense<0.000000e+00> : vector<288x128xf32>
    %89 = tpu.matmul %86, %88, %cst_102 {dimension_numbers = #tpu.dot_dimension_numbers<[1], [0], [0], [1], [0, 0, 1, 1], [], []>} : vector<288x128xf32>, vector<128x128xf32>, vector<288x128xf32> -> vector<288x128xf32>
    %c0_103 = arith.constant 0 : index
    %c0_104 = arith.constant 0 : index
    %90 = vector.load %arg8[%c0_103, %c0_104] : memref<288x128xf32, #tpu.memory_space<vmem>>, vector<288x128xf32>
    tpu.vector_store %arg8[%c0_103, %c0_104], %89 {strides = array<i32>} : memref<288x128xf32, #tpu.memory_space<vmem>>, vector<288x128xf32>,
    %c1_105 = arith.constant 1 : index
    %c0_106 = arith.constant 0 : index
    %91 = vector.load %arg9[%c1_105, %c0_106] : memref<326x128xf32, #tpu.memory_space<vmem>>, vector<288x128xf32>
    %c1_107 = arith.constant 1 : index
    %c0_108 = arith.constant 0 : index
    %c0_109 = arith.constant 0 : index
    %92 = vector.load %arg5[%c1_107, %c0_108, %c0_109] : memref<9x128x128xf32, #tpu.memory_space<vmem>>, vector<1x128x128xf32>
    %93 = vector.shape_cast %92 : vector<1x128x128xf32> to vector<128x128xf32>
    %cst_110 = arith.constant dense<0.000000e+00> : vector<288x128xf32>
    %94 = tpu.matmul %91, %93, %cst_110 {dimension_numbers = #tpu.dot_dimension_numbers<[1], [0], [0], [1], [0, 0, 1, 1], [], []>} : vector<288x128xf32>, vector<128x128xf32>, vector<288x128xf32> -> vector<288x128xf32>
    %c0_111 = arith.constant 0 : index
    %c0_112 = arith.constant 0 : index
    %95 = vector.load %arg8[%c0_111, %c0_112] : memref<288x128xf32, #tpu.memory_space<vmem>>, vector<288x128xf32>
    %96 = arith.addf %95, %94 : vector<288x128xf32>
    %c0_113 = arith.constant 0 : index
    %c0_114 = arith.constant 0 : index
    %97 = vector.load %arg8[%c0_113, %c0_114] : memref<288x128xf32, #tpu.memory_space<vmem>>, vector<288x128xf32>
    tpu.vector_store %arg8[%c0_113, %c0_114], %96 {strides = array<i32>} : memref<288x128xf32, #tpu.memory_space<vmem>>, vector<288x128xf32>,
    %c2_115 = arith.constant 2 : index
    %c0_116 = arith.constant 0 : index
    %98 = vector.load %arg9[%c2_115, %c0_116] : memref<326x128xf32, #tpu.memory_space<vmem>>, vector<288x128xf32>
    %c2_117 = arith.constant 2 : index
    %c0_118 = arith.constant 0 : index
    %c0_119 = arith.constant 0 : index
    %99 = vector.load %arg5[%c2_117, %c0_118, %c0_119] : memref<9x128x128xf32, #tpu.memory_space<vmem>>, vector<1x128x128xf32>
    %100 = vector.shape_cast %99 : vector<1x128x128xf32> to vector<128x128xf32>
    %cst_120 = arith.constant dense<0.000000e+00> : vector<288x128xf32>
    %101 = tpu.matmul %98, %100, %cst_120 {dimension_numbers = #tpu.dot_dimension_numbers<[1], [0], [0], [1], [0, 0, 1, 1], [], []>} : vector<288x128xf32>, vector<128x128xf32>, vector<288x128xf32> -> vector<288x128xf32>
    %c0_121 = arith.constant 0 : index
    %c0_122 = arith.constant 0 : index
    %102 = vector.load %arg8[%c0_121, %c0_122] : memref<288x128xf32, #tpu.memory_space<vmem>>, vector<288x128xf32>
    %103 = arith.addf %102, %101 : vector<288x128xf32>
    %c0_123 = arith.constant 0 : index
    %c0_124 = arith.constant 0 : index
    %104 = vector.load %arg8[%c0_123, %c0_124] : memref<288x128xf32, #tpu.memory_space<vmem>>, vector<288x128xf32>
    tpu.vector_store %arg8[%c0_123, %c0_124], %103 {strides = array<i32>} : memref<288x128xf32, #tpu.memory_space<vmem>>, vector<288x128xf32>,
    %c18_125 = arith.constant 18 : index
    %c0_126 = arith.constant 0 : index
    %105 = vector.load %arg9[%c18_125, %c0_126] : memref<326x128xf32, #tpu.memory_space<vmem>>, vector<288x128xf32>
    %c3_127 = arith.constant 3 : index
    %c0_128 = arith.constant 0 : index
    %c0_129 = arith.constant 0 : index
    %106 = vector.load %arg5[%c3_127, %c0_128, %c0_129] : memref<9x128x128xf32, #tpu.memory_space<vmem>>, vector<1x128x128xf32>
    %107 = vector.shape_cast %106 : vector<1x128x128xf32> to vector<128x128xf32>
    %cst_130 = arith.constant dense<0.000000e+00> : vector<288x128xf32>
    %108 = tpu.matmul %105, %107, %cst_130 {dimension_numbers = #tpu.dot_dimension_numbers<[1], [0], [0], [1], [0, 0, 1, 1], [], []>} : vector<288x128xf32>, vector<128x128xf32>, vector<288x128xf32> -> vector<288x128xf32>
    %c0_131 = arith.constant 0 : index
    %c0_132 = arith.constant 0 : index
    %109 = vector.load %arg8[%c0_131, %c0_132] : memref<288x128xf32, #tpu.memory_space<vmem>>, vector<288x128xf32>
    %110 = arith.addf %109, %108 : vector<288x128xf32>
    %c0_133 = arith.constant 0 : index
    %c0_134 = arith.constant 0 : index
    %111 = vector.load %arg8[%c0_133, %c0_134] : memref<288x128xf32, #tpu.memory_space<vmem>>, vector<288x128xf32>
    tpu.vector_store %arg8[%c0_133, %c0_134], %110 {strides = array<i32>} : memref<288x128xf32, #tpu.memory_space<vmem>>, vector<288x128xf32>,
    %c19_135 = arith.constant 19 : index
    %c0_136 = arith.constant 0 : index
    %112 = vector.load %arg9[%c19_135, %c0_136] : memref<326x128xf32, #tpu.memory_space<vmem>>, vector<288x128xf32>
    %c4_137 = arith.constant 4 : index
    %c0_138 = arith.constant 0 : index
    %c0_139 = arith.constant 0 : index
    %113 = vector.load %arg5[%c4_137, %c0_138, %c0_139] : memref<9x128x128xf32, #tpu.memory_space<vmem>>, vector<1x128x128xf32>
    %114 = vector.shape_cast %113 : vector<1x128x128xf32> to vector<128x128xf32>
    %cst_140 = arith.constant dense<0.000000e+00> : vector<288x128xf32>
    %115 = tpu.matmul %112, %114, %cst_140 {dimension_numbers = #tpu.dot_dimension_numbers<[1], [0], [0], [1], [0, 0, 1, 1], [], []>} : vector<288x128xf32>, vector<128x128xf32>, vector<288x128xf32> -> vector<288x128xf32>
    %c0_141 = arith.constant 0 : index
    %c0_142 = arith.constant 0 : index
    %116 = vector.load %arg8[%c0_141, %c0_142] : memref<288x128xf32, #tpu.memory_space<vmem>>, vector<288x128xf32>
    %117 = arith.addf %116, %115 : vector<288x128xf32>
    %c0_143 = arith.constant 0 : index
    %c0_144 = arith.constant 0 : index
    %118 = vector.load %arg8[%c0_143, %c0_144] : memref<288x128xf32, #tpu.memory_space<vmem>>, vector<288x128xf32>
    tpu.vector_store %arg8[%c0_143, %c0_144], %117 {strides = array<i32>} : memref<288x128xf32, #tpu.memory_space<vmem>>, vector<288x128xf32>,
    %c20_145 = arith.constant 20 : index
    %c0_146 = arith.constant 0 : index
    %119 = vector.load %arg9[%c20_145, %c0_146] : memref<326x128xf32, #tpu.memory_space<vmem>>, vector<288x128xf32>
    %c5_147 = arith.constant 5 : index
    %c0_148 = arith.constant 0 : index
    %c0_149 = arith.constant 0 : index
    %120 = vector.load %arg5[%c5_147, %c0_148, %c0_149] : memref<9x128x128xf32, #tpu.memory_space<vmem>>, vector<1x128x128xf32>
    %121 = vector.shape_cast %120 : vector<1x128x128xf32> to vector<128x128xf32>
    %cst_150 = arith.constant dense<0.000000e+00> : vector<288x128xf32>
    %122 = tpu.matmul %119, %121, %cst_150 {dimension_numbers = #tpu.dot_dimension_numbers<[1], [0], [0], [1], [0, 0, 1, 1], [], []>} : vector<288x128xf32>, vector<128x128xf32>, vector<288x128xf32> -> vector<288x128xf32>
    %c0_151 = arith.constant 0 : index
    %c0_152 = arith.constant 0 : index
    %123 = vector.load %arg8[%c0_151, %c0_152] : memref<288x128xf32, #tpu.memory_space<vmem>>, vector<288x128xf32>
    %124 = arith.addf %123, %122 : vector<288x128xf32>
    %c0_153 = arith.constant 0 : index
    %c0_154 = arith.constant 0 : index
    %125 = vector.load %arg8[%c0_153, %c0_154] : memref<288x128xf32, #tpu.memory_space<vmem>>, vector<288x128xf32>
    tpu.vector_store %arg8[%c0_153, %c0_154], %124 {strides = array<i32>} : memref<288x128xf32, #tpu.memory_space<vmem>>, vector<288x128xf32>,
    %c36_155 = arith.constant 36 : index
    %c0_156 = arith.constant 0 : index
    %126 = vector.load %arg9[%c36_155, %c0_156] : memref<326x128xf32, #tpu.memory_space<vmem>>, vector<288x128xf32>
    %c6_157 = arith.constant 6 : index
    %c0_158 = arith.constant 0 : index
    %c0_159 = arith.constant 0 : index
    %127 = vector.load %arg5[%c6_157, %c0_158, %c0_159] : memref<9x128x128xf32, #tpu.memory_space<vmem>>, vector<1x128x128xf32>
    %128 = vector.shape_cast %127 : vector<1x128x128xf32> to vector<128x128xf32>
    %cst_160 = arith.constant dense<0.000000e+00> : vector<288x128xf32>
    %129 = tpu.matmul %126, %128, %cst_160 {dimension_numbers = #tpu.dot_dimension_numbers<[1], [0], [0], [1], [0, 0, 1, 1], [], []>} : vector<288x128xf32>, vector<128x128xf32>, vector<288x128xf32> -> vector<288x128xf32>
    %c0_161 = arith.constant 0 : index
    %c0_162 = arith.constant 0 : index
    %130 = vector.load %arg8[%c0_161, %c0_162] : memref<288x128xf32, #tpu.memory_space<vmem>>, vector<288x128xf32>
    %131 = arith.addf %130, %129 : vector<288x128xf32>
    %c0_163 = arith.constant 0 : index
    %c0_164 = arith.constant 0 : index
    %132 = vector.load %arg8[%c0_163, %c0_164] : memref<288x128xf32, #tpu.memory_space<vmem>>, vector<288x128xf32>
    tpu.vector_store %arg8[%c0_163, %c0_164], %131 {strides = array<i32>} : memref<288x128xf32, #tpu.memory_space<vmem>>, vector<288x128xf32>,
    %c37_165 = arith.constant 37 : index
    %c0_166 = arith.constant 0 : index
    %133 = vector.load %arg9[%c37_165, %c0_166] : memref<326x128xf32, #tpu.memory_space<vmem>>, vector<288x128xf32>
    %c7_167 = arith.constant 7 : index
    %c0_168 = arith.constant 0 : index
    %c0_169 = arith.constant 0 : index
    %134 = vector.load %arg5[%c7_167, %c0_168, %c0_169] : memref<9x128x128xf32, #tpu.memory_space<vmem>>, vector<1x128x128xf32>
    %135 = vector.shape_cast %134 : vector<1x128x128xf32> to vector<128x128xf32>
    %cst_170 = arith.constant dense<0.000000e+00> : vector<288x128xf32>
    %136 = tpu.matmul %133, %135, %cst_170 {dimension_numbers = #tpu.dot_dimension_numbers<[1], [0], [0], [1], [0, 0, 1, 1], [], []>} : vector<288x128xf32>, vector<128x128xf32>, vector<288x128xf32> -> vector<288x128xf32>
    %c0_171 = arith.constant 0 : index
    %c0_172 = arith.constant 0 : index
    %137 = vector.load %arg8[%c0_171, %c0_172] : memref<288x128xf32, #tpu.memory_space<vmem>>, vector<288x128xf32>
    %138 = arith.addf %137, %136 : vector<288x128xf32>
    %c0_173 = arith.constant 0 : index
    %c0_174 = arith.constant 0 : index
    %139 = vector.load %arg8[%c0_173, %c0_174] : memref<288x128xf32, #tpu.memory_space<vmem>>, vector<288x128xf32>
    tpu.vector_store %arg8[%c0_173, %c0_174], %138 {strides = array<i32>} : memref<288x128xf32, #tpu.memory_space<vmem>>, vector<288x128xf32>,
    %c38_175 = arith.constant 38 : index
    %c0_176 = arith.constant 0 : index
    %140 = vector.load %arg9[%c38_175, %c0_176] : memref<326x128xf32, #tpu.memory_space<vmem>>, vector<288x128xf32>
    %c8_177 = arith.constant 8 : index
    %c0_178 = arith.constant 0 : index
    %c0_179 = arith.constant 0 : index
    %141 = vector.load %arg5[%c8_177, %c0_178, %c0_179] : memref<9x128x128xf32, #tpu.memory_space<vmem>>, vector<1x128x128xf32>
    %142 = vector.shape_cast %141 : vector<1x128x128xf32> to vector<128x128xf32>
    %cst_180 = arith.constant dense<0.000000e+00> : vector<288x128xf32>
    %143 = tpu.matmul %140, %142, %cst_180 {dimension_numbers = #tpu.dot_dimension_numbers<[1], [0], [0], [1], [0, 0, 1, 1], [], []>} : vector<288x128xf32>, vector<128x128xf32>, vector<288x128xf32> -> vector<288x128xf32>
    %c0_181 = arith.constant 0 : index
    %c0_182 = arith.constant 0 : index
    %144 = vector.load %arg8[%c0_181, %c0_182] : memref<288x128xf32, #tpu.memory_space<vmem>>, vector<288x128xf32>
    %145 = arith.addf %144, %143 : vector<288x128xf32>
    %c0_183 = arith.constant 0 : index
    %c0_184 = arith.constant 0 : index
    %146 = vector.load %arg8[%c0_183, %c0_184] : memref<288x128xf32, #tpu.memory_space<vmem>>, vector<288x128xf32>
    tpu.vector_store %arg8[%c0_183, %c0_184], %145 {strides = array<i32>} : memref<288x128xf32, #tpu.memory_space<vmem>>, vector<288x128xf32>,
    %c0_185 = arith.constant 0 : index
    %c0_186 = arith.constant 0 : index
    %147 = vector.load %arg8[%c0_185, %c0_186] : memref<288x128xf32, #tpu.memory_space<vmem>>, vector<288x128xf32>
    %c0_187 = arith.constant 0 : index
    %c0_188 = arith.constant 0 : index
    %148 = vector.load %arg6[%c0_187, %c0_188] : memref<1x128xf32, #tpu.memory_space<vmem>>, vector<1x128xf32>
    %149 = vector.broadcast %148 : vector<1x128xf32> to vector<288x128xf32>
    %150 = arith.addf %147, %149 : vector<288x128xf32>
    %cst_189 = arith.constant 0.000000e+00 : f32
    %151 = vector.broadcast %cst_189 : f32 to vector<288x128xf32>
    %152 = arith.maximumf %150, %151 : vector<288x128xf32>
    %c0_190 = arith.constant 0 : index
    %c0_191 = arith.constant 0 : index
    %153 = vector.load %arg2[%c0_190, %c0_191] : memref<288x1xf32, #tpu.memory_space<vmem>>, vector<288x1xf32>
    %154 = vector.broadcast %153 : vector<288x1xf32> to vector<288x128xf32>
    %155 = arith.mulf %152, %154 : vector<288x128xf32>
    %c0_192 = arith.constant 0 : index
    %c0_193 = arith.constant 0 : index
    %156 = vector.load %arg8[%c0_192, %c0_193] : memref<288x128xf32, #tpu.memory_space<vmem>>, vector<288x128xf32>
    tpu.vector_store %arg8[%c0_192, %c0_193], %155 {strides = array<i32>} : memref<288x128xf32, #tpu.memory_space<vmem>>, vector<288x128xf32>,
    %c0_194 = arith.constant 0 : index
    %c0_195 = arith.constant 0 : index
    %157 = tpu.strided_load %arg8[%c0_194, %c0_195] {strides = array<i32: 2, 1>} : memref<288x128xf32, #tpu.memory_space<vmem>>, vector<8x128xf32>
    %c1_196 = arith.constant 1 : index
    %c0_197 = arith.constant 0 : index
    %158 = tpu.strided_load %arg8[%c1_196, %c0_197] {strides = array<i32: 2, 1>} : memref<288x128xf32, #tpu.memory_space<vmem>>, vector<8x128xf32>
    %159 = arith.maximumf %157, %158 : vector<8x128xf32>
    %c18_198 = arith.constant 18 : index
    %c0_199 = arith.constant 0 : index
    %160 = tpu.strided_load %arg8[%c18_198, %c0_199] {strides = array<i32: 2, 1>} : memref<288x128xf32, #tpu.memory_space<vmem>>, vector<8x128xf32>
    %c19_200 = arith.constant 19 : index
    %c0_201 = arith.constant 0 : index
    %161 = tpu.strided_load %arg8[%c19_200, %c0_201] {strides = array<i32: 2, 1>} : memref<288x128xf32, #tpu.memory_space<vmem>>, vector<8x128xf32>
    %162 = arith.maximumf %160, %161 : vector<8x128xf32>
    %163 = arith.maximumf %159, %162 : vector<8x128xf32>
    %c0_202 = arith.constant 0 : index
    %c11 = arith.constant 11 : index
    %c0_203 = arith.constant 0 : index
    %164 = vector.load %arg7[%c0_202, %c11, %c0_203] : memref<1x102x128xf32, #tpu.memory_space<vmem>>, vector<1x8x128xf32>
    %165 = vector.shape_cast %164 : vector<1x8x128xf32> to vector<8x128xf32>
    %166 = vector.shape_cast %163 : vector<8x128xf32> to vector<1x8x128xf32>
    tpu.vector_store %arg7[%c0_202, %c11, %c0_203], %166 {strides = array<i32>} : memref<1x102x128xf32, #tpu.memory_space<vmem>>, vector<1x8x128xf32>,
    %c36_204 = arith.constant 36 : index
    %c0_205 = arith.constant 0 : index
    %167 = tpu.strided_load %arg8[%c36_204, %c0_205] {strides = array<i32: 2, 1>} : memref<288x128xf32, #tpu.memory_space<vmem>>, vector<8x128xf32>
    %c37_206 = arith.constant 37 : index
    %c0_207 = arith.constant 0 : index
    %168 = tpu.strided_load %arg8[%c37_206, %c0_207] {strides = array<i32: 2, 1>} : memref<288x128xf32, #tpu.memory_space<vmem>>, vector<8x128xf32>
    %169 = arith.maximumf %167, %168 : vector<8x128xf32>
    %c54 = arith.constant 54 : index
    %c0_208 = arith.constant 0 : index
    %170 = tpu.strided_load %arg8[%c54, %c0_208] {strides = array<i32: 2, 1>} : memref<288x128xf32, #tpu.memory_space<vmem>>, vector<8x128xf32>
    %c55 = arith.constant 55 : index
    %c0_209 = arith.constant 0 : index
    %171 = tpu.strided_load %arg8[%c55, %c0_209] {strides = array<i32: 2, 1>} : memref<288x128xf32, #tpu.memory_space<vmem>>, vector<8x128xf32>
    %172 = arith.maximumf %170, %171 : vector<8x128xf32>
    %173 = arith.maximumf %169, %172 : vector<8x128xf32>
    %c0_210 = arith.constant 0 : index
    %c21 = arith.constant 21 : index
    %c0_211 = arith.constant 0 : index
    %174 = vector.load %arg7[%c0_210, %c21, %c0_211] : memref<1x102x128xf32, #tpu.memory_space<vmem>>, vector<1x8x128xf32>
    %175 = vector.shape_cast %174 : vector<1x8x128xf32> to vector<8x128xf32>
    %176 = vector.shape_cast %173 : vector<8x128xf32> to vector<1x8x128xf32>
    tpu.vector_store %arg7[%c0_210, %c21, %c0_211], %176 {strides = array<i32>} : memref<1x102x128xf32, #tpu.memory_space<vmem>>, vector<1x8x128xf32>,
    %c72 = arith.constant 72 : index
    %c0_212 = arith.constant 0 : index
    %177 = tpu.strided_load %arg8[%c72, %c0_212] {strides = array<i32: 2, 1>} : memref<288x128xf32, #tpu.memory_space<vmem>>, vector<8x128xf32>
    %c73 = arith.constant 73 : index
    %c0_213 = arith.constant 0 : index
    %178 = tpu.strided_load %arg8[%c73, %c0_213] {strides = array<i32: 2, 1>} : memref<288x128xf32, #tpu.memory_space<vmem>>, vector<8x128xf32>
    %179 = arith.maximumf %177, %178 : vector<8x128xf32>
    %c90 = arith.constant 90 : index
    %c0_214 = arith.constant 0 : index
    %180 = tpu.strided_load %arg8[%c90, %c0_214] {strides = array<i32: 2, 1>} : memref<288x128xf32, #tpu.memory_space<vmem>>, vector<8x128xf32>
    %c91 = arith.constant 91 : index
    %c0_215 = arith.constant 0 : index
    %181 = tpu.strided_load %arg8[%c91, %c0_215] {strides = array<i32: 2, 1>} : memref<288x128xf32, #tpu.memory_space<vmem>>, vector<8x128xf32>
    %182 = arith.maximumf %180, %181 : vector<8x128xf32>
    %183 = arith.maximumf %179, %182 : vector<8x128xf32>
    %c0_216 = arith.constant 0 : index
    %c31 = arith.constant 31 : index
    %c0_217 = arith.constant 0 : index
    %184 = vector.load %arg7[%c0_216, %c31, %c0_217] : memref<1x102x128xf32, #tpu.memory_space<vmem>>, vector<1x8x128xf32>
    %185 = vector.shape_cast %184 : vector<1x8x128xf32> to vector<8x128xf32>
    %186 = vector.shape_cast %183 : vector<8x128xf32> to vector<1x8x128xf32>
    tpu.vector_store %arg7[%c0_216, %c31, %c0_217], %186 {strides = array<i32>} : memref<1x102x128xf32, #tpu.memory_space<vmem>>, vector<1x8x128xf32>,
    %c108 = arith.constant 108 : index
    %c0_218 = arith.constant 0 : index
    %187 = tpu.strided_load %arg8[%c108, %c0_218] {strides = array<i32: 2, 1>} : memref<288x128xf32, #tpu.memory_space<vmem>>, vector<8x128xf32>
    %c109 = arith.constant 109 : index
    %c0_219 = arith.constant 0 : index
    %188 = tpu.strided_load %arg8[%c109, %c0_219] {strides = array<i32: 2, 1>} : memref<288x128xf32, #tpu.memory_space<vmem>>, vector<8x128xf32>
    %189 = arith.maximumf %187, %188 : vector<8x128xf32>
    %c126 = arith.constant 126 : index
    %c0_220 = arith.constant 0 : index
    %190 = tpu.strided_load %arg8[%c126, %c0_220] {strides = array<i32: 2, 1>} : memref<288x128xf32, #tpu.memory_space<vmem>>, vector<8x128xf32>
    %c127 = arith.constant 127 : index
    %c0_221 = arith.constant 0 : index
    %191 = tpu.strided_load %arg8[%c127, %c0_221] {strides = array<i32: 2, 1>} : memref<288x128xf32, #tpu.memory_space<vmem>>, vector<8x128xf32>
    %192 = arith.maximumf %190, %191 : vector<8x128xf32>
    %193 = arith.maximumf %189, %192 : vector<8x128xf32>
    %c0_222 = arith.constant 0 : index
    %c41 = arith.constant 41 : index
    %c0_223 = arith.constant 0 : index
    %194 = vector.load %arg7[%c0_222, %c41, %c0_223] : memref<1x102x128xf32, #tpu.memory_space<vmem>>, vector<1x8x128xf32>
    %195 = vector.shape_cast %194 : vector<1x8x128xf32> to vector<8x128xf32>
    %196 = vector.shape_cast %193 : vector<8x128xf32> to vector<1x8x128xf32>
    tpu.vector_store %arg7[%c0_222, %c41, %c0_223], %196 {strides = array<i32>} : memref<1x102x128xf32, #tpu.memory_space<vmem>>, vector<1x8x128xf32>,
    %c144 = arith.constant 144 : index
    %c0_224 = arith.constant 0 : index
    %197 = tpu.strided_load %arg8[%c144, %c0_224] {strides = array<i32: 2, 1>} : memref<288x128xf32, #tpu.memory_space<vmem>>, vector<8x128xf32>
    %c145 = arith.constant 145 : index
    %c0_225 = arith.constant 0 : index
    %198 = tpu.strided_load %arg8[%c145, %c0_225] {strides = array<i32: 2, 1>} : memref<288x128xf32, #tpu.memory_space<vmem>>, vector<8x128xf32>
    %199 = arith.maximumf %197, %198 : vector<8x128xf32>
    %c162 = arith.constant 162 : index
    %c0_226 = arith.constant 0 : index
    %200 = tpu.strided_load %arg8[%c162, %c0_226] {strides = array<i32: 2, 1>} : memref<288x128xf32, #tpu.memory_space<vmem>>, vector<8x128xf32>
    %c163 = arith.constant 163 : index
    %c0_227 = arith.constant 0 : index
    %201 = tpu.strided_load %arg8[%c163, %c0_227] {strides = array<i32: 2, 1>} : memref<288x128xf32, #tpu.memory_space<vmem>>, vector<8x128xf32>
    %202 = arith.maximumf %200, %201 : vector<8x128xf32>
    %203 = arith.maximumf %199, %202 : vector<8x128xf32>
    %c0_228 = arith.constant 0 : index
    %c51 = arith.constant 51 : index
    %c0_229 = arith.constant 0 : index
    %204 = vector.load %arg7[%c0_228, %c51, %c0_229] : memref<1x102x128xf32, #tpu.memory_space<vmem>>, vector<1x8x128xf32>
    %205 = vector.shape_cast %204 : vector<1x8x128xf32> to vector<8x128xf32>
    %206 = vector.shape_cast %203 : vector<8x128xf32> to vector<1x8x128xf32>
    tpu.vector_store %arg7[%c0_228, %c51, %c0_229], %206 {strides = array<i32>} : memref<1x102x128xf32, #tpu.memory_space<vmem>>, vector<1x8x128xf32>,
    %c180 = arith.constant 180 : index
    %c0_230 = arith.constant 0 : index
    %207 = tpu.strided_load %arg8[%c180, %c0_230] {strides = array<i32: 2, 1>} : memref<288x128xf32, #tpu.memory_space<vmem>>, vector<8x128xf32>
    %c181 = arith.constant 181 : index
    %c0_231 = arith.constant 0 : index
    %208 = tpu.strided_load %arg8[%c181, %c0_231] {strides = array<i32: 2, 1>} : memref<288x128xf32, #tpu.memory_space<vmem>>, vector<8x128xf32>
    %209 = arith.maximumf %207, %208 : vector<8x128xf32>
    %c198 = arith.constant 198 : index
    %c0_232 = arith.constant 0 : index
    %210 = tpu.strided_load %arg8[%c198, %c0_232] {strides = array<i32: 2, 1>} : memref<288x128xf32, #tpu.memory_space<vmem>>, vector<8x128xf32>
    %c199 = arith.constant 199 : index
    %c0_233 = arith.constant 0 : index
    %211 = tpu.strided_load %arg8[%c199, %c0_233] {strides = array<i32: 2, 1>} : memref<288x128xf32, #tpu.memory_space<vmem>>, vector<8x128xf32>
    %212 = arith.maximumf %210, %211 : vector<8x128xf32>
    %213 = arith.maximumf %209, %212 : vector<8x128xf32>
    %c0_234 = arith.constant 0 : index
    %c61 = arith.constant 61 : index
    %c0_235 = arith.constant 0 : index
    %214 = vector.load %arg7[%c0_234, %c61, %c0_235] : memref<1x102x128xf32, #tpu.memory_space<vmem>>, vector<1x8x128xf32>
    %215 = vector.shape_cast %214 : vector<1x8x128xf32> to vector<8x128xf32>
    %216 = vector.shape_cast %213 : vector<8x128xf32> to vector<1x8x128xf32>
    tpu.vector_store %arg7[%c0_234, %c61, %c0_235], %216 {strides = array<i32>} : memref<1x102x128xf32, #tpu.memory_space<vmem>>, vector<1x8x128xf32>,
    %c216 = arith.constant 216 : index
    %c0_236 = arith.constant 0 : index
    %217 = tpu.strided_load %arg8[%c216, %c0_236] {strides = array<i32: 2, 1>} : memref<288x128xf32, #tpu.memory_space<vmem>>, vector<8x128xf32>
    %c217 = arith.constant 217 : index
    %c0_237 = arith.constant 0 : index
    %218 = tpu.strided_load %arg8[%c217, %c0_237] {strides = array<i32: 2, 1>} : memref<288x128xf32, #tpu.memory_space<vmem>>, vector<8x128xf32>
    %219 = arith.maximumf %217, %218 : vector<8x128xf32>
    %c234 = arith.constant 234 : index
    %c0_238 = arith.constant 0 : index
    %220 = tpu.strided_load %arg8[%c234, %c0_238] {strides = array<i32: 2, 1>} : memref<288x128xf32, #tpu.memory_space<vmem>>, vector<8x128xf32>
    %c235 = arith.constant 235 : index
    %c0_239 = arith.constant 0 : index
    %221 = tpu.strided_load %arg8[%c235, %c0_239] {strides = array<i32: 2, 1>} : memref<288x128xf32, #tpu.memory_space<vmem>>, vector<8x128xf32>
    %222 = arith.maximumf %220, %221 : vector<8x128xf32>
    %223 = arith.maximumf %219, %222 : vector<8x128xf32>
    %c0_240 = arith.constant 0 : index
    %c71 = arith.constant 71 : index
    %c0_241 = arith.constant 0 : index
    %224 = vector.load %arg7[%c0_240, %c71, %c0_241] : memref<1x102x128xf32, #tpu.memory_space<vmem>>, vector<1x8x128xf32>
    %225 = vector.shape_cast %224 : vector<1x8x128xf32> to vector<8x128xf32>
    %226 = vector.shape_cast %223 : vector<8x128xf32> to vector<1x8x128xf32>
    tpu.vector_store %arg7[%c0_240, %c71, %c0_241], %226 {strides = array<i32>} : memref<1x102x128xf32, #tpu.memory_space<vmem>>, vector<1x8x128xf32>,
    %c252 = arith.constant 252 : index
    %c0_242 = arith.constant 0 : index
    %227 = tpu.strided_load %arg8[%c252, %c0_242] {strides = array<i32: 2, 1>} : memref<288x128xf32, #tpu.memory_space<vmem>>, vector<8x128xf32>
    %c253 = arith.constant 253 : index
    %c0_243 = arith.constant 0 : index
    %228 = tpu.strided_load %arg8[%c253, %c0_243] {strides = array<i32: 2, 1>} : memref<288x128xf32, #tpu.memory_space<vmem>>, vector<8x128xf32>
    %229 = arith.maximumf %227, %228 : vector<8x128xf32>
    %c270 = arith.constant 270 : index
    %c0_244 = arith.constant 0 : index
    %230 = tpu.strided_load %arg8[%c270, %c0_244] {strides = array<i32: 2, 1>} : memref<288x128xf32, #tpu.memory_space<vmem>>, vector<8x128xf32>
    %c271 = arith.constant 271 : index
    %c0_245 = arith.constant 0 : index
    %231 = tpu.strided_load %arg8[%c271, %c0_245] {strides = array<i32: 2, 1>} : memref<288x128xf32, #tpu.memory_space<vmem>>, vector<8x128xf32>
    %232 = arith.maximumf %230, %231 : vector<8x128xf32>
    %233 = arith.maximumf %229, %232 : vector<8x128xf32>
    %c0_246 = arith.constant 0 : index
    %c81 = arith.constant 81 : index
    %c0_247 = arith.constant 0 : index
    %234 = vector.load %arg7[%c0_246, %c81, %c0_247] : memref<1x102x128xf32, #tpu.memory_space<vmem>>, vector<1x8x128xf32>
    %235 = vector.shape_cast %234 : vector<1x8x128xf32> to vector<8x128xf32>
    %236 = vector.shape_cast %233 : vector<8x128xf32> to vector<1x8x128xf32>
    tpu.vector_store %arg7[%c0_246, %c81, %c0_247], %236 {strides = array<i32>} : memref<1x102x128xf32, #tpu.memory_space<vmem>>, vector<1x8x128xf32>,
    return
  }
  func.func @transform_0(%arg0: i32) -> (i32, i32, i32) {
    %c0_i32 = arith.constant 0 : i32
    %c0_i32_0 = arith.constant 0 : i32
    %c0_i32_1 = arith.constant 0 : i32
    return %arg0, %c0_i32, %c0_i32_0 : i32, i32, i32
  }
  func.func @transform_1(%arg0: i32) -> (i32, i32) {
    %c0_i32 = arith.constant 0 : i32
    %c0_i32_0 = arith.constant 0 : i32
    %c0_i32_1 = arith.constant 0 : i32
    return %c0_i32, %c0_i32_0 : i32, i32
  }
  func.func @transform_2(%arg0: i32) -> (i32, i32, i32) {
    %c0_i32 = arith.constant 0 : i32
    %c0_i32_0 = arith.constant 0 : i32
    %c0_i32_1 = arith.constant 0 : i32
    %c0_i32_2 = arith.constant 0 : i32
    return %c0_i32, %c0_i32_0, %c0_i32_1 : i32, i32, i32
  }
  func.func @transform_3(%arg0: i32) -> (i32, i32) {
    %c0_i32 = arith.constant 0 : i32
    %c0_i32_0 = arith.constant 0 : i32
    %c0_i32_1 = arith.constant 0 : i32
    return %c0_i32, %c0_i32_0 : i32, i32
  }
  func.func @transform_4(%arg0: i32) -> (i32, i32, i32) {
    %c0_i32 = arith.constant 0 : i32
    %c0_i32_0 = arith.constant 0 : i32
    %c0_i32_1 = arith.constant 0 : i32
    %c0_i32_2 = arith.constant 0 : i32
    return %c0_i32, %c0_i32_0, %c0_i32_1 : i32, i32, i32
  }
  func.func @transform_5(%arg0: i32) -> (i32, i32) {
    %c0_i32 = arith.constant 0 : i32
    %c0_i32_0 = arith.constant 0 : i32
    %c0_i32_1 = arith.constant 0 : i32
    return %c0_i32, %c0_i32_0 : i32, i32
  }
  func.func @transform_6(%arg0: i32) -> (i32, i32, i32) {
    %c0_i32 = arith.constant 0 : i32
    %c0_i32_0 = arith.constant 0 : i32
    %c0_i32_1 = arith.constant 0 : i32
    return %arg0, %c0_i32, %c0_i32_0 : i32, i32, i32
  }
}

</mosaic_0001>

<bundles_post_ra>
// kernel: tpu_custom_call.1
= control target key start
LH: loop header
LB: loop body
LE: loop exit
PB: predicated region body
PF: predicated region fallthrough
CT: control target
= control target key end

     0   :  { %11 = vsyncpa [#allocation5], 0  ;;  %s12336_s21 = smov 0   ;;  %s14081_s0 = inlined_call_operand.vmem [shape: f32[2,326,128], index: 0, kind: input, shape index: {}]   ;;  %s14082_s1 = inlined_call_operand.vmem [shape: f32[288,1], index: 1, kind: input, shape index: {}]   ;;  %s14083_s2 = inlined_call_operand.vmem [shape: f32[9,128,128], index: 2, kind: input, shape index: {}]   ;;  %s14084_s3 = inlined_call_operand.vmem [shape: f32[1,128], index: 3, kind: input, shape index: {}]   ;;  %s14085_s4 = inlined_call_operand.hbm [shape: f32[9,128,128], index: 4, kind: input, shape index: {}]   ;;  %s14086_s5 = inlined_call_operand.vmem [shape: f32[1,128], index: 5, kind: input, shape index: {}]   ;;  %s14087_s6 = inlined_call_operand.vmem [shape: f32[2,102,128], index: 6, kind: output, shape index: {}]  }
   0x1 LB: > { %s12342_s22 = sadd.s32 4294967295, %s12294_s21   ;;  %p8453_p0 = scmp.ge.s32.totalorder %s12294_s21, 1  ;;  %s12294_s21 = sphi %s12336_s21, %s17_s21  }
   0x2   : > { %p179_p1 = scmp.lt.s32.totalorder %s12294_s21, 3  ;;  %s12296_s23 = smov [#allocation4]  }
   0x3   : > { %s200_s24 = sshll.u32 %s12296_s23, 4  ;;  %p14088_p3 = scmp.eq.s32.totalorder %s12342_s22, 0  ;;  %s201_s24 = int_to_ptr.vmem [resolvable:$true] %s200_s24 }
   0x4   : > { %p12346_p2 = pnand %p8453_p0, %p179_p1  ;;  %s12256_s29 = scalar_lea.hbm %s14085_s4, 18432 }
   0x5   : > { %p12257_p6 = scmp.ne.s32.totalorder %s14085_s4, %s12256_s29  ;;  %p12263_p10 = scmp.lt.u32.totalorder %s12256_s29, %s14085_s4 }
   0x6   : > { %s14090_s25 = scalar_select %p12346_p2, 1, 0 }
   0x7   : > { %p12234_p4 = pneg %p12346_p2 }
   0x9   : > { %p12355_p5 = pnand %p14088_p3, %p12234_p4 }
   0xb   : > { %p12258_p7 = pneg %p12355_p5 }
   0xd   : > { %p12259_p8 = pnand %p12258_p7, %p12257_p6 }
   0xf   : > { %p12260_p9 = pneg %p12259_p8 }
  0x11   : > { %p12265_p11 = pnand %p12263_p10, %p12260_p9 }
  0x13   : > { %12268 = shalt.err (!%p12265_p11)
}
  0x14   : > { %s12269_s10 = scalar_lea.vmem %s201_s24, 18432  ;;  %p12277_p1 = scmp.lt.s32.totalorder %s201_s24, %s201_s24 }
  0x15   : > { %p12270_p12 = scmp.ne.s32.totalorder %s201_s24, %s12269_s10  ;;  %p12278_p4 = scmp.lt.s32.totalorder %s12269_s10, %s12269_s10 }
  0x17   : > { %p12272_p13 = pnand %p12270_p12, %p12258_p7  ;;  %p12279_p3 = por %p12278_p4, %p12277_p1 }
  0x19   : > { %p12273_p0 = pneg %p12272_p13 }
  0x1b   : > { %p12280_p2 = pnand %p12279_p3, %p12273_p0 }
  0x1d   : > { %12283 = shalt.err (!%p12280_p2)
}
  0x1e   : > { %s12297_s11 = smov 128   ;;  %s12298_s12 = smov 8  }
  0x1f   : > { %12237 = dma.hbm_to_vmem [thread:$0]  (!%p12355_p5), %s14085_s4, 18432, %s201_s24, [#allocation5], %s12297_s11, %s12297_s11, %s12298_s12  }
  0x20   : > { %p14092_p6 = scmp.ne.s32.totalorder %s14090_s25, 0 }
  0x21   : > { %p14093_p8 = scmp.eq.s32.totalorder (!%p14092_p6), %s12342_s22, 0 }
  0x22   : > { %227 = sbr.rel (%p14092_p6) target bundleno = 1753 (0x6d9), region = 44 }
  0x29   : > { %12289 = dma.done.wait (%p14093_p8), [#allocation5], 18432   ;;  %p14094_p7 = pmov %p14093_p8 }
  0x2a   : > { %p257_p2 = scmp.lt.s32.totalorder %s12342_s22, 1  ;;  %v357_v0 = vld [vmem:[%s14083_s2] sm:$0xff]  ;;  %v358_v1 = vld [vmem:[%s14083_s2 + $0x8] sm:$0xff]  ;;  %v359_v2 = vld [vmem:[%s14083_s2 + $0x10] sm:$0xff] }
  0x2b   : > { %12291 = vsyncadd (%p14094_p7), [#allocation5], 4294948864  ;;  %v11076_v3 = vpack.c.bf16 %v358_v1, %v357_v0  ;;  %v360_v4 = vld [vmem:[%s14083_s2 + $0x18] sm:$0xff]  ;;  %v361_v6 = vld [vmem:[%s14083_s2 + $0x20] sm:$0xff] }
  0x2c   : > { %s14096_s22 = smov (!%p257_p2, %s12342_s22), 1  ;;  %v11080_v5 = vpack.c.bf16 %v360_v4, %v359_v2  ;;  %v362_v7 = vld [vmem:[%s14083_s2 + $0x28] sm:$0xff]  ;;  %v363_v10 = vld [vmem:[%s14083_s2 + $0x30] sm:$0xff]  ;;  %v364_v11 = vld [vmem:[%s14083_s2 + $0x38] sm:$0xff] }
  0x2d   : > { %s12228_s15 = smul.u32 328, %s14096_s22  ;;  %11077 = vmatprep.subr.bf16.mxu0 %v11076_v3  ;;  %v11084_v8 = vpack.c.bf16 %v362_v7, %v361_v6  ;;  %v11088_v12 = vpack.c.bf16 %v364_v11, %v363_v10  ;;  %v365_v13 = vld [vmem:[%s14083_s2 + $0x40] sm:$0xff]  ;;  %v366_v14 = vld [vmem:[%s14083_s2 + $0x48] sm:$0xff]  ;;  %v367_v16 = vld [vmem:[%s14083_s2 + $0x50] sm:$0xff] }
  0x2e   : > { %11079 = vmatpush3.bf16.msra.mxu0 %v11076_v3  ;;  %v11092_v15 = vpack.c.bf16 %v366_v14, %v365_v13  ;;  %v368_v17 = vld [vmem:[%s14083_s2 + $0x58] sm:$0xff]  ;;  %v369_v19 = vld [vmem:[%s14083_s2 + $0x60] sm:$0xff]  ;;  %v370_v20 = vld [vmem:[%s14083_s2 + $0x68] sm:$0xff]  ;;  %s12229_s24 = smul.u32 104, %s14096_s22 }
  0x2f   : > { %s12407_s8 = scalar_lea.vmem %s14081_s0, %s12228_s15  ;;  %11081 = vmatprep.subr.bf16.mxu0 %v11080_v5  ;;  %v11096_v18 = vpack.c.bf16 %v368_v17, %v367_v16  ;;  %v11100_v21 = vpack.c.bf16 %v370_v20, %v369_v19  ;;  %v371_v22 = vld [vmem:[%s14083_s2 + $0x70] sm:$0xff]  ;;  %v372_v23 = vld [vmem:[%s14083_s2 + $0x78] sm:$0xff]  ;;  %v8460_v25 = vld [vmem:[%s14083_s2 + $0x80] sm:$0xff] }
  0x30   : > { %v321_v9 = vld [vmem:[%s12407_s8] sm:$0xff]  ;;  %v11104_v24 = vpack.c.bf16 %v372_v23, %v371_v22  ;;  %v8461_v26 = vld [vmem:[%s14083_s2 + $0x88] sm:$0xff]  ;;  %v8462_v28 = vld [vmem:[%s14083_s2 + $0x90] sm:$0xff]  ;;  %s13984_s27 = scalar_lea.vmem %s14087_s6, %s12229_s24 }
  0x31   : > { %9560 = vmatprep.mubr.f32.mxu0 %v321_v9  ;;  %v11108_v27 = vpack.c.bf16 %v8461_v26, %v8460_v25  ;;  %v8463_v29 = vld [vmem:[%s14083_s2 + $0x98] sm:$0xff]  ;;  %v322_v30 = vld [vmem:[%s12407_s8 + $0x8] sm:$0xff]  ;;  %v323_v31 = vld [vmem:[%s12407_s8 + $0x10] sm:$0xff] }
  0x32   : > { %11083 = vmatpush3.bf16.msra.mxu0 %v11080_v5  ;;  %v11112_v32 = vpack.c.bf16 %v8463_v29, %v8462_v28  ;;  %v8464_v33 = vld [vmem:[%s14083_s2 + $0xa0] sm:$0xff]  ;;  %v8465_v34 = vld [vmem:[%s14083_s2 + $0xa8] sm:$0xff]  ;;  %v324_v35 = vld [vmem:[%s12407_s8 + $0x18] sm:$0xff] }
  0x33   : > { %11085 = vmatprep.subr.bf16.mxu0 %v11084_v8  ;;  %v325_v36 = vld [vmem:[%s12407_s8 + $0x20] sm:$0xff]  ;;  %v11116_v37 = vpack.c.bf16 %v8465_v34, %v8464_v33  ;;  %v8466_v38 = vld [vmem:[%s14083_s2 + $0xb0] sm:$0xff]  ;;  %v8467_v39 = vld [vmem:[%s14083_s2 + $0xb8] sm:$0xff] }
  0x34   : > { %v326_v40 = vld [vmem:[%s12407_s8 + $0x28] sm:$0xff]  ;;  %v327_v41 = vld [vmem:[%s12407_s8 + $0x30] sm:$0xff]  ;;  %v11120_v42 = vpack.c.bf16 %v8467_v39, %v8466_v38  ;;  %v8468_v43 = vld [vmem:[%s14083_s2 + $0xc0] sm:$0xff] }
  0x35   : > { %v8469_v44 = vld [vmem:[%s14083_s2 + $0xc8] sm:$0xff]  ;;  %v328_v45 = vld [vmem:[%s12407_s8 + $0x38] sm:$0xff]  ;;  %v329_v46 = vld [vmem:[%s12407_s8 + $0x40] sm:$0xff] }
  0x36   : > { %11087 = vmatpush3.bf16.msra.mxu0 %v11084_v8  ;;  %v11124_v47 = vpack.c.bf16 %v8469_v44, %v8468_v43  ;;  %v8470_v48 = vld [vmem:[%s14083_s2 + $0xd0] sm:$0xff]  ;;  %v8471_v49 = vld [vmem:[%s14083_s2 + $0xd8] sm:$0xff]  ;;  %v330_v50 = vld [vmem:[%s12407_s8 + $0x48] sm:$0xff] }
  0x37   : > { %11089 = vmatprep.subr.bf16.mxu0 %v11088_v12  ;;  %v331_v51 = vld [vmem:[%s12407_s8 + $0x50] sm:$0xff]  ;;  %v11128_v52 = vpack.c.bf16 %v8471_v49, %v8470_v48  ;;  %v8472_v53 = vld [vmem:[%s14083_s2 + $0xe0] sm:$0xff]  ;;  %v8473_v54 = vld [vmem:[%s14083_s2 + $0xe8] sm:$0xff] }
  0x38   : > { %v332_v55 = vld [vmem:[%s12407_s8 + $0x58] sm:$0xff]  ;;  %v333_v56 = vld [vmem:[%s12407_s8 + $0x60] sm:$0xff]  ;;  %v11132_v57 = vpack.c.bf16 %v8473_v54, %v8472_v53  ;;  %v8474_v58 = vld [vmem:[%s14083_s2 + $0xf0] sm:$0xff] }
  0x39   : > { %v8475_v59 = vld [vmem:[%s14083_s2 + $0xf8] sm:$0xff]  ;;  %v334_v60 = vld [vmem:[%s12407_s8 + $0x68] sm:$0xff]  ;;  %v335_v61 = vld [vmem:[%s12407_s8 + $0x70] sm:$0xff] }
  0x3a   : > { %11091 = vmatpush3.bf16.msra.mxu0 %v11088_v12  ;;  %v11136_v62 = vpack.c.bf16 %v8475_v59, %v8474_v58  ;;  %v8476_v63 = vld [vmem:[%s14083_s2 + $0x100] sm:$0xff]  ;;  %v8477_v0 = vld [vmem:[%s14083_s2 + $0x108] sm:$0xff]  ;;  %v336_v1 = vld [vmem:[%s12407_s8 + $0x78] sm:$0xff] }
  0x3b   : > { %11093 = vmatprep.subr.bf16.mxu0 %v11092_v15  ;;  %v337_v2 = vld [vmem:[%s12407_s8 + $0x80] sm:$0xff]  ;;  %v11140_v3 = vpack.c.bf16 %v8477_v0, %v8476_v63  ;;  %v338_v4 = vld [vmem:[%s12407_s8 + $0x88] sm:$0xff]  ;;  %v339_v5 = vld [vmem:[%s12407_s8 + $0x90] sm:$0xff] }
  0x3c   : > { %v340_v6 = vld [vmem:[%s12407_s8 + $0x98] sm:$0xff]  ;;  %v341_v7 = vld [vmem:[%s12407_s8 + $0xa0] sm:$0xff]  ;;  %v342_v8 = vld [vmem:[%s12407_s8 + $0xa8] sm:$0xff] }
  0x3d   : > { %v343_v9 = vld [vmem:[%s12407_s8 + $0xb0] sm:$0xff]  ;;  %v344_v10 = vld [vmem:[%s12407_s8 + $0xb8] sm:$0xff]  ;;  %v345_v11 = vld [vmem:[%s12407_s8 + $0xc0] sm:$0xff] }
  0x3e   : > { %11095 = vmatpush3.bf16.msra.mxu0 %v11092_v15  ;;  %v346_v12 = vld [vmem:[%s12407_s8 + $0xc8] sm:$0xff]  ;;  %v347_v13 = vld [vmem:[%s12407_s8 + $0xd0] sm:$0xff]  ;;  %v348_v14 = vld [vmem:[%s12407_s8 + $0xd8] sm:$0xff] }
  0x3f   : > { %11097 = vmatprep.subr.bf16.mxu0 %v11096_v18  ;;  %v349_v15 = vld [vmem:[%s12407_s8 + $0xe0] sm:$0xff]  ;;  %v350_v16 = vld [vmem:[%s12407_s8 + $0xe8] sm:$0xff]  ;;  %v351_v17 = vld [vmem:[%s12407_s8 + $0xf0] sm:$0xff] }
  0x40   : > { %v353_v19 = vld [vmem:[%s12407_s8 + $0x100] sm:$0xff]  ;;  %v354_v20 = vld [vmem:[%s12407_s8 + $0x108] sm:$0xff]  ;;  %v356_v22 = vld [vmem:[%s12407_s8 + $0x118] sm:$0xff] }
  0x41   : > { %v654_v23 = vld [vmem:[%s12407_s8 + $0x1] sm:$0xff]  ;;  %v8479_v25 = vld [vmem:[%s14083_s2 + $0x118] sm:$0xff]  ;;  %v655_v26 = vld [vmem:[%s12407_s8 + $0x9] sm:$0xff] }
  0x42   : > { %11099 = vmatpush3.bf16.msra.mxu0 %v11096_v18  ;;  %v352_v18 = vld [vmem:[%s12407_s8 + $0xf8] sm:$0xff]  ;;  %v8480_v29 = vld [vmem:[%s14083_s2 + $0x120] sm:$0xff]  ;;  %v8482_v34 = vld [vmem:[%s14083_s2 + $0x130] sm:$0xff] }
  0x43   : > { %11101 = vmatprep.subr.bf16.mxu0 %v11100_v21  ;;  %v8484_v39 = vld [vmem:[%s14083_s2 + $0x140] sm:$0xff]  ;;  %v8486_v44 = vld [vmem:[%s14083_s2 + $0x150] sm:$0xff] }
  0x44   : > { %v8488_v49 = vld [vmem:[%s14083_s2 + $0x160] sm:$0xff]  ;;  %v8490_v54 = vld [vmem:[%s14083_s2 + $0x170] sm:$0xff] }
  0x45   : > { %v8492_v59 = vld [vmem:[%s14083_s2 + $0x180] sm:$0xff]  ;;  %v671_v0 = vld [vmem:[%s12407_s8 + $0x89] sm:$0xff] }
  0x46   : > { %11103 = vmatpush3.bf16.msra.mxu0 %v11100_v21  ;;  %v355_v21 = vld [vmem:[%s12407_s8 + $0x110] sm:$0xff] }
  0x47   : > { %11105 = vmatprep.subr.bf16.mxu0 %v11104_v24 }
  0x4a   : > { %11107 = vmatpush3.bf16.msra.mxu0 %v11104_v24  ;;  %v8478_v24 = vld [vmem:[%s14083_s2 + $0x110] sm:$0xff] }
  0x4b   : > { %11109 = vmatprep.subr.bf16.mxu0 %v11108_v27  ;;  %v11144_v28 = vpack.c.bf16 %v8479_v25, %v8478_v24  ;;  %v8496_v25 = vld [vmem:[%s14083_s2 + $0x1a0] sm:$0xff] }
  0x4d   : > { %9561 = vmatmul.mubr.f32.vlgmr.msra.gmra.mrb[0].mxu0 %v322_v30  ;;  %v8481_v30 = vld [vmem:[%s14083_s2 + $0x128] sm:$0xff] }
  0x4e   : > { %11111 = vmatpush3.bf16.msra.mxu0 %v11108_v27  ;;  %9563 = vmatprep.mubr.f32.mxu0 %v323_v31  ;;  %v656_v27 = vld [vmem:[%s12407_s8 + $0x11] sm:$0xff]  ;;  %v657_v31 = vld [vmem:[%s12407_s8 + $0x19] sm:$0xff]  ;;  %v11148_v33 = vpack.c.bf16 %v8481_v30, %v8480_v29 }
  0x4f   : > { %11113 = vmatprep.subr.bf16.mxu0 %v11112_v32  ;;  %v8498_v30 = vld [vmem:[%s14083_s2 + $0x1b0] sm:$0xff] }
  0x51   : > { %9564 = vmatmul.mubr.f32.gmra.mrb[2].mxu0 %v324_v35  ;;  %v8483_v35 = vld [vmem:[%s14083_s2 + $0x138] sm:$0xff] }
  0x52   : > { %9566 = vmatprep.mubr.f32.mxu0 %v325_v36  ;;  %11115 = vmatpush3.bf16.msra.mxu0 %v11112_v32  ;;  %v658_v32 = vld [vmem:[%s12407_s8 + $0x21] sm:$0xff]  ;;  %v659_v36 = vld [vmem:[%s12407_s8 + $0x29] sm:$0xff]  ;;  %v11152_v38 = vpack.c.bf16 %v8483_v35, %v8482_v34 }
  0x53   : > { %11117 = vmatprep.subr.bf16.mxu0 %v11116_v37  ;;  %v8500_v35 = vld [vmem:[%s14083_s2 + $0x1c0] sm:$0xff] }
  0x55   : > { %9567 = vmatmul.mubr.f32.gmra.mrb[4].mxu0 %v326_v40  ;;  %v8485_v40 = vld [vmem:[%s14083_s2 + $0x148] sm:$0xff] }
  0x56   : > { %9569 = vmatprep.mubr.f32.mxu0 %v327_v41  ;;  %11119 = vmatpush3.bf16.msra.mxu0 %v11116_v37  ;;  %v660_v37 = vld [vmem:[%s12407_s8 + $0x31] sm:$0xff]  ;;  %v661_v41 = vld [vmem:[%s12407_s8 + $0x39] sm:$0xff]  ;;  %v11156_v43 = vpack.c.bf16 %v8485_v40, %v8484_v39 }
  0x57   : > { %11121 = vmatprep.subr.bf16.mxu0 %v11120_v42  ;;  %v8502_v40 = vld [vmem:[%s14083_s2 + $0x1d0] sm:$0xff] }
  0x59   : > { %9570 = vmatmul.mubr.f32.gmra.mrb[6].mxu0 %v328_v45  ;;  %v8487_v45 = vld [vmem:[%s14083_s2 + $0x158] sm:$0xff] }
  0x5a   : > { %9572 = vmatprep.mubr.f32.mxu0 %v329_v46  ;;  %11123 = vmatpush3.bf16.msra.mxu0 %v11120_v42  ;;  %v662_v42 = vld [vmem:[%s12407_s8 + $0x41] sm:$0xff]  ;;  %v663_v46 = vld [vmem:[%s12407_s8 + $0x49] sm:$0xff]  ;;  %v11160_v48 = vpack.c.bf16 %v8487_v45, %v8486_v44 }
  0x5b   : > { %11125 = vmatprep.subr.bf16.mxu0 %v11124_v47  ;;  %v8504_v45 = vld [vmem:[%s14083_s2 + $0x1e0] sm:$0xff] }
  0x5d   : > { %9573 = vmatmul.mubr.f32.gmra.mrb[8].mxu0 %v330_v50  ;;  %v8489_v50 = vld [vmem:[%s14083_s2 + $0x168] sm:$0xff] }
  0x5e   : > { %9575 = vmatprep.mubr.f32.mxu0 %v331_v51  ;;  %11127 = vmatpush3.bf16.msra.mxu0 %v11124_v47  ;;  %v664_v47 = vld [vmem:[%s12407_s8 + $0x51] sm:$0xff]  ;;  %v665_v51 = vld [vmem:[%s12407_s8 + $0x59] sm:$0xff]  ;;  %v11164_v53 = vpack.c.bf16 %v8489_v50, %v8488_v49 }
  0x5f   : > { %11129 = vmatprep.subr.bf16.mxu0 %v11128_v52  ;;  %v8506_v50 = vld [vmem:[%s14083_s2 + $0x1f0] sm:$0xff] }
  0x61   : > { %9576 = vmatmul.mubr.f32.gmra.mrb[10].mxu0 %v332_v55  ;;  %v8491_v55 = vld [vmem:[%s14083_s2 + $0x178] sm:$0xff] }
  0x62   : > { %9578 = vmatprep.mubr.f32.mxu0 %v333_v56  ;;  %11131 = vmatpush3.bf16.msra.mxu0 %v11128_v52  ;;  %v666_v52 = vld [vmem:[%s12407_s8 + $0x61] sm:$0xff]  ;;  %v667_v56 = vld [vmem:[%s12407_s8 + $0x69] sm:$0xff]  ;;  %v11168_v58 = vpack.c.bf16 %v8491_v55, %v8490_v54 }
  0x63   : > { %11133 = vmatprep.subr.bf16.mxu0 %v11132_v57  ;;  %v8508_v55 = vld [vmem:[%s14083_s2 + $0x200] sm:$0xff] }
  0x65   : > { %9579 = vmatmul.mubr.f32.gmra.mrb[12].mxu0 %v334_v60  ;;  %v8493_v60 = vld [vmem:[%s14083_s2 + $0x188] sm:$0xff] }
  0x66   : > { %9581 = vmatprep.mubr.f32.mxu0 %v335_v61  ;;  %11135 = vmatpush3.bf16.msra.mxu0 %v11132_v57  ;;  %v668_v57 = vld [vmem:[%s12407_s8 + $0x71] sm:$0xff]  ;;  %v669_v61 = vld [vmem:[%s12407_s8 + $0x79] sm:$0xff]  ;;  %v11172_v63 = vpack.c.bf16 %v8493_v60, %v8492_v59 }
  0x67   : > { %11137 = vmatprep.subr.bf16.mxu0 %v11136_v62  ;;  %v12724_v60 = vld [vmem:[%s12407_s8 + $0x8a] sm:$0xff] }
  0x69   : > { %9582 = vmatmul.mubr.f32.gmra.mrb[14].mxu0 %v336_v1  ;;  %v672_v1 = vld [vmem:[%s12407_s8 + $0x91] sm:$0xff] }
  0x6a   : > { %9584 = vmatprep.mubr.f32.mxu0 %v337_v2  ;;  %11139 = vmatpush3.bf16.msra.mxu0 %v11136_v62  ;;  %v670_v62 = vld [vmem:[%s12407_s8 + $0x81] sm:$0xff]  ;;  %v673_v2 = vld [vmem:[%s12407_s8 + $0x99] sm:$0xff] }
  0x6b   : > { %11141 = vmatprep.subr.bf16.mxu0 %v11140_v3 }
  0x6d   : > { %9585 = vmatmul.mubr.f32.gmra.mrb[16].mxu0 %v338_v4  ;;  %v675_v4 = vld [vmem:[%s12407_s8 + $0xa9] sm:$0xff] }
  0x6e   : > { %9587 = vmatprep.mubr.f32.mxu0 %v339_v5  ;;  %v676_v5 = vld [vmem:[%s12407_s8 + $0xb1] sm:$0xff] }
  0x71   : > { %9588 = vmatmul.mubr.f32.gmra.mrb[18].mxu0 %v340_v6  ;;  %v677_v6 = vld [vmem:[%s12407_s8 + $0xb9] sm:$0xff] }
  0x72   : > { %9590 = vmatprep.mubr.f32.mxu0 %v341_v7  ;;  %v678_v7 = vld [vmem:[%s12407_s8 + $0xc1] sm:$0xff] }
  0x75   : > { %9591 = vmatmul.mubr.f32.gmra.mrb[20].mxu0 %v342_v8  ;;  %v679_v8 = vld [vmem:[%s12407_s8 + $0xc9] sm:$0xff] }
  0x76   : > { %9593 = vmatprep.mubr.f32.mxu0 %v343_v9  ;;  %v680_v9 = vld [vmem:[%s12407_s8 + $0xd1] sm:$0xff] }
  0x79   : > { %9594 = vmatmul.mubr.f32.gmra.mrb[22].mxu0 %v344_v10  ;;  %v681_v10 = vld [vmem:[%s12407_s8 + $0xd9] sm:$0xff] }
  0x7a   : > { %9596 = vmatprep.mubr.f32.mxu0 %v345_v11  ;;  %v682_v11 = vld [vmem:[%s12407_s8 + $0xe1] sm:$0xff] }
  0x7d   : > { %9597 = vmatmul.mubr.f32.gmra.mrb[24].mxu0 %v346_v12  ;;  %v683_v12 = vld [vmem:[%s12407_s8 + $0xe9] sm:$0xff] }
  0x7e   : > { %9599 = vmatprep.mubr.f32.mxu0 %v347_v13  ;;  %v684_v13 = vld [vmem:[%s12407_s8 + $0xf1] sm:$0xff] }
  0x81   : > { %9600 = vmatmul.mubr.f32.gmra.mrb[26].mxu0 %v348_v14  ;;  %v685_v14 = vld [vmem:[%s12407_s8 + $0xf9] sm:$0xff] }
  0x82   : > { %9602 = vmatprep.mubr.f32.mxu0 %v349_v15  ;;  %v686_v15 = vld [vmem:[%s12407_s8 + $0x101] sm:$0xff] }
  0x85   : > { %9603 = vmatmul.mubr.f32.gmra.mrb[28].mxu0 %v350_v16  ;;  %v687_v16 = vld [vmem:[%s12407_s8 + $0x109] sm:$0xff] }
  0x86   : > { %9605 = vmatprep.mubr.f32.mxu0 %v351_v17  ;;  %v688_v17 = vld [vmem:[%s12407_s8 + $0x111] sm:$0xff] }
  0x89   : > { %9606 = vmatmul.mubr.f32.gmra.mrb[30].mxu0 %v352_v18  ;;  %v689_v18 = vld [vmem:[%s12407_s8 + $0x119] sm:$0xff] }
  0x8a   : > { %9608 = vmatprep.mubr.f32.mxu0 %v353_v19  ;;  %v1060_v19 = vld [vmem:[%s12407_s8 + $0x2] sm:$0xff] }
  0x8d   : > { %9609 = vmatmul.mubr.f32.gmra.mrb[32].mxu0 %v354_v20  ;;  %v8494_v20 = vld [vmem:[%s14083_s2 + $0x190] sm:$0xff] }
  0x8e   : > { %9611 = vmatprep.mubr.f32.mxu0 %v355_v21  ;;  %v8495_v21 = vld [vmem:[%s14083_s2 + $0x198] sm:$0xff] }
  0x8f   : > { %v11176_v24 = vpack.c.bf16 %v8495_v21, %v8494_v20  ;;  %v8514_v21 = vld [vmem:[%s14083_s2 + $0x230] sm:$0xff] }
  0x91   : > { %9612 = vmatmul.mubr.f32.gmra.mrb[34].mxu0 %v356_v22  ;;  %v1061_v22 = vld [vmem:[%s12407_s8 + $0xa] sm:$0xff] }
  0x92   : > { %9646 = vmatprep.mubr.f32.mxu0 %v654_v23  ;;  %v12622_v23 = vld [vmem:[%s12407_s8 + $0x12] sm:$0xff] }
  0x95   : > { %9647 = vmatmul.mubr.f32.vlgmr.msra.gmra.mrb[0].mxu0 %v655_v26  ;;  %v8497_v26 = vld [vmem:[%s14083_s2 + $0x1a8] sm:$0xff] }
  0x96   : > { %11143 = vmatpush3.bf16.msra.mxu0 %v11140_v3  ;;  %9649 = vmatprep.mubr.f32.mxu0 %v656_v27  ;;  %v674_v3 = vld [vmem:[%s12407_s8 + $0xa1] sm:$0xff]  ;;  %v11180_v29 = vpack.c.bf16 %v8497_v26, %v8496_v25 }
  0x97   : > { %11145 = vmatprep.subr.bf16.mxu0 %v11144_v28  ;;  %v12632_v27 = vld [vmem:[%s12407_s8 + $0x1a] sm:$0xff]  ;;  %v8517_v25 = vld [vmem:[%s14083_s2 + $0x248] sm:$0xff] }
  0x99   : > { %9650 = vmatmul.mubr.f32.gmra.mrb[2].mxu0 %v657_v31  ;;  %v8499_v31 = vld [vmem:[%s14083_s2 + $0x1b8] sm:$0xff] }
  0x9a   : > { %9652 = vmatprep.mubr.f32.mxu0 %v658_v32  ;;  %11147 = vmatpush3.bf16.msra.mxu0 %v11144_v28  ;;  %v12635_v28 = vld [vmem:[%s12407_s8 + $0x22] sm:$0xff]  ;;  %v12646_v32 = vld [vmem:[%s12407_s8 + $0x2a] sm:$0xff]  ;;  %v11184_v34 = vpack.c.bf16 %v8499_v31, %v8498_v30 }
  0x9b   : > { %11149 = vmatprep.subr.bf16.mxu0 %v11148_v33  ;;  %v8520_v30 = vld [vmem:[%s14083_s2 + $0x260] sm:$0xff]  ;;  %v8521_v31 = vld [vmem:[%s14083_s2 + $0x268] sm:$0xff] }
  0x9d   : > { %9653 = vmatmul.mubr.f32.gmra.mrb[4].mxu0 %v659_v36  ;;  %v8501_v36 = vld [vmem:[%s14083_s2 + $0x1c8] sm:$0xff] }
  0x9e   : > { %9655 = vmatprep.mubr.f32.mxu0 %v660_v37  ;;  %11151 = vmatpush3.bf16.msra.mxu0 %v11148_v33  ;;  %v12649_v33 = vld [vmem:[%s12407_s8 + $0x32] sm:$0xff]  ;;  %v12660_v37 = vld [vmem:[%s12407_s8 + $0x3a] sm:$0xff]  ;;  %v11188_v39 = vpack.c.bf16 %v8501_v36, %v8500_v35 }
  0x9f   : > { %11153 = vmatprep.subr.bf16.mxu0 %v11152_v38  ;;  %v8524_v36 = vld [vmem:[%s14083_s2 + $0x280] sm:$0xff] }
  0xa1   : > { %9656 = vmatmul.mubr.f32.gmra.mrb[6].mxu0 %v661_v41  ;;  %v8503_v41 = vld [vmem:[%s14083_s2 + $0x1d8] sm:$0xff] }
  0xa2   : > { %9658 = vmatprep.mubr.f32.mxu0 %v662_v42  ;;  %11155 = vmatpush3.bf16.msra.mxu0 %v11152_v38  ;;  %v12663_v38 = vld [vmem:[%s12407_s8 + $0x42] sm:$0xff]  ;;  %v12674_v42 = vld [vmem:[%s12407_s8 + $0x4a] sm:$0xff]  ;;  %v11192_v44 = vpack.c.bf16 %v8503_v41, %v8502_v40  ;;  %v1872_v41 = vld [vmem:[%s12407_s8 + $0x13] sm:$0xff] }
  0xa3   : > { %11157 = vmatprep.subr.bf16.mxu0 %v11156_v43  ;;  %v1501_v40 = vld [vmem:[%s12407_s8 + $0x12a] sm:$0xff] }
  0xa5   : > { %9659 = vmatmul.mubr.f32.gmra.mrb[8].mxu0 %v663_v46  ;;  %v8505_v46 = vld [vmem:[%s14083_s2 + $0x1e8] sm:$0xff] }
  0xa6   : > { %9661 = vmatprep.mubr.f32.mxu0 %v664_v47  ;;  %11159 = vmatpush3.bf16.msra.mxu0 %v11156_v43  ;;  %v12677_v43 = vld [vmem:[%s12407_s8 + $0x52] sm:$0xff]  ;;  %v12688_v47 = vld [vmem:[%s12407_s8 + $0x5a] sm:$0xff]  ;;  %v11196_v49 = vpack.c.bf16 %v8505_v46, %v8504_v45  ;;  %v1874_v45 = vld [vmem:[%s12407_s8 + $0x23] sm:$0xff] }
  0xa7   : > { %11161 = vmatprep.subr.bf16.mxu0 %v11160_v48 }
  0xa9   : > { %9662 = vmatmul.mubr.f32.gmra.mrb[10].mxu0 %v665_v51  ;;  %v8507_v51 = vld [vmem:[%s14083_s2 + $0x1f8] sm:$0xff] }
  0xaa   : > { %9664 = vmatprep.mubr.f32.mxu0 %v666_v52  ;;  %11163 = vmatpush3.bf16.msra.mxu0 %v11160_v48  ;;  %v12691_v48 = vld [vmem:[%s12407_s8 + $0x62] sm:$0xff]  ;;  %v12702_v52 = vld [vmem:[%s12407_s8 + $0x6a] sm:$0xff]  ;;  %v11200_v54 = vpack.c.bf16 %v8507_v51, %v8506_v50  ;;  %v1876_v50 = vld [vmem:[%s12407_s8 + $0x33] sm:$0xff] }
  0xab   : > { %11165 = vmatprep.subr.bf16.mxu0 %v11164_v53 }
  0xad   : > { %9665 = vmatmul.mubr.f32.gmra.mrb[12].mxu0 %v667_v56  ;;  %v8509_v56 = vld [vmem:[%s14083_s2 + $0x208] sm:$0xff] }
  0xae   : > { %9667 = vmatprep.mubr.f32.mxu0 %v668_v57  ;;  %11167 = vmatpush3.bf16.msra.mxu0 %v11164_v53  ;;  %v12705_v53 = vld [vmem:[%s12407_s8 + $0x72] sm:$0xff]  ;;  %v12716_v57 = vld [vmem:[%s12407_s8 + $0x7a] sm:$0xff]  ;;  %v11204_v59 = vpack.c.bf16 %v8509_v56, %v8508_v55  ;;  %v1878_v55 = vld [vmem:[%s12407_s8 + $0x43] sm:$0xff] }
  0xaf   : > { %11169 = vmatprep.subr.bf16.mxu0 %v11168_v58 }
  0xb1   : > { %9668 = vmatmul.mubr.f32.gmra.mrb[14].mxu0 %v669_v61  ;;  %v12727_v61 = vld [vmem:[%s12407_s8 + $0x92] sm:$0xff] }
  0xb2   : > { %9670 = vmatprep.mubr.f32.mxu0 %v670_v62  ;;  %11171 = vmatpush3.bf16.msra.mxu0 %v11168_v58  ;;  %v12719_v58 = vld [vmem:[%s12407_s8 + $0x82] sm:$0xff]  ;;  %v12732_v62 = vld [vmem:[%s12407_s8 + $0x9a] sm:$0xff] }
  0xb3   : > { %11173 = vmatprep.subr.bf16.mxu0 %v11172_v63 }
  0xb5   : > { %9671 = vmatmul.mubr.f32.gmra.mrb[16].mxu0 %v671_v0  ;;  %v12740_v0 = vld [vmem:[%s12407_s8 + $0xaa] sm:$0xff] }
  0xb6   : > { %9673 = vmatprep.mubr.f32.mxu0 %v672_v1  ;;  %v12743_v1 = vld [vmem:[%s12407_s8 + $0xb2] sm:$0xff] }
  0xb9   : > { %9674 = vmatmul.mubr.f32.gmra.mrb[18].mxu0 %v673_v2  ;;  %v12748_v2 = vld [vmem:[%s12407_s8 + $0xba] sm:$0xff] }
  0xba   : > { %9676 = vmatprep.mubr.f32.mxu0 %v674_v3  ;;  %v12751_v3 = vld [vmem:[%s12407_s8 + $0xc2] sm:$0xff] }
  0xbd   : > { %9677 = vmatmul.mubr.f32.gmra.mrb[20].mxu0 %v675_v4  ;;  %v12756_v4 = vld [vmem:[%s12407_s8 + $0xca] sm:$0xff] }
  0xbe   : > { %9679 = vmatprep.mubr.f32.mxu0 %v676_v5  ;;  %v12759_v5 = vld [vmem:[%s12407_s8 + $0xd2] sm:$0xff] }
  0xc1   : > { %9680 = vmatmul.mubr.f32.gmra.mrb[22].mxu0 %v677_v6  ;;  %v12764_v6 = vld [vmem:[%s12407_s8 + $0xda] sm:$0xff] }
  0xc2   : > { %9682 = vmatprep.mubr.f32.mxu0 %v678_v7  ;;  %v12767_v7 = vld [vmem:[%s12407_s8 + $0xe2] sm:$0xff] }
  0xc5   : > { %9683 = vmatmul.mubr.f32.gmra.mrb[24].mxu0 %v679_v8  ;;  %v12772_v8 = vld [vmem:[%s12407_s8 + $0xea] sm:$0xff] }
  0xc6   : > { %9685 = vmatprep.mubr.f32.mxu0 %v680_v9  ;;  %v12775_v9 = vld [vmem:[%s12407_s8 + $0xf2] sm:$0xff] }
  0xc9   : > { %9686 = vmatmul.mubr.f32.gmra.mrb[26].mxu0 %v681_v10  ;;  %v12780_v10 = vld [vmem:[%s12407_s8 + $0xfa] sm:$0xff] }
  0xca   : > { %9688 = vmatprep.mubr.f32.mxu0 %v682_v11  ;;  %v12783_v11 = vld [vmem:[%s12407_s8 + $0x102] sm:$0xff] }
  0xcd   : > { %9689 = vmatmul.mubr.f32.gmra.mrb[28].mxu0 %v683_v12  ;;  %v12788_v12 = vld [vmem:[%s12407_s8 + $0x10a] sm:$0xff] }
  0xce   : > { %9691 = vmatprep.mubr.f32.mxu0 %v684_v13  ;;  %v12791_v13 = vld [vmem:[%s12407_s8 + $0x112] sm:$0xff] }
  0xd1   : > { %9692 = vmatmul.mubr.f32.gmra.mrb[30].mxu0 %v685_v14  ;;  %v12796_v14 = vld [vmem:[%s12407_s8 + $0x11a] sm:$0xff] }
  0xd2   : > { %9694 = vmatprep.mubr.f32.mxu0 %v686_v15  ;;  %v8510_v15 = vld [vmem:[%s14083_s2 + $0x210] sm:$0xff] }
  0xd5   : > { %9695 = vmatmul.mubr.f32.gmra.mrb[32].mxu0 %v687_v16  ;;  %v8511_v16 = vld [vmem:[%s14083_s2 + $0x218] sm:$0xff] }
  0xd6   : > { %9697 = vmatprep.mubr.f32.mxu0 %v688_v17  ;;  %v11208_v17 = vpack.c.bf16 %v8511_v16, %v8510_v15  ;;  %v1887_v15 = vld [vmem:[%s12407_s8 + $0x8b] sm:$0xff]  ;;  %v1888_v16 = vld [vmem:[%s12407_s8 + $0x93] sm:$0xff] }
  0xd9   : > { %9698 = vmatmul.mubr.f32.gmra.mrb[34].mxu0 %v689_v18  ;;  %v8512_v18 = vld [vmem:[%s14083_s2 + $0x220] sm:$0xff] }
  0xda   : > { %9732 = vmatprep.mubr.f32.mxu0 %v1060_v19  ;;  %v8513_v19 = vld [vmem:[%s14083_s2 + $0x228] sm:$0xff] }
  0xdb   : > { %v11212_v20 = vpack.c.bf16 %v8513_v19, %v8512_v18  ;;  %v1889_v18 = vld [vmem:[%s12407_s8 + $0x9b] sm:$0xff]  ;;  %v1890_v19 = vld [vmem:[%s12407_s8 + $0xa3] sm:$0xff] }
  0xdd   : > { %9733 = vmatmul.mubr.f32.vlgmr.msra.gmra.mrb[0].mxu0 %v1061_v22  ;;  %v8515_v22 = vld [vmem:[%s14083_s2 + $0x238] sm:$0xff] }
  0xde   : > { %11175 = vmatpush3.bf16.msra.mxu0 %v11172_v63  ;;  %9735 = vmatprep.mubr.f32.mxu0 %v12622_v23  ;;  %v12735_v63 = vld [vmem:[%s12407_s8 + $0xa2] sm:$0xff] }
  0xdf   : > { %11177 = vmatprep.subr.bf16.mxu0 %v11176_v24 }
  0xe1   : > { %9736 = vmatmul.mubr.f32.gmra.mrb[2].mxu0 %v12632_v27 }
  0xe2   : > { %9738 = vmatprep.mubr.f32.mxu0 %v12635_v28  ;;  %11179 = vmatpush3.bf16.msra.mxu0 %v11176_v24  ;;  %v8516_v24 = vld [vmem:[%s14083_s2 + $0x240] sm:$0xff] }
  0xe3   : > { %11181 = vmatprep.subr.bf16.mxu0 %v11180_v29  ;;  %v11220_v26 = vpack.c.bf16 %v8517_v25, %v8516_v24  ;;  %v1895_v24 = vld [vmem:[%s12407_s8 + $0xcb] sm:$0xff]  ;;  %v1896_v25 = vld [vmem:[%s12407_s8 + $0xd3] sm:$0xff] }
  0xe5   : > { %9739 = vmatmul.mubr.f32.gmra.mrb[4].mxu0 %v12646_v32 }
  0xe6   : > { %9741 = vmatprep.mubr.f32.mxu0 %v12649_v33  ;;  %11183 = vmatpush3.bf16.msra.mxu0 %v11180_v29 }
  0xe7   : > { %11185 = vmatprep.subr.bf16.mxu0 %v11184_v34 }
  0xe9   : > { %9742 = vmatmul.mubr.f32.gmra.mrb[6].mxu0 %v12660_v37 }
  0xea   : > { %9744 = vmatprep.mubr.f32.mxu0 %v12663_v38  ;;  %11187 = vmatpush3.bf16.msra.mxu0 %v11184_v34  ;;  %v8523_v34 = vld [vmem:[%s14083_s2 + $0x278] sm:$0xff] }
  0xeb   : > { %11189 = vmatprep.subr.bf16.mxu0 %v11188_v39 }
  0xed   : > { %9745 = vmatmul.mubr.f32.gmra.mrb[8].mxu0 %v12674_v42 }
  0xee   : > { %9747 = vmatprep.mubr.f32.mxu0 %v12677_v43  ;;  %11191 = vmatpush3.bf16.msra.mxu0 %v11188_v39  ;;  %v1500_v39 = vld [vmem:[%s12407_s8 + $0x122] sm:$0xff] }
  0xef   : > { %11193 = vmatprep.subr.bf16.mxu0 %v11192_v44 }
  0xf1   : > { %9748 = vmatmul.mubr.f32.gmra.mrb[10].mxu0 %v12688_v47 }
  0xf2   : > { %9750 = vmatprep.mubr.f32.mxu0 %v12691_v48  ;;  %11195 = vmatpush3.bf16.msra.mxu0 %v11192_v44  ;;  %v1873_v44 = vld [vmem:[%s12407_s8 + $0x1b] sm:$0xff] }
  0xf3   : > { %11197 = vmatprep.subr.bf16.mxu0 %v11196_v49 }
  0xf5   : > { %9751 = vmatmul.mubr.f32.gmra.mrb[12].mxu0 %v12702_v52 }
  0xf6   : > { %9753 = vmatprep.mubr.f32.mxu0 %v12705_v53  ;;  %11199 = vmatpush3.bf16.msra.mxu0 %v11196_v49  ;;  %v1875_v49 = vld [vmem:[%s12407_s8 + $0x2b] sm:$0xff] }
  0xf7   : > { %11201 = vmatprep.subr.bf16.mxu0 %v11200_v54 }
  0xf9   : > { %9754 = vmatmul.mubr.f32.gmra.mrb[14].mxu0 %v12716_v57 }
  0xfa   : > { %9756 = vmatprep.mubr.f32.mxu0 %v12719_v58  ;;  %11203 = vmatpush3.bf16.msra.mxu0 %v11200_v54  ;;  %v1877_v54 = vld [vmem:[%s12407_s8 + $0x3b] sm:$0xff] }
  0xfb   : > { %11205 = vmatprep.subr.bf16.mxu0 %v11204_v59 }
  0xfd   : > { %9757 = vmatmul.mubr.f32.gmra.mrb[16].mxu0 %v12724_v60 }
  0xfe   : > { %9759 = vmatprep.mubr.f32.mxu0 %v12727_v61 }
 0x101   : > { %9760 = vmatmul.mubr.f32.gmra.mrb[18].mxu0 %v12732_v62 }
 0x102   : > { %9762 = vmatprep.mubr.f32.mxu0 %v12735_v63 }
 0x105   : > { %9763 = vmatmul.mubr.f32.gmra.mrb[20].mxu0 %v12740_v0 }
 0x106   : > { %9765 = vmatprep.mubr.f32.mxu0 %v12743_v1 }
 0x109   : > { %9766 = vmatmul.mubr.f32.gmra.mrb[22].mxu0 %v12748_v2 }
 0x10a   : > { %9768 = vmatprep.mubr.f32.mxu0 %v12751_v3 }
 0x10d   : > { %9769 = vmatmul.mubr.f32.gmra.mrb[24].mxu0 %v12756_v4 }
 0x10e   : > { %9771 = vmatprep.mubr.f32.mxu0 %v12759_v5 }
 0x111   : > { %9772 = vmatmul.mubr.f32.gmra.mrb[26].mxu0 %v12764_v6 }
 0x112   : > { %9774 = vmatprep.mubr.f32.mxu0 %v12767_v7 }
 0x115   : > { %9775 = vmatmul.mubr.f32.gmra.mrb[28].mxu0 %v12772_v8 }
 0x116   : > { %9777 = vmatprep.mubr.f32.mxu0 %v12775_v9 }
 0x119   : > { %9778 = vmatmul.mubr.f32.gmra.mrb[30].mxu0 %v12780_v10 }
 0x11a   : > { %9780 = vmatprep.mubr.f32.mxu0 %v12783_v11 }
 0x11d   : > { %9781 = vmatmul.mubr.f32.gmra.mrb[32].mxu0 %v12788_v12 }
 0x11e   : > { %9783 = vmatprep.mubr.f32.mxu0 %v12791_v13 }
 0x121   : > { %9784 = vmatmul.mubr.f32.gmra.mrb[34].mxu0 %v12796_v14 }
 0x122   : > { %9818 = vmatprep.mubr.f32.mxu0 %v12622_v23  ;;  %v11216_v23 = vpack.c.bf16 %v8515_v22, %v8514_v21  ;;  %v1892_v21 = vld [vmem:[%s12407_s8 + $0xb3] sm:$0xff]  ;;  %v1893_v22 = vld [vmem:[%s12407_s8 + $0xbb] sm:$0xff] }
 0x125   : > { %9819 = vmatmul.mubr.f32.vlgmr.msra.gmra.mrb[0].mxu0 %v12632_v27  ;;  %v8518_v27 = vld [vmem:[%s14083_s2 + $0x250] sm:$0xff] }
 0x126   : > { %11207 = vmatpush3.bf16.msra.mxu0 %v11204_v59  ;;  %9821 = vmatprep.mubr.f32.mxu0 %v12635_v28  ;;  %v8519_v28 = vld [vmem:[%s14083_s2 + $0x258] sm:$0xff]  ;;  %v1879_v59 = vld [vmem:[%s12407_s8 + $0x4b] sm:$0xff] }
 0x127   : > { %11209 = vmatprep.subr.bf16.mxu0 %v11208_v17  ;;  %v11224_v29 = vpack.c.bf16 %v8519_v28, %v8518_v27  ;;  %v1898_v27 = vld [vmem:[%s12407_s8 + $0xe3] sm:$0xff]  ;;  %v1899_v28 = vld [vmem:[%s12407_s8 + $0xeb] sm:$0xff] }
 0x129   : > { %9822 = vmatmul.mubr.f32.gmra.mrb[2].mxu0 %v12646_v32  ;;  %v11228_v32 = vpack.c.bf16 %v8521_v31, %v8520_v30  ;;  %v1901_v30 = vld [vmem:[%s12407_s8 + $0xfb] sm:$0xff]  ;;  %v1902_v31 = vld [vmem:[%s12407_s8 + $0x103] sm:$0xff] }
 0x12a   : > { %9824 = vmatprep.mubr.f32.mxu0 %v12649_v33  ;;  %11211 = vmatpush3.bf16.msra.mxu0 %v11208_v17  ;;  %v8522_v33 = vld [vmem:[%s14083_s2 + $0x270] sm:$0xff] }
 0x12b   : > { %11213 = vmatprep.subr.bf16.mxu0 %v11212_v20  ;;  %v11232_v35 = vpack.c.bf16 %v8523_v34, %v8522_v33  ;;  %v1904_v33 = vld [vmem:[%s12407_s8 + $0x113] sm:$0xff]  ;;  %v1905_v34 = vld [vmem:[%s12407_s8 + $0x11b] sm:$0xff] }
 0x12d   : > { %9825 = vmatmul.mubr.f32.gmra.mrb[4].mxu0 %v12660_v37  ;;  %v8525_v37 = vld [vmem:[%s14083_s2 + $0x288] sm:$0xff] }
 0x12e   : > { %9827 = vmatprep.mubr.f32.mxu0 %v12663_v38  ;;  %11215 = vmatpush3.bf16.msra.mxu0 %v11212_v20  ;;  %v11236_v38 = vpack.c.bf16 %v8525_v37, %v8524_v36  ;;  %v1891_v20 = vld [vmem:[%s12407_s8 + $0xab] sm:$0xff]  ;;  %v2278_v37 = vld [vmem:[%s12407_s8 + $0x14] sm:$0xff] }
 0x12f   : > { %11217 = vmatprep.subr.bf16.mxu0 %v11216_v23  ;;  %v1907_v36 = vld [vmem:[%s12407_s8 + $0x12b] sm:$0xff] }
 0x131   : > { %9828 = vmatmul.mubr.f32.gmra.mrb[6].mxu0 %v12674_v42  ;;  %v8526_v42 = vld [vmem:[%s14083_s2 + $0x290] sm:$0xff] }
 0x132   : > { %9830 = vmatprep.mubr.f32.mxu0 %v12677_v43  ;;  %11219 = vmatpush3.bf16.msra.mxu0 %v11216_v23  ;;  %v8527_v43 = vld [vmem:[%s14083_s2 + $0x298] sm:$0xff]  ;;  %v1894_v23 = vld [vmem:[%s12407_s8 + $0xc3] sm:$0xff] }
 0x133   : > { %11221 = vmatprep.subr.bf16.mxu0 %v11220_v26  ;;  %v11240_v46 = vpack.c.bf16 %v8527_v43, %v8526_v42  ;;  %v8544_v43 = vld [vmem:[%s14083_s2 + $0x320] sm:$0xff] }
 0x135   : > { %9831 = vmatmul.mubr.f32.gmra.mrb[8].mxu0 %v12688_v47  ;;  %v8528_v47 = vld [vmem:[%s14083_s2 + $0x2a0] sm:$0xff] }
 0x136   : > { %9833 = vmatprep.mubr.f32.mxu0 %v12691_v48  ;;  %11223 = vmatpush3.bf16.msra.mxu0 %v11220_v26  ;;  %v8529_v48 = vld [vmem:[%s14083_s2 + $0x2a8] sm:$0xff]  ;;  %v1897_v26 = vld [vmem:[%s12407_s8 + $0xdb] sm:$0xff] }
 0x137   : > { %11225 = vmatprep.subr.bf16.mxu0 %v11224_v29  ;;  %v11244_v51 = vpack.c.bf16 %v8529_v48, %v8528_v47  ;;  %v8546_v48 = vld [vmem:[%s14083_s2 + $0x330] sm:$0xff] }
 0x139   : > { %9834 = vmatmul.mubr.f32.gmra.mrb[10].mxu0 %v12702_v52  ;;  %v8530_v52 = vld [vmem:[%s14083_s2 + $0x2b0] sm:$0xff] }
 0x13a   : > { %9836 = vmatprep.mubr.f32.mxu0 %v12705_v53  ;;  %11227 = vmatpush3.bf16.msra.mxu0 %v11224_v29  ;;  %v8531_v53 = vld [vmem:[%s14083_s2 + $0x2b8] sm:$0xff] }
 0x13b   : > { %11229 = vmatprep.subr.bf16.mxu0 %v11228_v32  ;;  %v11248_v56 = vpack.c.bf16 %v8531_v53, %v8530_v52  ;;  %v1900_v29 = vld [vmem:[%s12407_s8 + $0xf3] sm:$0xff]  ;;  %v8548_v53 = vld [vmem:[%s14083_s2 + $0x340] sm:$0xff] }
 0x13d   : > { %9837 = vmatmul.mubr.f32.gmra.mrb[12].mxu0 %v12716_v57  ;;  %v8532_v57 = vld [vmem:[%s14083_s2 + $0x2c0] sm:$0xff] }
 0x13e   : > { %9839 = vmatprep.mubr.f32.mxu0 %v12719_v58  ;;  %11231 = vmatpush3.bf16.msra.mxu0 %v11228_v32  ;;  %v8533_v58 = vld [vmem:[%s14083_s2 + $0x2c8] sm:$0xff] }
 0x13f   : > { %11233 = vmatprep.subr.bf16.mxu0 %v11232_v35  ;;  %v1903_v32 = vld [vmem:[%s12407_s8 + $0x10b] sm:$0xff] }
 0x141   : > { %9840 = vmatmul.mubr.f32.gmra.mrb[14].mxu0 %v12724_v60  ;;  %v1880_v60 = vld [vmem:[%s12407_s8 + $0x53] sm:$0xff] }
 0x142   : > { %9842 = vmatprep.mubr.f32.mxu0 %v12727_v61  ;;  %11235 = vmatpush3.bf16.msra.mxu0 %v11232_v35  ;;  %v11252_v61 = vpack.c.bf16 %v8533_v58, %v8532_v57  ;;  %v1906_v35 = vld [vmem:[%s12407_s8 + $0x123] sm:$0xff]  ;;  %v8550_v58 = vld [vmem:[%s14083_s2 + $0x350] sm:$0xff] }
 0x143   : > { %11237 = vmatprep.subr.bf16.mxu0 %v11236_v38 }
 0x145   : > { %9843 = vmatmul.mubr.f32.gmra.mrb[16].mxu0 %v12732_v62  ;;  %v8534_v62 = vld [vmem:[%s14083_s2 + $0x2d0] sm:$0xff] }
 0x146   : > { %9845 = vmatprep.mubr.f32.mxu0 %v12735_v63  ;;  %v8535_v63 = vld [vmem:[%s14083_s2 + $0x2d8] sm:$0xff] }
 0x149   : > { %9846 = vmatmul.mubr.f32.gmra.mrb[18].mxu0 %v12740_v0  ;;  %v1881_v0 = vld [vmem:[%s12407_s8 + $0x5b] sm:$0xff] }
 0x14a   : > { %9848 = vmatprep.mubr.f32.mxu0 %v12743_v1  ;;  %v1882_v1 = vld [vmem:[%s12407_s8 + $0x63] sm:$0xff] }
 0x14d   : > { %9849 = vmatmul.mubr.f32.gmra.mrb[20].mxu0 %v12748_v2  ;;  %v11256_v2 = vpack.c.bf16 %v8535_v63, %v8534_v62  ;;  %v8552_v63 = vld [vmem:[%s14083_s2 + $0x360] sm:$0xff] }
 0x14e   : > { %9851 = vmatprep.mubr.f32.mxu0 %v12751_v3  ;;  %v8536_v3 = vld [vmem:[%s14083_s2 + $0x2e0] sm:$0xff] }
 0x151   : > { %9852 = vmatmul.mubr.f32.gmra.mrb[22].mxu0 %v12756_v4  ;;  %v8537_v4 = vld [vmem:[%s14083_s2 + $0x2e8] sm:$0xff] }
 0x152   : > { %9854 = vmatprep.mubr.f32.mxu0 %v12759_v5  ;;  %v1883_v5 = vld [vmem:[%s12407_s8 + $0x6b] sm:$0xff] }
 0x155   : > { %9855 = vmatmul.mubr.f32.gmra.mrb[24].mxu0 %v12764_v6  ;;  %v1884_v6 = vld [vmem:[%s12407_s8 + $0x73] sm:$0xff] }
 0x156   : > { %9857 = vmatprep.mubr.f32.mxu0 %v12767_v7  ;;  %v11260_v7 = vpack.c.bf16 %v8537_v4, %v8536_v3  ;;  %v8554_v4 = vld [vmem:[%s14083_s2 + $0x370] sm:$0xff] }
 0x159   : > { %9858 = vmatmul.mubr.f32.gmra.mrb[26].mxu0 %v12772_v8  ;;  %v8538_v8 = vld [vmem:[%s14083_s2 + $0x2f0] sm:$0xff] }
 0x15a   : > { %9860 = vmatprep.mubr.f32.mxu0 %v12775_v9  ;;  %v8539_v9 = vld [vmem:[%s14083_s2 + $0x2f8] sm:$0xff] }
 0x15d   : > { %9861 = vmatmul.mubr.f32.gmra.mrb[28].mxu0 %v12780_v10  ;;  %v1885_v10 = vld [vmem:[%s12407_s8 + $0x7b] sm:$0xff] }
 0x15e   : > { %9863 = vmatprep.mubr.f32.mxu0 %v12783_v11  ;;  %v1886_v11 = vld [vmem:[%s12407_s8 + $0x83] sm:$0xff] }
 0x161   : > { %9864 = vmatmul.mubr.f32.gmra.mrb[30].mxu0 %v12788_v12  ;;  %v11264_v12 = vpack.c.bf16 %v8539_v9, %v8538_v8  ;;  %v8556_v9 = vld [vmem:[%s14083_s2 + $0x380] sm:$0xff] }
 0x162   : > { %9866 = vmatprep.mubr.f32.mxu0 %v12791_v13  ;;  %v8540_v13 = vld [vmem:[%s14083_s2 + $0x300] sm:$0xff] }
 0x165   : > { %9867 = vmatmul.mubr.f32.gmra.mrb[32].mxu0 %v12796_v14  ;;  %v8541_v14 = vld [vmem:[%s14083_s2 + $0x308] sm:$0xff] }
 0x166   : > { %9869 = vmatprep.mubr.f32.mxu0 %v1500_v39  ;;  %v11268_v17 = vpack.c.bf16 %v8541_v14, %v8540_v13  ;;  %v8543_v39 = vld [vmem:[%s14083_s2 + $0x318] sm:$0xff] }
 0x167   : > { %v13080_v14 = vld [vmem:[%s12407_s8 + $0x9c] sm:$0xff] }
 0x169   : > { %9870 = vmatmul.mubr.f32.gmra.mrb[34].mxu0 %v1501_v40  ;;  %v2279_v40 = vld [vmem:[%s12407_s8 + $0x1c] sm:$0xff] }
 0x16a   : > { %9904 = vmatprep.mubr.f32.mxu0 %v1872_v41  ;;  %v12976_v41 = vld [vmem:[%s12407_s8 + $0x24] sm:$0xff] }
 0x16d   : > { %9905 = vmatmul.mubr.f32.vlgmr.msra.gmra.mrb[0].mxu0 %v1873_v44  ;;  %v8545_v44 = vld [vmem:[%s14083_s2 + $0x328] sm:$0xff] }
 0x16e   : > { %11239 = vmatpush3.bf16.msra.mxu0 %v11236_v38  ;;  %9907 = vmatprep.mubr.f32.mxu0 %v1874_v45  ;;  %v8542_v38 = vld [vmem:[%s14083_s2 + $0x310] sm:$0xff]  ;;  %v11276_v47 = vpack.c.bf16 %v8545_v44, %v8544_v43  ;;  %v13213_v43 = vld [vmem:[%s14082_s1 + $0x60] sm:$0xff] }
 0x16f   : > { %11241 = vmatprep.subr.bf16.mxu0 %v11240_v46  ;;  %v11272_v42 = vpack.c.bf16 %v8543_v39, %v8542_v38  ;;  %v12986_v45 = vld [vmem:[%s12407_s8 + $0x2c] sm:$0xff]  ;;  %v13196_v39 = vld [vmem:[%s12407_s8 + $0x104] sm:$0xff]  ;;  %v13216_v44 = vld [vmem:[%s12407_s8 + $0x114] sm:$0xff] }
 0x170   : > { %v13193_v38 = vld [vmem:[%s14082_s1 + $0x50] sm:$0xff] }
 0x171   : > { %9908 = vmatmul.mubr.f32.gmra.mrb[2].mxu0 %v1875_v49  ;;  %v8547_v49 = vld [vmem:[%s14083_s2 + $0x338] sm:$0xff] }
 0x172   : > { %9910 = vmatprep.mubr.f32.mxu0 %v1876_v50  ;;  %11243 = vmatpush3.bf16.msra.mxu0 %v11240_v46  ;;  %v12989_v46 = vld [vmem:[%s12407_s8 + $0x34] sm:$0xff]  ;;  %v13000_v50 = vld [vmem:[%s12407_s8 + $0x3c] sm:$0xff]  ;;  %v11280_v52 = vpack.c.bf16 %v8547_v49, %v8546_v48  ;;  %v13228_v48 = vld [vmem:[%s14082_s1 + $0x68] sm:$0xff] }
 0x173   : > { %11245 = vmatprep.subr.bf16.mxu0 %v11244_v51  ;;  %v13233_v49 = vld [vmem:[%s14082_s1 + $0x70] sm:$0xff] }
 0x175   : > { %9911 = vmatmul.mubr.f32.gmra.mrb[4].mxu0 %v1877_v54  ;;  %v8549_v54 = vld [vmem:[%s14083_s2 + $0x348] sm:$0xff] }
 0x176   : > { %9913 = vmatprep.mubr.f32.mxu0 %v1878_v55  ;;  %11247 = vmatpush3.bf16.msra.mxu0 %v11244_v51  ;;  %v13003_v51 = vld [vmem:[%s12407_s8 + $0x44] sm:$0xff]  ;;  %v13014_v55 = vld [vmem:[%s12407_s8 + $0x4c] sm:$0xff]  ;;  %v11284_v57 = vpack.c.bf16 %v8549_v54, %v8548_v53  ;;  %v13248_v54 = vld [vmem:[%s14082_s1 + $0x78] sm:$0xff] }
 0x177   : > { %11249 = vmatprep.subr.bf16.mxu0 %v11248_v56  ;;  %v13243_v53 = vld [vmem:[%s12407_s8 + $0x12c] sm:$0xff] }
 0x179   : > { %9914 = vmatmul.mubr.f32.gmra.mrb[6].mxu0 %v1879_v59  ;;  %v8551_v59 = vld [vmem:[%s14083_s2 + $0x358] sm:$0xff] }
 0x17a   : > { %9916 = vmatprep.mubr.f32.mxu0 %v1880_v60  ;;  %11251 = vmatpush3.bf16.msra.mxu0 %v11248_v56  ;;  %v13017_v56 = vld [vmem:[%s12407_s8 + $0x54] sm:$0xff]  ;;  %v13028_v60 = vld [vmem:[%s12407_s8 + $0x5c] sm:$0xff]  ;;  %v11288_v62 = vpack.c.bf16 %v8551_v59, %v8550_v58 }
 0x17b   : > { %11253 = vmatprep.subr.bf16.mxu0 %v11252_v61  ;;  %v8558_v58 = vld [vmem:[%s14083_s2 + $0x390] sm:$0xff]  ;;  %v8559_v59 = vld [vmem:[%s14083_s2 + $0x398] sm:$0xff] }
 0x17d   : > { %9917 = vmatmul.mubr.f32.gmra.mrb[8].mxu0 %v1881_v0  ;;  %v8553_v0 = vld [vmem:[%s14083_s2 + $0x368] sm:$0xff] }
 0x17e   : > { %9919 = vmatprep.mubr.f32.mxu0 %v1882_v1  ;;  %11255 = vmatpush3.bf16.msra.mxu0 %v11252_v61  ;;  %v13031_v61 = vld [vmem:[%s12407_s8 + $0x64] sm:$0xff]  ;;  %v13042_v1 = vld [vmem:[%s12407_s8 + $0x6c] sm:$0xff]  ;;  %v11292_v3 = vpack.c.bf16 %v8553_v0, %v8552_v63  ;;  %v11304_v0 = vpack.c.bf16 %v8559_v59, %v8558_v58 }
 0x17f   : > { %11257 = vmatprep.subr.bf16.mxu0 %v11256_v2  ;;  %v13273_v63 = vld [vmem:[%s14082_s1 + $0x90] sm:$0xff]  ;;  %v13334_v58 = vld [vmem:[%s14082_s1 + $0xc0] sm:$0xff] }
 0x181   : > { %9920 = vmatmul.mubr.f32.gmra.mrb[10].mxu0 %v1883_v5  ;;  %v8555_v5 = vld [vmem:[%s14083_s2 + $0x378] sm:$0xff] }
 0x182   : > { %9922 = vmatprep.mubr.f32.mxu0 %v1884_v6  ;;  %11259 = vmatpush3.bf16.msra.mxu0 %v11256_v2  ;;  %v13045_v2 = vld [vmem:[%s12407_s8 + $0x74] sm:$0xff]  ;;  %v13056_v6 = vld [vmem:[%s12407_s8 + $0x7c] sm:$0xff]  ;;  %v11296_v8 = vpack.c.bf16 %v8555_v5, %v8554_v4  ;;  %v8561_v4 = vld [vmem:[%s14083_s2 + $0x3a8] sm:$0xff] }
 0x183   : > { %11261 = vmatprep.subr.bf16.mxu0 %v11260_v7  ;;  %v13294_v5 = vld [vmem:[%s14082_s1 + $0xa0] sm:$0xff] }
 0x185   : > { %9923 = vmatmul.mubr.f32.gmra.mrb[12].mxu0 %v1885_v10  ;;  %v8557_v10 = vld [vmem:[%s14083_s2 + $0x388] sm:$0xff] }
 0x186   : > { %9925 = vmatprep.mubr.f32.mxu0 %v1886_v11  ;;  %11263 = vmatpush3.bf16.msra.mxu0 %v11260_v7  ;;  %v13059_v7 = vld [vmem:[%s12407_s8 + $0x84] sm:$0xff]  ;;  %v13070_v11 = vld [vmem:[%s12407_s8 + $0x8c] sm:$0xff]  ;;  %v13075_v13 = vpack.c.bf16 %v8557_v10, %v8556_v9 }
 0x187   : > { %11265 = vmatprep.subr.bf16.mxu0 %v11264_v12  ;;  %v13309_v10 = vld [vmem:[%s14082_s1 + $0xa8] sm:$0xff] }
 0x189   : > { %9926 = vmatmul.mubr.f32.gmra.mrb[14].mxu0 %v1887_v15  ;;  %v13083_v15 = vld [vmem:[%s12407_s8 + $0xa4] sm:$0xff] }
 0x18a   : > { %9928 = vmatprep.mubr.f32.mxu0 %v1888_v16  ;;  %11267 = vmatpush3.bf16.msra.mxu0 %v11264_v12  ;;  %v13073_v12 = vld [vmem:[%s12407_s8 + $0x94] sm:$0xff]  ;;  %v13089_v16 = vld [vmem:[%s12407_s8 + $0xac] sm:$0xff] }
 0x18b   : > { %11269 = vmatprep.subr.bf16.mxu0 %v11268_v17 }
 0x18d   : > { %9929 = vmatmul.mubr.f32.gmra.mrb[16].mxu0 %v1889_v18  ;;  %v13094_v18 = vld [vmem:[%s14082_s1] sm:$0xff] }
 0x18e   : > { %9931 = vmatprep.mubr.f32.mxu0 %v1890_v19  ;;  %v13097_v19 = vld [vmem:[%s12407_s8 + $0xb4] sm:$0xff] }
 0x191   : > { %9932 = vmatmul.mubr.f32.gmra.mrb[18].mxu0 %v1891_v20  ;;  %v13103_v20 = vld [vmem:[%s12407_s8 + $0xbc] sm:$0xff] }
 0x192   : > { %9934 = vmatprep.mubr.f32.mxu0 %v1892_v21  ;;  %v13108_v21 = vld [vmem:[%s14082_s1 + $0x10] sm:$0xff] }
 0x195   : > { %9935 = vmatmul.mubr.f32.gmra.mrb[20].mxu0 %v1893_v22  ;;  %v13113_v22 = vld [vmem:[%s14082_s1 + $0x8] sm:$0xff] }
 0x196   : > { %9937 = vmatprep.mubr.f32.mxu0 %v1894_v23  ;;  %v13116_v23 = vld [vmem:[%s12407_s8 + $0xc4] sm:$0xff] }
 0x199   : > { %9938 = vmatmul.mubr.f32.gmra.mrb[22].mxu0 %v1895_v24  ;;  %v13123_v24 = vld [vmem:[%s12407_s8 + $0xcc] sm:$0xff] }
 0x19a   : > { %9940 = vmatprep.mubr.f32.mxu0 %v1896_v25  ;;  %v13126_v25 = vld [vmem:[%s12407_s8 + $0xd4] sm:$0xff] }
 0x19d   : > { %9941 = vmatmul.mubr.f32.gmra.mrb[24].mxu0 %v1897_v26  ;;  %v13131_v26 = vld [vmem:[%s14082_s1 + $0x18] sm:$0xff] }
 0x19e   : > { %9943 = vmatprep.mubr.f32.mxu0 %v1898_v27  ;;  %v13136_v27 = vld [vmem:[%s14082_s1 + $0x20] sm:$0xff] }
 0x1a1   : > { %9944 = vmatmul.mubr.f32.gmra.mrb[26].mxu0 %v1899_v28  ;;  %v13143_v28 = vld [vmem:[%s12407_s8 + $0xdc] sm:$0xff] }
 0x1a2   : > { %9946 = vmatprep.mubr.f32.mxu0 %v1900_v29  ;;  %v13148_v29 = vld [vmem:[%s14082_s1 + $0x28] sm:$0xff] }
 0x1a5   : > { %9947 = vmatmul.mubr.f32.gmra.mrb[28].mxu0 %v1901_v30  ;;  %v13153_v30 = vld [vmem:[%s14082_s1 + $0x30] sm:$0xff] }
 0x1a6   : > { %9949 = vmatprep.mubr.f32.mxu0 %v1902_v31  ;;  %v13156_v31 = vld [vmem:[%s12407_s8 + $0xe4] sm:$0xff] }
 0x1a9   : > { %9950 = vmatmul.mubr.f32.gmra.mrb[30].mxu0 %v1903_v32  ;;  %v13163_v32 = vld [vmem:[%s12407_s8 + $0xec] sm:$0xff] }
 0x1aa   : > { %9952 = vmatprep.mubr.f32.mxu0 %v1904_v33  ;;  %v13168_v33 = vld [vmem:[%s14082_s1 + $0x38] sm:$0xff] }
 0x1ad   : > { %9953 = vmatmul.mubr.f32.gmra.mrb[32].mxu0 %v1905_v34  ;;  %v13173_v34 = vld [vmem:[%s14082_s1 + $0x40] sm:$0xff] }
 0x1ae   : > { %9955 = vmatprep.mubr.f32.mxu0 %v1906_v35  ;;  %v13176_v35 = vld [vmem:[%s12407_s8 + $0xf4] sm:$0xff] }
 0x1b1   : > { %9956 = vmatmul.mubr.f32.gmra.mrb[34].mxu0 %v1907_v36  ;;  %v13183_v36 = vld [vmem:[%s12407_s8 + $0xfc] sm:$0xff] }
 0x1b2   : > { %9990 = vmatprep.mubr.f32.mxu0 %v2278_v37  ;;  %v13188_v37 = vld [vmem:[%s14082_s1 + $0x48] sm:$0xff] }
 0x1b5   : > { %9991 = vmatmul.mubr.f32.vlgmr.msra.gmra.mrb[0].mxu0 %v2279_v40  ;;  %v13203_v40 = vld [vmem:[%s12407_s8 + $0x10c] sm:$0xff] }
 0x1b6   : > { %11271 = vmatpush3.bf16.msra.mxu0 %v11268_v17  ;;  %9993 = vmatprep.mubr.f32.mxu0 %v12976_v41  ;;  %v12299_v17 = vmov 0  }
 0x1b7   : > { %11273 = vmatprep.subr.bf16.mxu0 %v11272_v42  ;;  %12253 = vset.pattern.permute.xlu0 %v12299_v17 }
 0x1b8   : > { %4055 = vperm.xlu0 %12253, %v13094_v18   ;;  %12254 = vset.pattern.permute.xlu1 %v12299_v17  ;;  %v8564_v17 = vld [vmem:[%s14083_s2 + $0x3c0] sm:$0xff] }
 0x1b9   : > { %9994 = vmatmul.mubr.f32.gmra.mrb[2].mxu0 %v12986_v45  ;;  %4065 = vperm.xlu1 %12254, %v13108_v21  }
 0x1ba   : > { %9996 = vmatprep.mubr.f32.mxu0 %v12989_v46  ;;  %11275 = vmatpush3.bf16.msra.mxu0 %v11272_v42  ;;  %v13208_v42 = vld [vmem:[%s14082_s1 + $0x58] sm:$0xff] }
 0x1bb   : > { %11277 = vmatprep.subr.bf16.mxu0 %v11276_v47 }
 0x1bc   : > { %4060 = vperm.xlu0 %12253, %v13113_v22  }
 0x1bd   : > { %9997 = vmatmul.mubr.f32.gmra.mrb[4].mxu0 %v13000_v50  ;;  %4070 = vperm.xlu1 %12254, %v13131_v26  }
 0x1be   : > { %9999 = vmatprep.mubr.f32.mxu0 %v13003_v51  ;;  %11279 = vmatpush3.bf16.msra.mxu0 %v11276_v47  ;;  %v13223_v47 = vld [vmem:[%s12407_s8 + $0x11c] sm:$0xff] }
 0x1bf   : > { %11281 = vmatprep.subr.bf16.mxu0 %v11280_v52 }
 0x1c0   : > { %4075 = vperm.xlu0 %12253, %v13136_v27  }
 0x1c1   : > { %10000 = vmatmul.mubr.f32.gmra.mrb[6].mxu0 %v13014_v55  ;;  %4080 = vperm.xlu1 %12254, %v13148_v29  }
 0x1c2   : > { %10002 = vmatprep.mubr.f32.mxu0 %v13017_v56  ;;  %11283 = vmatpush3.bf16.msra.mxu0 %v11280_v52  ;;  %v13236_v52 = vld [vmem:[%s12407_s8 + $0x124] sm:$0xff] }
 0x1c3   : > { %11285 = vmatprep.subr.bf16.mxu0 %v11284_v57 }
 0x1c4   : > { %4085 = vperm.xlu0 %12253, %v13153_v30  }
 0x1c5   : > { %10003 = vmatmul.mubr.f32.gmra.mrb[8].mxu0 %v13028_v60  ;;  %4090 = vperm.xlu1 %12254, %v13168_v33  }
 0x1c6   : > { %10005 = vmatprep.mubr.f32.mxu0 %v13031_v61  ;;  %11287 = vmatpush3.bf16.msra.mxu0 %v11284_v57  ;;  %v13253_v57 = vld [vmem:[%s14082_s1 + $0x80] sm:$0xff] }
 0x1c7   : > { %11289 = vmatprep.subr.bf16.mxu0 %v11288_v62 }
 0x1c8   : > { %4095 = vperm.xlu0 %12253, %v13173_v34  }
 0x1c9   : > { %10006 = vmatmul.mubr.f32.gmra.mrb[10].mxu0 %v13042_v1  ;;  %4100 = vperm.xlu1 %12254, %v13188_v37  }
 0x1ca   : > { %10008 = vmatprep.mubr.f32.mxu0 %v13045_v2  ;;  %11291 = vmatpush3.bf16.msra.mxu0 %v11288_v62  ;;  %v13268_v62 = vld [vmem:[%s14082_s1 + $0x88] sm:$0xff] }
 0x1cb   : > { %11293 = vmatprep.subr.bf16.mxu0 %v11292_v3 }
 0x1cc   : > { %4105 = vperm.xlu0 %12253, %v13193_v38  }
 0x1cd   : > { %10009 = vmatmul.mubr.f32.gmra.mrb[12].mxu0 %v13056_v6  ;;  %4110 = vperm.xlu1 %12254, %v13208_v42  }
 0x1ce   : > { %10011 = vmatprep.mubr.f32.mxu0 %v13059_v7  ;;  %11295 = vmatpush3.bf16.msra.mxu0 %v11292_v3  ;;  %v8560_v3 = vld [vmem:[%s14083_s2 + $0x3a0] sm:$0xff] }
 0x1cf   : > { %11297 = vmatprep.subr.bf16.mxu0 %v11296_v8 }
 0x1d0   : > { %4115 = vperm.xlu0 %12253, %v13213_v43  }
 0x1d1   : > { %10012 = vmatmul.mubr.f32.gmra.mrb[14].mxu0 %v13070_v11  ;;  %4120 = vperm.xlu1 %12254, %v13228_v48  }
 0x1d2   : > { %10014 = vmatprep.mubr.f32.mxu0 %v13073_v12  ;;  %11299 = vmatpush3.bf16.msra.mxu0 %v11296_v8  ;;  %v11308_v8 = vpack.c.bf16 %v8561_v4, %v8560_v3  ;;  %v13354_v3 = vld [vmem:[%s14082_s1 + $0xd0] sm:$0xff] }
 0x1d3   : > { %11301 = vmatprep.subr.bf16.mxu0 %v13075_v13 }
 0x1d4   : > { %4125 = vperm.xlu0 %12253, %v13233_v49  }
 0x1d5   : > { %10015 = vmatmul.mubr.f32.gmra.mrb[16].mxu0 %v13080_v14  ;;  %4130 = vperm.xlu1 %12254, %v13248_v54  }
 0x1d6   : > { %10017 = vmatprep.mubr.f32.mxu0 %v13083_v15 }
 0x1d8   : > { %4135 = vperm.xlu0 %12253, %v13253_v57  }
 0x1d9   : > { %10018 = vmatmul.mubr.f32.gmra.mrb[18].mxu0 %v13089_v16  ;;  %4140 = vperm.xlu1 %12254, %v13268_v62  }
 0x1da   : > { %10020 = vmatprep.mubr.f32.mxu0 %v13097_v19 }
 0x1dc   : > { %4145 = vperm.xlu0 %12253, %v13273_v63  }
 0x1dd   : > { %10021 = vmatmul.mubr.f32.gmra.mrb[20].mxu0 %v13103_v20 }
 0x1de   : > { %10023 = vmatprep.mubr.f32.mxu0 %v13116_v23 }
 0x1e0   : > { %4155 = vperm.xlu0 %12253, %v13294_v5  }
 0x1e1   : > { %10024 = vmatmul.mubr.f32.gmra.mrb[22].mxu0 %v13123_v24 }
 0x1e2   : > { %10026 = vmatprep.mubr.f32.mxu0 %v13126_v25 }
 0x1e5   : > { %10027 = vmatmul.mubr.f32.gmra.mrb[24].mxu0 %v13143_v28 }
 0x1e6   : > { %10029 = vmatprep.mubr.f32.mxu0 %v13156_v31 }
 0x1e9   : > { %10030 = vmatmul.mubr.f32.gmra.mrb[26].mxu0 %v13163_v32 }
 0x1ea   : > { %10032 = vmatprep.mubr.f32.mxu0 %v13176_v35 }
 0x1ed   : > { %10033 = vmatmul.mubr.f32.gmra.mrb[28].mxu0 %v13183_v36 }
 0x1ee   : > { %10035 = vmatprep.mubr.f32.mxu0 %v13196_v39 }
 0x1f1   : > { %10036 = vmatmul.mubr.f32.gmra.mrb[30].mxu0 %v13203_v40 }
 0x1f2   : > { %10038 = vmatprep.mubr.f32.mxu0 %v13216_v44 }
 0x1f5   : > { %10039 = vmatmul.mubr.f32.gmra.mrb[32].mxu0 %v13223_v47 }
 0x1f6   : > { %10041 = vmatprep.mubr.f32.mxu0 %v13236_v52 }
 0x1f9   : > { %10042 = vmatmul.mubr.f32.gmra.mrb[34].mxu0 %v13243_v53 }
 0x1fa   : > { %10076 = vmatprep.mubr.f32.mxu0 %v12976_v41  ;;  %v13289_v41 = vld [vmem:[%s14082_s1 + $0x98] sm:$0xff] }
 0x1fb   : > { %4150 = vperm.xlu1 %12254, %v13289_v41  }
 0x1fd   : > { %10077 = vmatmul.mubr.f32.vlgmr.msra.gmra.mrb[0].mxu0 %v12986_v45  ;;  %v8562_v45 = vld [vmem:[%s14083_s2 + $0x3b0] sm:$0xff] }
 0x1fe   : > { %11303 = vmatpush3.bf16.msra.mxu0 %v13075_v13  ;;  %10079 = vmatprep.mubr.f32.mxu0 %v12989_v46  ;;  %v8563_v46 = vld [vmem:[%s14083_s2 + $0x3b8] sm:$0xff]  ;;  %v13314_v13 = vld [vmem:[%s14082_s1 + $0xb0] sm:$0xff] }
 0x1ff   : > { %11305 = vmatprep.subr.bf16.mxu0 %v11304_v0  ;;  %v11312_v9 = vpack.c.bf16 %v8563_v46, %v8562_v45  ;;  %4160 = vperm.xlu1 %12254, %v13309_v10   ;;  %v13374_v45 = vld [vmem:[%s14082_s1 + $0xe0] sm:$0xff] }
 0x200   : > { %4165 = vperm.xlu0 %12253, %v13314_v13  }
 0x201   : > { %10080 = vmatmul.mubr.f32.gmra.mrb[2].mxu0 %v13000_v50  ;;  %v8565_v50 = vld [vmem:[%s14083_s2 + $0x3c8] sm:$0xff] }
 0x202   : > { %10082 = vmatprep.mubr.f32.mxu0 %v13003_v51  ;;  %11307 = vmatpush3.bf16.msra.mxu0 %v11304_v0  ;;  %v13329_v51 = vld [vmem:[%s14082_s1 + $0xb8] sm:$0xff]  ;;  %v11316_v59 = vpack.c.bf16 %v8565_v50, %v8564_v17  ;;  %v8566_v0 = vld [vmem:[%s14083_s2 + $0x3d0] sm:$0xff] }
 0x203   : > { %11309 = vmatprep.subr.bf16.mxu0 %v11308_v8  ;;  %4170 = vperm.xlu1 %12254, %v13329_v51   ;;  %v13394_v17 = vld [vmem:[%s14082_s1 + $0xf0] sm:$0xff] }
 0x204   : > { %4175 = vperm.xlu0 %12253, %v13334_v58  }
 0x205   : > { %10083 = vmatmul.mubr.f32.gmra.mrb[4].mxu0 %v13014_v55  ;;  %v8567_v55 = vld [vmem:[%s14083_s2 + $0x3d8] sm:$0xff] }
 0x206   : > { %10085 = vmatprep.mubr.f32.mxu0 %v13017_v56  ;;  %11311 = vmatpush3.bf16.msra.mxu0 %v11308_v8  ;;  %v13349_v56 = vld [vmem:[%s14082_s1 + $0xc8] sm:$0xff]  ;;  %v11320_v4 = vpack.c.bf16 %v8567_v55, %v8566_v0  ;;  %v8568_v8 = vld [vmem:[%s14083_s2 + $0x3e0] sm:$0xff] }
 0x207   : > { %11313 = vmatprep.subr.bf16.mxu0 %v11312_v9  ;;  %4180 = vperm.xlu1 %12254, %v13349_v56   ;;  %v13414_v0 = vld [vmem:[%s14082_s1 + $0x100] sm:$0xff] }
 0x208   : > { %4185 = vperm.xlu0 %12253, %v13354_v3  }
 0x209   : > { %10086 = vmatmul.mubr.f32.gmra.mrb[6].mxu0 %v13028_v60  ;;  %v8569_v60 = vld [vmem:[%s14083_s2 + $0x3e8] sm:$0xff] }
 0x20a   : > { %10088 = vmatprep.mubr.f32.mxu0 %v13031_v61  ;;  %11315 = vmatpush3.bf16.msra.mxu0 %v11312_v9  ;;  %v13369_v61 = vld [vmem:[%s14082_s1 + $0xd8] sm:$0xff]  ;;  %v11324_v46 = vpack.c.bf16 %v8569_v60, %v8568_v8  ;;  %v8570_v9 = vld [vmem:[%s14083_s2 + $0x3f0] sm:$0xff] }
 0x20b   : > { %11317 = vmatprep.subr.bf16.mxu0 %v11316_v59  ;;  %4190 = vperm.xlu1 %12254, %v13369_v61   ;;  %v3105_v60 = vld [vmem:[%s12407_s8 + $0x9d] sm:$0xff] }
 0x20c   : > { %4195 = vperm.xlu0 %12253, %v13374_v45  }
 0x20d   : > { %10089 = vmatmul.mubr.f32.gmra.mrb[8].mxu0 %v13042_v1  ;;  %v8571_v1 = vld [vmem:[%s14083_s2 + $0x3f8] sm:$0xff] }
 0x20e   : > { %10091 = vmatprep.mubr.f32.mxu0 %v13045_v2  ;;  %11319 = vmatpush3.bf16.msra.mxu0 %v11316_v59  ;;  %v13389_v2 = vld [vmem:[%s14082_s1 + $0xe8] sm:$0xff]  ;;  %v11328_v50 = vpack.c.bf16 %v8571_v1, %v8570_v9  ;;  %v8572_v59 = vld [vmem:[%s14083_s2 + $0x400] sm:$0xff] }
 0x20f   : > { %11321 = vmatprep.subr.bf16.mxu0 %v11320_v4  ;;  %4200 = vperm.xlu1 %12254, %v13389_v2   ;;  %v3109_v9 = vld [vmem:[%s12407_s8 + $0xbd] sm:$0xff]  ;;  %v3110_v1 = vld [vmem:[%s12407_s8 + $0xc5] sm:$0xff] }
 0x210   : > { %4205 = vperm.xlu0 %12253, %v13394_v17  }
 0x211   : > { %10092 = vmatmul.mubr.f32.gmra.mrb[10].mxu0 %v13056_v6  ;;  %v8573_v6 = vld [vmem:[%s14083_s2 + $0x408] sm:$0xff] }
 0x212   : > { %10094 = vmatprep.mubr.f32.mxu0 %v13059_v7  ;;  %11323 = vmatpush3.bf16.msra.mxu0 %v11320_v4  ;;  %v13409_v7 = vld [vmem:[%s14082_s1 + $0xf8] sm:$0xff]  ;;  %v11332_v55 = vpack.c.bf16 %v8573_v6, %v8572_v59  ;;  %v3114_v59 = vld [vmem:[%s12407_s8 + $0xe5] sm:$0xff]  ;;  %v3115_v6 = vld [vmem:[%s12407_s8 + $0xed] sm:$0xff] }
 0x213   : > { %11325 = vmatprep.subr.bf16.mxu0 %v11324_v46  ;;  %4210 = vperm.xlu1 %12254, %v13409_v7   ;;  %v3104_v4 = vld [vmem:[%s12407_s8 + $0x95] sm:$0xff] }
 0x214   : > { %4215 = vperm.xlu0 %12253, %v13414_v0  }
 0x215   : > { %10095 = vmatmul.mubr.f32.gmra.mrb[12].mxu0 %v13070_v11  ;;  %v13423_v11 = vld [vmem:[%s14082_s1 + $0x108] sm:$0xff] }
 0x216   : > { %10097 = vmatprep.mubr.f32.mxu0 %v13073_v12  ;;  %11327 = vmatpush3.bf16.msra.mxu0 %v11324_v46  ;;  %v13428_v12 = vld [vmem:[%s14082_s1 + $0x110] sm:$0xff] }
 0x217   : > { %11329 = vmatprep.subr.bf16.mxu0 %v11328_v50  ;;  %4220 = vperm.xlu1 %12254, %v13423_v11   ;;  %v3108_v46 = vld [vmem:[%s12407_s8 + $0xb5] sm:$0xff] }
 0x218   : > { %4225 = vperm.xlu0 %12253, %v13428_v12  }
 0x219   : > { %10098 = vmatmul.mubr.f32.gmra.mrb[14].mxu0 %v13080_v14  ;;  %v13437_v14 = vld [vmem:[%s14082_s1 + $0x118] sm:$0xff] }
 0x21a   : > { %10100 = vmatprep.mubr.f32.mxu0 %v13083_v15  ;;  %11331 = vmatpush3.bf16.msra.mxu0 %v11328_v50  ;;  %v2718_v15 = vld [vmem:[%s12407_s8 + $0x134] sm:$0xff]  ;;  %v3113_v50 = vld [vmem:[%s12407_s8 + $0xdd] sm:$0xff] }
 0x21b   : > { %11333 = vmatprep.subr.bf16.mxu0 %v11332_v55  ;;  %4230 = vperm.xlu1 %12254, %v13437_v14  }
 0x21c   : > { %8039 = vperm.xlu0 %12253, %v13094_v18   ;;  %v3090_v18 = vld [vmem:[%s12407_s8 + $0x25] sm:$0xff] }
 0x21d   : > { %10101 = vmatmul.mubr.f32.gmra.mrb[16].mxu0 %v13089_v16  ;;  %v2719_v16 = vld [vmem:[%s12407_s8 + $0x13c] sm:$0xff] }
 0x21e   : > { %10103 = vmatprep.mubr.f32.mxu0 %v13097_v19  ;;  %v8574_v19 = vld [vmem:[%s14083_s2 + $0x410] sm:$0xff] }
 0x21f   : > { %8044 = vperm.xlu1 %12254, %v13113_v22   ;;  %v3092_v22 = vld [vmem:[%s12407_s8 + $0x35] sm:$0xff] }
 0x220   : > { %8049 = vperm.xlu0 %12253, %v13108_v21   ;;  %v3091_v21 = vld [vmem:[%s12407_s8 + $0x2d] sm:$0xff] }
 0x221   : > { %10104 = vmatmul.mubr.f32.gmra.mrb[18].mxu0 %v13103_v20  ;;  %v8575_v20 = vld [vmem:[%s14083_s2 + $0x418] sm:$0xff] }
 0x222   : > { %10106 = vmatprep.mubr.f32.mxu0 %v13116_v23  ;;  %v11336_v23 = vpack.c.bf16 %v8575_v20, %v8574_v19  ;;  %v3125_v19 = vld [vmem:[%s12407_s8 + $0x13d] sm:$0xff]  ;;  %v3496_v20 = vld [vmem:[%s12407_s8 + $0x26] sm:$0xff] }
 0x223   : > { %8054 = vperm.xlu1 %12254, %v13131_v26   ;;  %v3093_v26 = vld [vmem:[%s12407_s8 + $0x3d] sm:$0xff] }
 0x224   : > { %8059 = vperm.xlu0 %12253, %v13136_v27   ;;  %v3094_v27 = vld [vmem:[%s12407_s8 + $0x45] sm:$0xff] }
 0x225   : > { %10107 = vmatmul.mubr.f32.gmra.mrb[20].mxu0 %v13123_v24  ;;  %v8576_v24 = vld [vmem:[%s14083_s2 + $0x420] sm:$0xff] }
 0x226   : > { %10109 = vmatprep.mubr.f32.mxu0 %v13126_v25  ;;  %v8577_v25 = vld [vmem:[%s14083_s2 + $0x428] sm:$0xff] }
 0x227   : > { %8064 = vperm.xlu1 %12254, %v13148_v29   ;;  %v8578_v29 = vld [vmem:[%s14083_s2 + $0x430] sm:$0xff] }
 0x228   : > { %8069 = vperm.xlu0 %12253, %v13153_v30   ;;  %v8579_v30 = vld [vmem:[%s14083_s2 + $0x438] sm:$0xff] }
 0x229   : > { %10110 = vmatmul.mubr.f32.gmra.mrb[22].mxu0 %v13143_v28  ;;  %v11340_v28 = vpack.c.bf16 %v8577_v25, %v8576_v24  ;;  %v3500_v24 = vld [vmem:[%s12407_s8 + $0x46] sm:$0xff]  ;;  %v3501_v25 = vld [vmem:[%s12407_s8 + $0x4e] sm:$0xff] }
 0x22a   : > { %10112 = vmatprep.mubr.f32.mxu0 %v13156_v31  ;;  %v3095_v31 = vld [vmem:[%s12407_s8 + $0x4d] sm:$0xff] }
 0x22b   : > { %8074 = vperm.xlu1 %12254, %v13168_v33   ;;  %v11344_v33 = vpack.c.bf16 %v8579_v30, %v8578_v29  ;;  %v3505_v29 = vld [vmem:[%s12407_s8 + $0x6e] sm:$0xff]  ;;  %v3506_v30 = vld [vmem:[%s12407_s8 + $0x76] sm:$0xff] }
 0x22c   : > { %8079 = vperm.xlu0 %12253, %v13173_v34   ;;  %v8580_v34 = vld [vmem:[%s14083_s2 + $0x440] sm:$0xff] }
 0x22d   : > { %10113 = vmatmul.mubr.f32.gmra.mrb[24].mxu0 %v13163_v32  ;;  %v3096_v32 = vld [vmem:[%s12407_s8 + $0x55] sm:$0xff] }
 0x22e   : > { %10115 = vmatprep.mubr.f32.mxu0 %v13176_v35  ;;  %v8581_v35 = vld [vmem:[%s14083_s2 + $0x448] sm:$0xff] }
 0x22f   : > { %8084 = vperm.xlu1 %12254, %v13188_v37   ;;  %v3098_v37 = vld [vmem:[%s12407_s8 + $0x65] sm:$0xff] }
 0x230   : > { %8089 = vperm.xlu0 %12253, %v13193_v38   ;;  %v11348_v38 = vpack.c.bf16 %v8581_v35, %v8580_v34  ;;  %v3510_v34 = vld [vmem:[%s12407_s8 + $0x96] sm:$0xff]  ;;  %v3511_v35 = vld [vmem:[%s12407_s8 + $0x9e] sm:$0xff] }
 0x231   : > { %10116 = vmatmul.mubr.f32.gmra.mrb[26].mxu0 %v13183_v36  ;;  %v3097_v36 = vld [vmem:[%s12407_s8 + $0x5d] sm:$0xff] }
 0x232   : > { %10118 = vmatprep.mubr.f32.mxu0 %v13196_v39  ;;  %v8582_v39 = vld [vmem:[%s14083_s2 + $0x450] sm:$0xff] }
 0x233   : > { %8094 = vperm.xlu1 %12254, %v13208_v42   ;;  %v4341_v42 = vld [vmem:[#allocation4] sm:$0xff] }
 0x234   : > { %8099 = vperm.xlu0 %12253, %v13213_v43   ;;  %v4342_v43 = vld [vmem:[#allocation4 + $0x8] sm:$0xff] }
 0x235   : > { %10119 = vmatmul.mubr.f32.gmra.mrb[28].mxu0 %v13203_v40  ;;  %v8583_v40 = vld [vmem:[%s14083_s2 + $0x458] sm:$0xff] }
 0x236   : > { %10121 = vmatprep.mubr.f32.mxu0 %v13216_v44  ;;  %v3099_v44 = vld [vmem:[%s12407_s8 + $0x6d] sm:$0xff] }
 0x237   : > { %8104 = vperm.xlu1 %12254, %v13228_v48   ;;  %v4343_v48 = vld [vmem:[#allocation4 + $0x10] sm:$0xff] }
 0x238   : > { %8109 = vperm.xlu0 %12253, %v13233_v49   ;;  %v4344_v49 = vld [vmem:[#allocation4 + $0x18] sm:$0xff] }
 0x239   : > { %10122 = vmatmul.mubr.f32.gmra.mrb[30].mxu0 %v13223_v47  ;;  %v11364_v47 = vpack.c.bf16 %v4342_v43, %v4341_v42  ;;  %v3517_v42 = vld [vmem:[%s12407_s8 + $0xce] sm:$0xff]  ;;  %v3518_v43 = vld [vmem:[%s12407_s8 + $0xd6] sm:$0xff] }
 0x23a   : > { %10124 = vmatprep.mubr.f32.mxu0 %v13236_v52  ;;  %v3100_v52 = vld [vmem:[%s12407_s8 + $0x75] sm:$0xff] }
 0x23b   : > { %8114 = vperm.xlu1 %12254, %v13248_v54   ;;  %v8584_v54 = vld [vmem:[%s14083_s2 + $0x460] sm:$0xff]  ;;  %11365 = vmatprep.subr.bf16.mxu1 %v11364_v47 }
 0x23c   : > { %8119 = vperm.xlu0 %12253, %v13253_v57   ;;  %v8585_v57 = vld [vmem:[%s14083_s2 + $0x468] sm:$0xff]  ;;  %11367 = vmatpush3.bf16.msra.mxu1 %v11364_v47 }
 0x23d   : > { %10125 = vmatmul.mubr.f32.gmra.mrb[32].mxu0 %v13243_v53  ;;  %v11352_v53 = vpack.c.bf16 %v8583_v40, %v8582_v39  ;;  %v3515_v39 = vld [vmem:[%s12407_s8 + $0xbe] sm:$0xff]  ;;  %v3516_v40 = vld [vmem:[%s12407_s8 + $0xc6] sm:$0xff] }
 0x23e   : > { %10127 = vmatprep.mubr.f32.mxu0 %v2718_v15  ;;  %v3122_v15 = vld [vmem:[%s12407_s8 + $0x125] sm:$0xff] }
 0x23f   : > { %8124 = vperm.xlu1 %12254, %v13268_v62   ;;  %v11368_v62 = vpack.c.bf16 %v4344_v49, %v4343_v48  ;;  %v3520_v47 = vld [vmem:[%s12407_s8 + $0xe6] sm:$0xff]  ;;  %v3521_v48 = vld [vmem:[%s12407_s8 + $0xee] sm:$0xff]  ;;  %v3522_v49 = vld [vmem:[%s12407_s8 + $0xf6] sm:$0xff] }
 0x240   : > { %8129 = vperm.xlu0 %12253, %v13273_v63   ;;  %v3101_v63 = vld [vmem:[%s12407_s8 + $0x7d] sm:$0xff] }
 0x241   : > { %10128 = vmatmul.mubr.f32.gmra.mrb[34].mxu0 %v2719_v16  ;;  %11369 = vmatprep.subr.bf16.mxu1 %v11368_v62  ;;  %v3123_v16 = vld [vmem:[%s12407_s8 + $0x12d] sm:$0xff] }
 0x242   : > { %10162 = vmatprep.mubr.f32.mxu0 %v3090_v18  ;;  %11371 = vmatpush3.bf16.msra.mxu1 %v11368_v62  ;;  %v3124_v18 = vld [vmem:[%s12407_s8 + $0x135] sm:$0xff]  ;;  %v3527_v62 = vld [vmem:[%s12407_s8 + $0x11e] sm:$0xff] }
 0x243   : > { %8134 = vperm.xlu1 %12254, %v13289_v41   ;;  %v4345_v41 = vld [vmem:[#allocation4 + $0x20] sm:$0xff] }
 0x244   : > { %8139 = vperm.xlu0 %12253, %v13294_v5   ;;  %v4346_v5 = vld [vmem:[#allocation4 + $0x28] sm:$0xff] }
 0x245   : > { %10163 = vmatmul.mubr.f32.vlgmr.msra.gmra.mrb[0].mxu0 %v3091_v21  ;;  %v3497_v21 = vld [vmem:[%s12407_s8 + $0x2e] sm:$0xff] }
 0x246   : > { %11335 = vmatpush3.bf16.msra.mxu0 %v11332_v55  ;;  %10165 = vmatprep.mubr.f32.mxu0 %v3092_v22  ;;  %v3118_v55 = vld [vmem:[%s12407_s8 + $0x105] sm:$0xff]  ;;  %v3498_v22 = vld [vmem:[%s12407_s8 + $0x36] sm:$0xff] }
 0x247   : > { %11337 = vmatprep.subr.bf16.mxu0 %v11336_v23  ;;  %8144 = vperm.xlu1 %12254, %v13309_v10   ;;  %v3102_v10 = vld [vmem:[%s12407_s8 + $0x85] sm:$0xff] }
 0x248   : > { %8149 = vperm.xlu0 %12253, %v13314_v13   ;;  %v11356_v13 = vpack.c.bf16 %v8585_v57, %v8584_v54  ;;  %v3525_v54 = vld [vmem:[%s12407_s8 + $0x10e] sm:$0xff]  ;;  %v3526_v57 = vld [vmem:[%s12407_s8 + $0x116] sm:$0xff] }
 0x249   : > { %10166 = vmatmul.mubr.f32.gmra.mrb[2].mxu0 %v3093_v26  ;;  %v3502_v26 = vld [vmem:[%s12407_s8 + $0x56] sm:$0xff] }
 0x24a   : > { %10168 = vmatprep.mubr.f32.mxu0 %v3094_v27  ;;  %11339 = vmatpush3.bf16.msra.mxu0 %v11336_v23  ;;  %v3499_v23 = vld [vmem:[%s12407_s8 + $0x3e] sm:$0xff] }
 0x24b   : > { %11341 = vmatprep.subr.bf16.mxu0 %v11340_v28  ;;  %8154 = vperm.xlu1 %12254, %v13329_v51   ;;  %v8586_v51 = vld [vmem:[%s14083_s2 + $0x470] sm:$0xff]  ;;  %v3503_v27 = vld [vmem:[%s12407_s8 + $0x5e] sm:$0xff] }
 0x24c   : > { %8159 = vperm.xlu0 %12253, %v13334_v58   ;;  %v8587_v58 = vld [vmem:[%s14083_s2 + $0x478] sm:$0xff] }
 0x24d   : > { %10169 = vmatmul.mubr.f32.gmra.mrb[4].mxu0 %v3095_v31  ;;  %v11360_v8 = vpack.c.bf16 %v8587_v58, %v8586_v51  ;;  %v3507_v31 = vld [vmem:[%s12407_s8 + $0x7e] sm:$0xff] }
 0x24e   : > { %10171 = vmatprep.mubr.f32.mxu0 %v3096_v32  ;;  %11343 = vmatpush3.bf16.msra.mxu0 %v11340_v28  ;;  %v3504_v28 = vld [vmem:[%s12407_s8 + $0x66] sm:$0xff] }
 0x24f   : > { %11345 = vmatprep.subr.bf16.mxu0 %v11344_v33  ;;  %8164 = vperm.xlu1 %12254, %v13349_v56   ;;  %v11372_v56 = vpack.c.bf16 %v4346_v5, %v4345_v41  ;;  %v3508_v32 = vld [vmem:[%s12407_s8 + $0x86] sm:$0xff]  ;;  %v3529_v41 = vld [vmem:[%s12407_s8 + $0x12e] sm:$0xff]  ;;  %v3530_v5 = vld [vmem:[%s12407_s8 + $0x136] sm:$0xff] }
 0x250   : > { %8169 = vperm.xlu0 %12253, %v13354_v3   ;;  %v3103_v3 = vld [vmem:[%s12407_s8 + $0x8d] sm:$0xff]  ;;  %v4348_v51 = vld [vmem:[#allocation4 + $0x38] sm:$0xff] }
 0x251   : > { %10172 = vmatmul.mubr.f32.gmra.mrb[6].mxu0 %v3097_v36  ;;  %11373 = vmatprep.subr.bf16.mxu1 %v11372_v56  ;;  %v3512_v36 = vld [vmem:[%s12407_s8 + $0xa6] sm:$0xff] }
 0x252   : > { %10174 = vmatprep.mubr.f32.mxu0 %v3098_v37  ;;  %11347 = vmatpush3.bf16.msra.mxu0 %v11344_v33  ;;  %v3509_v33 = vld [vmem:[%s12407_s8 + $0x8e] sm:$0xff] }
 0x253   : > { %11349 = vmatprep.subr.bf16.mxu0 %v11348_v38  ;;  %8174 = vperm.xlu1 %12254, %v13369_v61   ;;  %v3106_v61 = vld [vmem:[%s12407_s8 + $0xa5] sm:$0xff]  ;;  %v3513_v37 = vld [vmem:[%s12407_s8 + $0xae] sm:$0xff] }
 0x254   : > { %8179 = vperm.xlu0 %12253, %v13374_v45   ;;  %11375 = vmatpush3.bf16.msra.mxu1 %v11372_v56  ;;  %v3107_v45 = vld [vmem:[%s12407_s8 + $0xad] sm:$0xff] }
 0x255   : > { %10175 = vmatmul.mubr.f32.gmra.mrb[8].mxu0 %v3099_v44  ;;  %v3519_v44 = vld [vmem:[%s12407_s8 + $0xde] sm:$0xff]  ;;  %v4349_v56 = vld [vmem:[#allocation4 + $0x40] sm:$0xff] }
 0x256   : > { %10177 = vmatprep.mubr.f32.mxu0 %v3100_v52  ;;  %11351 = vmatpush3.bf16.msra.mxu0 %v11348_v38  ;;  %v3514_v38 = vld [vmem:[%s12407_s8 + $0xb6] sm:$0xff]  ;;  %v3523_v52 = vld [vmem:[%s12407_s8 + $0xfe] sm:$0xff] }
 0x257   : > { %11353 = vmatprep.subr.bf16.mxu0 %v11352_v53  ;;  %8184 = vperm.xlu1 %12254, %v13389_v2   ;;  %v3111_v2 = vld [vmem:[%s12407_s8 + $0xcd] sm:$0xff] }
 0x258   : > { %8189 = vperm.xlu0 %12253, %v13394_v17   ;;  %v3112_v17 = vld [vmem:[%s12407_s8 + $0xd5] sm:$0xff] }
 0x259   : > { %10178 = vmatmul.mubr.f32.gmra.mrb[10].mxu0 %v3101_v63  ;;  %v3528_v63 = vld [vmem:[%s12407_s8 + $0x126] sm:$0xff] }
 0x25a   : > { %10180 = vmatprep.mubr.f32.mxu0 %v3102_v10  ;;  %11355 = vmatpush3.bf16.msra.mxu0 %v11352_v53  ;;  %v3524_v53 = vld [vmem:[%s12407_s8 + $0x106] sm:$0xff]  ;;  %v3531_v10 = vld [vmem:[%s12407_s8 + $0x13e] sm:$0xff] }
 0x25b   : > { %11357 = vmatprep.subr.bf16.mxu0 %v11356_v13  ;;  %8194 = vperm.xlu1 %12254, %v13409_v7   ;;  %v3116_v7 = vld [vmem:[%s12407_s8 + $0xf5] sm:$0xff] }
 0x25c   : > { %8199 = vperm.xlu0 %12253, %v13414_v0   ;;  %v3117_v0 = vld [vmem:[%s12407_s8 + $0xfd] sm:$0xff] }
 0x25d   : > { %10181 = vmatmul.mubr.f32.gmra.mrb[12].mxu0 %v3103_v3  ;;  %v4350_v3 = vld [vmem:[#allocation4 + $0x48] sm:$0xff] }
 0x25e   : > { %10183 = vmatprep.mubr.f32.mxu0 %v3104_v4  ;;  %11359 = vmatpush3.bf16.msra.mxu0 %v11356_v13  ;;  %v4347_v13 = vld [vmem:[#allocation4 + $0x30] sm:$0xff]  ;;  %v11380_v4 = vpack.c.bf16 %v4350_v3, %v4349_v56 }
 0x25f   : > { %11361 = vmatprep.subr.bf16.mxu0 %v11360_v8  ;;  %8204 = vperm.xlu1 %12254, %v13423_v11   ;;  %v3119_v11 = vld [vmem:[%s12407_s8 + $0x10d] sm:$0xff]  ;;  %v11376_v58 = vpack.c.bf16 %v4348_v51, %v4347_v13 }
 0x260   : > { %8209 = vperm.xlu0 %12253, %v13428_v12   ;;  %v3120_v12 = vld [vmem:[%s12407_s8 + $0x115] sm:$0xff] }
 0x261   : > { %10184 = vmatmul.mubr.f32.gmra.mrb[14].mxu0 %v3105_v60  ;;  %11377 = vmatprep.subr.bf16.mxu1 %v11376_v58  ;;  %v4352_v60 = vld [vmem:[#allocation4 + $0x58] sm:$0xff] }
 0x262   : > { %10186 = vmatprep.mubr.f32.mxu0 %v3106_v61  ;;  %11363 = vmatpush3.bf16.msra.mxu0 %v11360_v8  ;;  %v4351_v8 = vld [vmem:[#allocation4 + $0x50] sm:$0xff] }
 0x263   : > { %8214 = vperm.xlu1 %12254, %v13437_v14   ;;  %v3121_v14 = vld [vmem:[%s12407_s8 + $0x11d] sm:$0xff]  ;;  %11379 = vmatpush3.bf16.msra.mxu1 %v11376_v58  ;;  %v11384_v61 = vpack.c.bf16 %v4352_v60, %v4351_v8 }
 0x264   : > { %11381 = vmatprep.subr.bf16.mxu1 %v11380_v4 }
 0x265   : > { %10187 = vmatmul.mubr.f32.gmra.mrb[16].mxu0 %v3107_v45  ;;  %v4353_v45 = vld [vmem:[#allocation4 + $0x60] sm:$0xff] }
 0x266   : > { %10189 = vmatprep.mubr.f32.mxu0 %v3108_v46  ;;  %v4354_v46 = vld [vmem:[#allocation4 + $0x68] sm:$0xff] }
 0x267   : > { %11383 = vmatpush3.bf16.msra.mxu1 %v11380_v4 }
 0x268   : > { %11385 = vmatprep.subr.bf16.mxu1 %v11384_v61 }
 0x269   : > { %10190 = vmatmul.mubr.f32.gmra.mrb[18].mxu0 %v3109_v9  ;;  %v11388_v9 = vpack.c.bf16 %v4354_v46, %v4353_v45 }
 0x26a   : > { %10192 = vmatprep.mubr.f32.mxu0 %v3110_v1  ;;  %v4355_v1 = vld [vmem:[#allocation4 + $0x70] sm:$0xff] }
 0x26b   : > { %11387 = vmatpush3.bf16.msra.mxu1 %v11384_v61 }
 0x26c   : > { %11389 = vmatprep.subr.bf16.mxu1 %v11388_v9 }
 0x26d   : > { %10193 = vmatmul.mubr.f32.gmra.mrb[20].mxu0 %v3111_v2  ;;  %v4356_v2 = vld [vmem:[#allocation4 + $0x78] sm:$0xff] }
 0x26e   : > { %10195 = vmatprep.mubr.f32.mxu0 %v3112_v17  ;;  %v12300_v17 = vmov 0.0  }
 0x26f   : > { %11391 = vmatpush3.bf16.msra.mxu1 %v11388_v9  ;;  %267 = vst [vmem:[#allocation3] sm:$0xff] %v12300_v17  ;;  %10334 = vmatprep.mubr.f32.mxu1 %v12300_v17  ;;  %268 = vst [vmem:[#allocation3 + $0x8] sm:$0xff] %v12300_v17 }
 0x270   : > { %269 = vst [vmem:[#allocation3 + $0x10] sm:$0xff] %v12300_v17  ;;  %270 = vst [vmem:[#allocation3 + $0x18] sm:$0xff] %v12300_v17 }
 0x271   : > { %10196 = vmatmul.mubr.f32.gmra.mrb[22].mxu0 %v3113_v50  ;;  %271 = vst [vmem:[#allocation3 + $0x20] sm:$0xff] %v12300_v17  ;;  %272 = vst [vmem:[#allocation3 + $0x28] sm:$0xff] %v12300_v17  ;;  %v11392_v50 = vpack.c.bf16 %v4356_v2, %v4355_v1 }
 0x272   : > { %10198 = vmatprep.mubr.f32.mxu0 %v3114_v59  ;;  %273 = vst [vmem:[#allocation3 + $0x30] sm:$0xff] %v12300_v17  ;;  %274 = vst [vmem:[#allocation3 + $0x38] sm:$0xff] %v12300_v17  ;;  %v4675_v59 = vld [vmem:[#allocation4 + $0x80] sm:$0xff] }
 0x273   : > { %275 = vst [vmem:[#allocation3 + $0x40] sm:$0xff] %v12300_v17  ;;  %276 = vst [vmem:[#allocation3 + $0x48] sm:$0xff] %v12300_v17  ;;  %11393 = vmatprep.subr.bf16.mxu1 %v11392_v50 }
 0x274   : > { %277 = vst [vmem:[#allocation3 + $0x50] sm:$0xff] %v12300_v17  ;;  %278 = vst [vmem:[#allocation3 + $0x58] sm:$0xff] %v12300_v17  ;;  %11395 = vmatpush3.bf16.msra.mxu1 %v11392_v50 }
 0x275   : > { %10199 = vmatmul.mubr.f32.gmra.mrb[24].mxu0 %v3115_v6  ;;  %279 = vst [vmem:[#allocation3 + $0x60] sm:$0xff] %v12300_v17  ;;  %280 = vst [vmem:[#allocation3 + $0x68] sm:$0xff] %v12300_v17  ;;  %v4676_v6 = vld [vmem:[#allocation4 + $0x88] sm:$0xff] }
 0x276   : > { %10201 = vmatprep.mubr.f32.mxu0 %v3116_v7  ;;  %281 = vst [vmem:[#allocation3 + $0x70] sm:$0xff] %v12300_v17  ;;  %282 = vst [vmem:[#allocation3 + $0x78] sm:$0xff] %v12300_v17  ;;  %v11396_v7 = vpack.c.bf16 %v4676_v6, %v4675_v59 }
 0x277   : > { %283 = vst [vmem:[#allocation3 + $0x80] sm:$0xff] %v12300_v17  ;;  %284 = vst [vmem:[#allocation3 + $0x88] sm:$0xff] %v12300_v17  ;;  %10335 = vmatmul.mubr.f32.vlgmr.msra.gmra.mrb[0].mxu1 %v12300_v17 }
 0x278   : > { %285 = vst [vmem:[#allocation3 + $0x90] sm:$0xff] %v12300_v17  ;;  %286 = vst [vmem:[#allocation3 + $0x98] sm:$0xff] %v12300_v17  ;;  %11397 = vmatprep.subr.bf16.mxu1 %v11396_v7 }
 0x279   : > { %10202 = vmatmul.mubr.f32.gmra.mrb[26].mxu0 %v3117_v0  ;;  %287 = vst [vmem:[#allocation3 + $0xa0] sm:$0xff] %v12300_v17  ;;  %288 = vst [vmem:[#allocation3 + $0xa8] sm:$0xff] %v12300_v17  ;;  %11399 = vmatpush3.bf16.msra.mxu1 %v11396_v7  ;;  %v4677_v0 = vld [vmem:[#allocation4 + $0x90] sm:$0xff] }
 0x27a   : > { %10204 = vmatprep.mubr.f32.mxu0 %v3118_v55  ;;  %289 = vst [vmem:[#allocation3 + $0xb0] sm:$0xff] %v12300_v17  ;;  %290 = vst [vmem:[#allocation3 + $0xb8] sm:$0xff] %v12300_v17  ;;  %v4678_v55 = vld [vmem:[#allocation4 + $0x98] sm:$0xff] }
 0x27b   : > { %291 = vst [vmem:[#allocation3 + $0xc0] sm:$0xff] %v12300_v17  ;;  %292 = vst [vmem:[#allocation3 + $0xc8] sm:$0xff] %v12300_v17 }
 0x27c   : > { %293 = vst [vmem:[#allocation3 + $0xd0] sm:$0xff] %v12300_v17  ;;  %294 = vst [vmem:[#allocation3 + $0xd8] sm:$0xff] %v12300_v17 }
 0x27d   : > { %10205 = vmatmul.mubr.f32.gmra.mrb[28].mxu0 %v3119_v11  ;;  %295 = vst [vmem:[#allocation3 + $0xe0] sm:$0xff] %v12300_v17  ;;  %296 = vst [vmem:[#allocation3 + $0xe8] sm:$0xff] %v12300_v17  ;;  %v11400_v11 = vpack.c.bf16 %v4678_v55, %v4677_v0 }
 0x27e   : > { %10207 = vmatprep.mubr.f32.mxu0 %v3120_v12  ;;  %297 = vst [vmem:[#allocation3 + $0xf0] sm:$0xff] %v12300_v17  ;;  %298 = vst [vmem:[#allocation3 + $0xf8] sm:$0xff] %v12300_v17  ;;  %v4679_v12 = vld [vmem:[#allocation4 + $0xa0] sm:$0xff] }
 0x27f   : > { %299 = vst [vmem:[#allocation3 + $0x100] sm:$0xff] %v12300_v17  ;;  %300 = vst [vmem:[#allocation3 + $0x108] sm:$0xff] %v12300_v17  ;;  %11401 = vmatprep.subr.bf16.mxu1 %v11400_v11 }
 0x280   : > { %301 = vst [vmem:[#allocation3 + $0x110] sm:$0xff] %v12300_v17  ;;  %302 = vst [vmem:[#allocation3 + $0x118] sm:$0xff] %v12300_v17  ;;  %11403 = vmatpush3.bf16.msra.mxu1 %v11400_v11 }
 0x281   : > { %10208 = vmatmul.mubr.f32.gmra.mrb[30].mxu0 %v3121_v14  ;;  %303 = vst [vmem:[#allocation3 + $0x120] sm:$0xff] %v12300_v17  ;;  %304 = vst [vmem:[#allocation3 + $0x128] sm:$0xff] %v12300_v17  ;;  %v4680_v14 = vld [vmem:[#allocation4 + $0xa8] sm:$0xff] }
 0x282   : > { %10210 = vmatprep.mubr.f32.mxu0 %v3122_v15  ;;  %305 = vst [vmem:[#allocation3 + $0x130] sm:$0xff] %v12300_v17  ;;  %306 = vst [vmem:[#allocation3 + $0x138] sm:$0xff] %v12300_v17  ;;  %v11404_v15 = vpack.c.bf16 %v4680_v14, %v4679_v12 }
 0x283   : > { %307 = vst [vmem:[#allocation3 + $0x140] sm:$0x3f] %v12300_v17 }
 0x284   : > { %11405 = vmatprep.subr.bf16.mxu1 %v11404_v15 }
 0x285   : > { %10211 = vmatmul.mubr.f32.gmra.mrb[32].mxu0 %v3123_v16  ;;  %11407 = vmatpush3.bf16.msra.mxu1 %v11404_v15  ;;  %v4681_v16 = vld [vmem:[#allocation4 + $0xb0] sm:$0xff] }
 0x286   : > { %10213 = vmatprep.mubr.f32.mxu0 %v3124_v18  ;;  %v4682_v18 = vld [vmem:[#allocation4 + $0xb8] sm:$0xff] }
 0x289   : > { %10214 = vmatmul.mubr.f32.gmra.mrb[34].mxu0 %v3125_v19  ;;  %v11408_v19 = vpack.c.bf16 %v4682_v18, %v4681_v16 }
 0x28a   : > { %10248 = vmatprep.mubr.f32.mxu0 %v3496_v20  ;;  %v4683_v20 = vld [vmem:[#allocation4 + $0xc0] sm:$0xff] }
 0x28b   : > { %11409 = vmatprep.subr.bf16.mxu1 %v11408_v19 }
 0x28c   : > { %11411 = vmatpush3.bf16.msra.mxu1 %v11408_v19 }
 0x28d   : > { %10249 = vmatmul.mubr.f32.vlgmr.msra.gmra.mrb[0].mxu0 %v3497_v21  ;;  %v4684_v21 = vld [vmem:[#allocation4 + $0xc8] sm:$0xff] }
 0x28e   : > { %10251 = vmatprep.mubr.f32.mxu0 %v3498_v22  ;;  %v11412_v22 = vpack.c.bf16 %v4684_v21, %v4683_v20 }
 0x290   : > { %11413 = vmatprep.subr.bf16.mxu1 %v11412_v22 }
 0x291   : > { %10252 = vmatmul.mubr.f32.gmra.mrb[2].mxu0 %v3499_v23  ;;  %11415 = vmatpush3.bf16.msra.mxu1 %v11412_v22  ;;  %v4685_v23 = vld [vmem:[#allocation4 + $0xd0] sm:$0xff] }
 0x292   : > { %10254 = vmatprep.mubr.f32.mxu0 %v3500_v24  ;;  %v4686_v24 = vld [vmem:[#allocation4 + $0xd8] sm:$0xff] }
 0x295   : > { %10255 = vmatmul.mubr.f32.gmra.mrb[4].mxu0 %v3501_v25  ;;  %v11416_v25 = vpack.c.bf16 %v4686_v24, %v4685_v23 }
 0x296   : > { %10257 = vmatprep.mubr.f32.mxu0 %v3502_v26  ;;  %v4687_v26 = vld [vmem:[#allocation4 + $0xe0] sm:$0xff] }
 0x297   : > { %11417 = vmatprep.subr.bf16.mxu1 %v11416_v25 }
 0x298   : > { %11419 = vmatpush3.bf16.msra.mxu1 %v11416_v25 }
 0x299   : > { %10258 = vmatmul.mubr.f32.gmra.mrb[6].mxu0 %v3503_v27  ;;  %v4688_v27 = vld [vmem:[#allocation4 + $0xe8] sm:$0xff] }
 0x29a   : > { %10260 = vmatprep.mubr.f32.mxu0 %v3504_v28  ;;  %v11420_v28 = vpack.c.bf16 %v4688_v27, %v4687_v26 }
 0x29c   : > { %11421 = vmatprep.subr.bf16.mxu1 %v11420_v28 }
 0x29d   : > { %10261 = vmatmul.mubr.f32.gmra.mrb[8].mxu0 %v3505_v29  ;;  %v4689_v29 = vld [vmem:[#allocation4 + $0xf0] sm:$0xff]  ;;  %11423 = vmatpush3.bf16.msra.mxu1 %v11420_v28 }
 0x29e   : > { %10263 = vmatprep.mubr.f32.mxu0 %v3506_v30  ;;  %v4690_v30 = vld [vmem:[#allocation4 + $0xf8] sm:$0xff] }
 0x2a1   : > { %10264 = vmatmul.mubr.f32.gmra.mrb[10].mxu0 %v3507_v31  ;;  %v11424_v31 = vpack.c.bf16 %v4690_v30, %v4689_v29 }
 0x2a2   : > { %10266 = vmatprep.mubr.f32.mxu0 %v3508_v32  ;;  %v5081_v32 = vld [vmem:[#allocation4 + $0x100] sm:$0xff] }
 0x2a3   : > { %11425 = vmatprep.subr.bf16.mxu1 %v11424_v31 }
 0x2a4   : > { %11427 = vmatpush3.bf16.msra.mxu1 %v11424_v31 }
 0x2a5   : > { %10267 = vmatmul.mubr.f32.gmra.mrb[12].mxu0 %v3509_v33  ;;  %v5082_v33 = vld [vmem:[#allocation4 + $0x108] sm:$0xff] }
 0x2a6   : > { %10269 = vmatprep.mubr.f32.mxu0 %v3510_v34  ;;  %v13607_v34 = vpack.c.bf16 %v5082_v33, %v5081_v32 }
 0x2a8   : > { %11429 = vmatprep.subr.bf16.mxu1 %v13607_v34 }
 0x2a9   : > { %10270 = vmatmul.mubr.f32.gmra.mrb[14].mxu0 %v3511_v35  ;;  %v4066_v35 = vpop.permute.xlu1 %4065 }
 0x2aa   : > { %10272 = vmatprep.mubr.f32.mxu0 %v3512_v36  ;;  %v4056_v36 = vpop.permute.xlu0 %4055 }
 0x2ad   : > { %10273 = vmatmul.mubr.f32.gmra.mrb[16].mxu0 %v3513_v37  ;;  %v4071_v37 = vpop.permute.xlu1 %4070 }
 0x2ae   : > { %10275 = vmatprep.mubr.f32.mxu0 %v3514_v38  ;;  %v4061_v38 = vpop.permute.xlu0 %4060 }
 0x2b1   : > { %10276 = vmatmul.mubr.f32.gmra.mrb[18].mxu0 %v3515_v39  ;;  %v4081_v39 = vpop.permute.xlu1 %4080 }
 0x2b2   : > { %10278 = vmatprep.mubr.f32.mxu0 %v3516_v40  ;;  %v4076_v40 = vpop.permute.xlu0 %4075 }
 0x2b5   : > { %10279 = vmatmul.mubr.f32.gmra.mrb[20].mxu0 %v3517_v42  ;;  %v4091_v42 = vpop.permute.xlu1 %4090 }
 0x2b6   : > { %10281 = vmatprep.mubr.f32.mxu0 %v3518_v43  ;;  %v4086_v43 = vpop.permute.xlu0 %4085 }
 0x2b9   : > { %10282 = vmatmul.mubr.f32.gmra.mrb[22].mxu0 %v3519_v44  ;;  %v13610_v44 = vpop.permute.xlu1 %4100 }
 0x2ba   : > { %10284 = vmatprep.mubr.f32.mxu0 %v3520_v47  ;;  %v13612_v47 = vpop.permute.xlu0 %4095 }
 0x2bd   : > { %10285 = vmatmul.mubr.f32.gmra.mrb[24].mxu0 %v3521_v48  ;;  %v13617_v48 = vld [vmem:[%s14084_s3] ss:$0 sm:$0xff] }
 0x2be   : > { %10287 = vmatprep.mubr.f32.mxu0 %v3522_v49  ;;  %v13619_v49 = vpop.permute.xlu1 %4110 }
 0x2c1   : > { %10288 = vmatmul.mubr.f32.gmra.mrb[26].mxu0 %v3523_v52 }
 0x2c2   : > { %10290 = vmatprep.mubr.f32.mxu0 %v3524_v53  ;;  %v13621_v53 = vpop.permute.xlu0 %4105  ;;  %v13626_v58 = vpop.permute.xlu1 %4120 }
 0x2c5   : > { %10291 = vmatmul.mubr.f32.gmra.mrb[28].mxu0 %v3525_v54 }
 0x2c6   : > { %10293 = vmatprep.mubr.f32.mxu0 %v3526_v57  ;;  %v13629_v4 = vpop.permute.xlu0 %4115  ;;  %v13633_v50 = vpop.permute.xlu1 %4130 }
 0x2c9   : > { %10294 = vmatmul.mubr.f32.gmra.mrb[30].mxu0 %v3527_v62 }
 0x2ca   : > { %10296 = vmatprep.mubr.f32.mxu0 %v3528_v63  ;;  %v13635_v7 = vpop.permute.xlu0 %4125  ;;  %v13640_v24 = vpop.permute.xlu1 %4140 }
 0x2cd   : > { %10297 = vmatmul.mubr.f32.gmra.mrb[32].mxu0 %v3529_v41 }
 0x2ce   : > { %10299 = vmatprep.mubr.f32.mxu0 %v3530_v5  ;;  %v13643_v27 = vpop.permute.xlu0 %4135 }
 0x2d1   : > { %10300 = vmatmul.mubr.f32.gmra.mrb[34].mxu0 %v3531_v10 }
 0x360   : > { %v10250_v52 = vpop.f32.mrb[0].mxu0 }
 0x361   : > { %v3946_v54 = vadd.f32 %v10250_v52, %v13617_v48  ;;  %v3615_v57 = vpop.f32.mrb[1].mxu0 }
 0x362   : > { %v3945_v62 = vadd.f32 %v13617_v48, %v3615_v57  ;;  %v13651_v57 = vpop.permute.xlu0 %4145 }
 0x363   : > { %v3982_v63 = vmax.f32 %v3946_v54, 0.0 }
 0x364   : > { %v3981_v41 = vmax.f32 %v3945_v62, 0.0  ;;  %v10253_v5 = vpop.f32.mrb[2].mxu0 }
 0x365   : > { %v4234_v10 = vmul.f32 %v4061_v38, %v3982_v63  ;;  %v3948_v13 = vadd.f32 %v10253_v5, %v13617_v48  ;;  %v3625_v51 = vpop.f32.mrb[3].mxu0 }
 0x366   : > { %v4233_v56 = vmul.f32 %v4056_v36, %v3981_v41  ;;  %v3947_v3 = vadd.f32 %v13617_v48, %v3625_v51 }
 0x367   : > { %v3984_v8 = vmax.f32 %v3948_v13, 0.0  ;;  %4270 = vst [vmem:[#allocation3 + $0x1b] sm:$0xff] %v4234_v10 }
 0x368   : > { %v3983_v60 = vmax.f32 %v3947_v3, 0.0  ;;  %v10256_v61 = vpop.f32.mrb[4].mxu0  ;;  %4269 = vst [vmem:[#allocation3 + $0x13] sm:$0xff] %v4233_v56 }
 0x369   : > { %v4236_v45 = vmul.f32 %v4071_v37, %v3984_v8  ;;  %v3950_v46 = vadd.f32 %v10256_v61, %v13617_v48  ;;  %v3635_v9 = vpop.f32.mrb[5].mxu0 }
 0x36a   : > { %v4235_v1 = vmul.f32 %v4066_v35, %v3983_v60  ;;  %v3949_v2 = vadd.f32 %v13617_v48, %v3635_v9 }
 0x36b   : > { %v3986_v17 = vmax.f32 %v3950_v46, 0.0  ;;  %4272 = vst [vmem:[#allocation3 + $0x2b] sm:$0xff] %v4236_v45  ;;  %v4156_v45 = vpop.permute.xlu0 %4155 }
 0x36c   : > { %v3985_v59 = vmax.f32 %v3949_v2, 0.0  ;;  %v10259_v6 = vpop.f32.mrb[6].mxu0  ;;  %4271 = vst [vmem:[#allocation3 + $0x23] sm:$0xff] %v4235_v1 }
 0x36d   : > { %v4238_v0 = vmul.f32 %v4081_v39, %v3986_v17  ;;  %v3952_v55 = vadd.f32 %v10259_v6, %v13617_v48  ;;  %v3645_v11 = vpop.f32.mrb[7].mxu0 }
 0x36e   : > { %v4237_v12 = vmul.f32 %v4076_v40, %v3985_v59  ;;  %v3951_v14 = vadd.f32 %v13617_v48, %v3645_v11 }
 0x36f   : > { %v3988_v15 = vmax.f32 %v3952_v55, 0.0  ;;  %4274 = vst [vmem:[#allocation3 + $0x3b] sm:$0xff] %v4238_v0  ;;  %v4307_v16 = vld [vmem:[#allocation3 + $0x10] sm:$0xff]  ;;  %v4308_v18 = vld [vmem:[#allocation3 + $0x18] sm:$0xff] }
 0x370   : > { %v3987_v19 = vmax.f32 %v3951_v14, 0.0  ;;  %v10262_v20 = vpop.f32.mrb[8].mxu0  ;;  %4273 = vst [vmem:[#allocation3 + $0x33] sm:$0xff] %v4237_v12  ;;  %10337 = vmatprep.mubr.f32.mxu1 %v4307_v16 }
 0x371   : > { %v4240_v21 = vmul.f32 %v4091_v42, %v3988_v15  ;;  %v3954_v22 = vadd.f32 %v10262_v20, %v13617_v48  ;;  %v3655_v23 = vpop.f32.mrb[9].mxu0  ;;  %10338 = vmatmul.mubr.f32.gmra.mrb[2].mxu1 %v4308_v18  ;;  %v4166_v18 = vpop.permute.xlu0 %4165 }
 0x372   : > { %v4239_v25 = vmul.f32 %v4086_v43, %v3987_v19  ;;  %v3953_v26 = vadd.f32 %v13617_v48, %v3655_v23  ;;  %v13649_v43 = vpop.permute.xlu1 %4150 }
 0x373   : > { %v3990_v28 = vmax.f32 %v3954_v22, 0.0  ;;  %4276 = vst [vmem:[#allocation3 + $0x4b] sm:$0xff] %v4240_v21  ;;  %v4309_v29 = vld [vmem:[#allocation3 + $0x20] sm:$0xff]  ;;  %v4310_v30 = vld [vmem:[#allocation3 + $0x28] sm:$0xff] }
 0x374   : > { %v3989_v31 = vmax.f32 %v3953_v26, 0.0  ;;  %v10265_v32 = vpop.f32.mrb[10].mxu0  ;;  %4275 = vst [vmem:[#allocation3 + $0x43] sm:$0xff] %v4239_v25  ;;  %10340 = vmatprep.mubr.f32.mxu1 %v4309_v29 }
 0x375   : > { %v4242_v33 = vmul.f32 %v13610_v44, %v3990_v28  ;;  %v3956_v35 = vadd.f32 %v10265_v32, %v13617_v48  ;;  %v3665_v36 = vpop.f32.mrb[11].mxu0  ;;  %10341 = vmatmul.mubr.f32.gmra.mrb[4].mxu1 %v4310_v30 }
 0x376   : > { %v4241_v37 = vmul.f32 %v13612_v47, %v3989_v31  ;;  %v3955_v38 = vadd.f32 %v13617_v48, %v3665_v36  ;;  %v4161_v60 = vpop.permute.xlu1 %4160 }
 0x377   : > { %v3992_v39 = vmax.f32 %v3956_v35, 0.0  ;;  %4278 = vst [vmem:[#allocation3 + $0x5b] sm:$0xff] %v4242_v33  ;;  %v4311_v40 = vld [vmem:[#allocation3 + $0x30] sm:$0xff]  ;;  %v4312_v42 = vld [vmem:[#allocation3 + $0x38] sm:$0xff]  ;;  %v4176_v33 = vpop.permute.xlu0 %4175 }
 0x378   : > { %v3991_v52 = vmax.f32 %v3955_v38, 0.0  ;;  %4277 = vst [vmem:[#allocation3 + $0x53] sm:$0xff] %v4241_v37  ;;  %v10268_v54 = vpop.f32.mrb[12].mxu0  ;;  %10343 = vmatprep.mubr.f32.mxu1 %v4311_v40 }
 0x379   : > { %v4244_v44 = vmul.f32 %v13619_v49, %v3992_v39  ;;  %v3958_v62 = vadd.f32 %v10268_v54, %v13617_v48  ;;  %v3675_v63 = vpop.f32.mrb[13].mxu0  ;;  %10344 = vmatmul.mubr.f32.gmra.mrb[6].mxu1 %v4312_v42 }
 0x37a   : > { %v4243_v47 = vmul.f32 %v13621_v53, %v3991_v52  ;;  %v3957_v41 = vadd.f32 %v13617_v48, %v3675_v63  ;;  %v4171_v14 = vpop.permute.xlu1 %4170 }
 0x37b   : > { %4280 = vst [vmem:[#allocation3 + $0x6b] sm:$0xff] %v4244_v44  ;;  %v3994_v5 = vmax.f32 %v3958_v62, 0.0  ;;  %v4313_v10 = vld [vmem:[#allocation3 + $0x40] sm:$0xff]  ;;  %v4314_v13 = vld [vmem:[#allocation3 + $0x48] sm:$0xff] }
 0x37c   : > { %4279 = vst [vmem:[#allocation3 + $0x63] sm:$0xff] %v4243_v47  ;;  %v3993_v51 = vmax.f32 %v3957_v41, 0.0  ;;  %v10271_v56 = vpop.f32.mrb[14].mxu0  ;;  %10346 = vmatprep.mubr.f32.mxu1 %v4313_v10 }
 0x37d   : > { %v4246_v3 = vmul.f32 %v13626_v58, %v3994_v5  ;;  %v3960_v49 = vadd.f32 %v10271_v56, %v13617_v48  ;;  %v3685_v8 = vpop.f32.mrb[15].mxu0  ;;  %10347 = vmatmul.mubr.f32.gmra.mrb[8].mxu1 %v4314_v13  ;;  %v4186_v5 = vpop.permute.xlu0 %4185 }
 0x37e   : > { %v4245_v61 = vmul.f32 %v13629_v4, %v3993_v51  ;;  %v3959_v53 = vadd.f32 %v13617_v48, %v3685_v8  ;;  %v4181_v31 = vpop.permute.xlu1 %4180 }
 0x37f   : > { %4282 = vst [vmem:[#allocation3 + $0x7b] sm:$0xff] %v4246_v3  ;;  %v3996_v46 = vmax.f32 %v3960_v49, 0.0  ;;  %v4315_v9 = vld [vmem:[#allocation3 + $0x50] sm:$0xff]  ;;  %v4316_v1 = vld [vmem:[#allocation3 + $0x58] sm:$0xff] }
 0x380   : > { %4281 = vst [vmem:[#allocation3 + $0x73] sm:$0xff] %v4245_v61  ;;  %v3995_v2 = vmax.f32 %v3959_v53, 0.0  ;;  %v10274_v17 = vpop.f32.mrb[16].mxu0  ;;  %10349 = vmatprep.mubr.f32.mxu1 %v4315_v9 }
 0x381   : > { %v4248_v58 = vmul.f32 %v13633_v50, %v3996_v46  ;;  %v3962_v59 = vadd.f32 %v10274_v17, %v13617_v48  ;;  %v3695_v6 = vpop.f32.mrb[17].mxu0  ;;  %10350 = vmatmul.mubr.f32.gmra.mrb[10].mxu1 %v4316_v1 }
 0x382   : > { %v4247_v0 = vmul.f32 %v13635_v7, %v3995_v2  ;;  %v3961_v4 = vadd.f32 %v13617_v48, %v3695_v6  ;;  %v4191_v63 = vpop.permute.xlu1 %4190 }
 0x383   : > { %4284 = vst [vmem:[#allocation3 + $0x8b] sm:$0xff] %v4248_v58  ;;  %v3998_v55 = vmax.f32 %v3962_v59, 0.0  ;;  %v4317_v11 = vld [vmem:[#allocation3 + $0x60] sm:$0xff]  ;;  %v4318_v12 = vld [vmem:[#allocation3 + $0x68] sm:$0xff]  ;;  %v4196_v58 = vpop.permute.xlu0 %4195 }
 0x384   : > { %4283 = vst [vmem:[#allocation3 + $0x83] sm:$0xff] %v4247_v0  ;;  %v3997_v15 = vmax.f32 %v3961_v4, 0.0  ;;  %v10277_v16 = vpop.f32.mrb[18].mxu0  ;;  %10352 = vmatprep.mubr.f32.mxu1 %v4317_v11 }
 0x385   : > { %v4250_v50 = vmul.f32 %v13640_v24, %v3998_v55  ;;  %v3964_v19 = vadd.f32 %v10277_v16, %v13617_v48  ;;  %v3705_v20 = vpop.f32.mrb[19].mxu0  ;;  %10353 = vmatmul.mubr.f32.gmra.mrb[12].mxu1 %v4318_v12 }
 0x386   : > { %v4249_v7 = vmul.f32 %v13643_v27, %v3997_v15  ;;  %v3963_v21 = vadd.f32 %v13617_v48, %v3705_v20  ;;  %v4201_v1 = vpop.permute.xlu1 %4200 }
 0x387   : > { %4286 = vst [vmem:[#allocation3 + $0x9b] sm:$0xff] %v4250_v50  ;;  %v4000_v22 = vmax.f32 %v3964_v19, 0.0  ;;  %v4319_v23 = vld [vmem:[#allocation3 + $0x70] sm:$0xff]  ;;  %v4320_v25 = vld [vmem:[#allocation3 + $0x78] sm:$0xff] }
 0x388   : > { %4285 = vst [vmem:[#allocation3 + $0x93] sm:$0xff] %v4249_v7  ;;  %v3999_v26 = vmax.f32 %v3963_v21, 0.0  ;;  %v10280_v28 = vpop.f32.mrb[20].mxu0  ;;  %10355 = vmatprep.mubr.f32.mxu1 %v4319_v23 }
 0x389   : > { %v4252_v29 = vmul.f32 %v13649_v43, %v4000_v22  ;;  %v3966_v24 = vadd.f32 %v10280_v28, %v13617_v48  ;;  %v3715_v30 = vpop.f32.mrb[21].mxu0  ;;  %10356 = vmatmul.mubr.f32.gmra.mrb[14].mxu1 %v4320_v25  ;;  %v4206_v22 = vpop.permute.xlu0 %4205 }
 0x38a   : > { %v4251_v32 = vmul.f32 %v13651_v57, %v3999_v26  ;;  %v3965_v27 = vadd.f32 %v13617_v48, %v3715_v30  ;;  %v4211_v20 = vpop.permute.xlu1 %4210 }
 0x38b   : > { %4288 = vst [vmem:[#allocation3 + $0xab] sm:$0xff] %v4252_v29  ;;  %v4002_v35 = vmax.f32 %v3966_v24, 0.0  ;;  %v4321_v36 = vld [vmem:[#allocation3 + $0x80] sm:$0xff]  ;;  %v4322_v37 = vld [vmem:[#allocation3 + $0x88] sm:$0xff] }
 0x38c   : > { %4287 = vst [vmem:[#allocation3 + $0xa3] sm:$0xff] %v4251_v32  ;;  %v4001_v38 = vmax.f32 %v3965_v27, 0.0  ;;  %v10283_v39 = vpop.f32.mrb[22].mxu0  ;;  %10358 = vmatprep.mubr.f32.mxu1 %v4321_v36 }
 0x38d   : > { %v4254_v40 = vmul.f32 %v4161_v60, %v4002_v35  ;;  %v3968_v42 = vadd.f32 %v10283_v39, %v13617_v48  ;;  %v3725_v43 = vpop.f32.mrb[23].mxu0  ;;  %10359 = vmatmul.mubr.f32.gmra.mrb[16].mxu1 %v4322_v37 }
 0x38e   : > { %v4253_v52 = vmul.f32 %v4156_v45, %v4001_v38  ;;  %v3967_v54 = vadd.f32 %v13617_v48, %v3725_v43  ;;  %v4221_v37 = vpop.permute.xlu1 %4220 }
 0x38f   : > { %4290 = vst [vmem:[#allocation3 + $0xbb] sm:$0xff] %v4254_v40  ;;  %v4004_v57 = vmax.f32 %v3968_v42, 0.0  ;;  %v4323_v44 = vld [vmem:[#allocation3 + $0x90] sm:$0xff]  ;;  %v4324_v62 = vld [vmem:[#allocation3 + $0x98] sm:$0xff]  ;;  %v4216_v40 = vpop.permute.xlu0 %4215 }
 0x390   : > { %4289 = vst [vmem:[#allocation3 + $0xb3] sm:$0xff] %v4253_v52  ;;  %v4003_v47 = vmax.f32 %v3967_v54, 0.0  ;;  %v10286_v41 = vpop.f32.mrb[24].mxu0  ;;  %10361 = vmatprep.mubr.f32.mxu1 %v4323_v44 }
 0x391   : > { %v4256_v10 = vmul.f32 %v4171_v14, %v4004_v57  ;;  %v3970_v13 = vadd.f32 %v10286_v41, %v13617_v48  ;;  %v3735_v51 = vpop.f32.mrb[25].mxu0  ;;  %10362 = vmatmul.mubr.f32.gmra.mrb[18].mxu1 %v4324_v62 }
 0x392   : > { %v4255_v56 = vmul.f32 %v4166_v18, %v4003_v47  ;;  %v3969_v3 = vadd.f32 %v13617_v48, %v3735_v51  ;;  %v4231_v51 = vpop.permute.xlu1 %4230 }
 0x393   : > { %4292 = vst [vmem:[#allocation3 + $0xcb] sm:$0xff] %v4256_v10  ;;  %v4006_v49 = vmax.f32 %v3970_v13, 0.0  ;;  %v4325_v8 = vld [vmem:[#allocation3 + $0xa0] sm:$0xff]  ;;  %v4326_v60 = vld [vmem:[#allocation3 + $0xa8] sm:$0xff] }
 0x394   : > { %4291 = vst [vmem:[#allocation3 + $0xc3] sm:$0xff] %v4255_v56  ;;  %v4005_v61 = vmax.f32 %v3969_v3, 0.0  ;;  %v10289_v53 = vpop.f32.mrb[26].mxu0  ;;  %10364 = vmatprep.mubr.f32.mxu1 %v4325_v8  ;;  %v4226_v3 = vpop.permute.xlu0 %4225 }
 0x395   : > { %v4258_v45 = vmul.f32 %v4181_v31, %v4006_v49  ;;  %v3972_v46 = vadd.f32 %v10289_v53, %v13617_v48  ;;  %v3745_v9 = vpop.f32.mrb[27].mxu0  ;;  %10365 = vmatmul.mubr.f32.gmra.mrb[20].mxu1 %v4326_v60 }
 0x396   : > { %v4257_v2 = vmul.f32 %v4176_v33, %v4005_v61  ;;  %v3971_v17 = vadd.f32 %v13617_v48, %v3745_v9  ;;  %v5084_v9 = vld [vmem:[#allocation4 + $0x118] sm:$0xff] }
 0x397   : > { %4294 = vst [vmem:[#allocation3 + $0xdb] sm:$0xff] %v4258_v45  ;;  %v4008_v59 = vmax.f32 %v3972_v46, 0.0  ;;  %v4327_v6 = vld [vmem:[#allocation3 + $0xb0] sm:$0xff]  ;;  %v4328_v0 = vld [vmem:[#allocation3 + $0xb8] sm:$0xff]  ;;  %v4638_v45 = vld [vmem:[#allocation3 + $0x1] sm:$0xff] }
 0x398   : > { %4293 = vst [vmem:[#allocation3 + $0xd3] sm:$0xff] %v4257_v2  ;;  %v4007_v4 = vmax.f32 %v3971_v17, 0.0  ;;  %v10292_v55 = vpop.f32.mrb[28].mxu0  ;;  %10367 = vmatprep.mubr.f32.mxu1 %v4327_v6  ;;  %v5083_v46 = vld [vmem:[#allocation4 + $0x110] sm:$0xff]  ;;  %v5085_v17 = vld [vmem:[#allocation4 + $0x120] sm:$0xff] }
 0x399   : > { %v4260_v11 = vmul.f32 %v4191_v63, %v4008_v59  ;;  %v3974_v12 = vadd.f32 %v10292_v55, %v13617_v48  ;;  %v3755_v14 = vpop.f32.mrb[29].mxu0  ;;  %10368 = vmatmul.mubr.f32.gmra.mrb[22].mxu1 %v4328_v0  ;;  %v11432_v2 = vpack.c.bf16 %v5084_v9, %v5083_v46  ;;  %v4640_v59 = vld [vmem:[#allocation3 + $0x11] sm:$0xff]  ;;  %v4641_v0 = vld [vmem:[#allocation3 + $0x19] sm:$0xff] }
 0x39a   : > { %v4259_v15 = vmul.f32 %v4186_v5, %v4007_v4  ;;  %v3973_v16 = vadd.f32 %v13617_v48, %v3755_v14  ;;  %v5087_v4 = vld [vmem:[#allocation4 + $0x130] sm:$0xff]  ;;  %v5088_v55 = vld [vmem:[#allocation4 + $0x138] sm:$0xff]  ;;  %v4643_v14 = vld [vmem:[#allocation3 + $0x29] sm:$0xff] }
 0x39b   : > { %4296 = vst [vmem:[#allocation3 + $0xeb] sm:$0xff] %v4260_v11  ;;  %v4010_v18 = vmax.f32 %v3974_v12, 0.0  ;;  %v4329_v50 = vld [vmem:[#allocation3 + $0xc0] sm:$0xff]  ;;  %v4330_v19 = vld [vmem:[#allocation3 + $0xc8] sm:$0xff]  ;;  %v11440_v12 = vpack.c.bf16 %v5088_v55, %v5087_v4  ;;  %v5489_v9 = vld [vmem:[#allocation4 + $0x190] sm:$0xff] }
 0x39c   : > { %4295 = vst [vmem:[#allocation3 + $0xe3] sm:$0xff] %v4259_v15  ;;  %v4009_v7 = vmax.f32 %v3973_v16, 0.0  ;;  %v10295_v21 = vpop.f32.mrb[30].mxu0  ;;  %10370 = vmatprep.mubr.f32.mxu1 %v4329_v50  ;;  %v4642_v11 = vld [vmem:[#allocation3 + $0x21] sm:$0xff]  ;;  %v5090_v16 = vld [vmem:[#allocation4 + $0x148] sm:$0xff]  ;;  %v4645_v50 = vld [vmem:[#allocation3 + $0x39] sm:$0xff] }
 0x39d   : > { %v4262_v23 = vmul.f32 %v4201_v1, %v4010_v18  ;;  %v3976_v25 = vadd.f32 %v10295_v21, %v13617_v48  ;;  %v3765_v26 = vpop.f32.mrb[31].mxu0  ;;  %10371 = vmatmul.mubr.f32.gmra.mrb[24].mxu1 %v4330_v19  ;;  %v4639_v1 = vld [vmem:[#allocation3 + $0x9] sm:$0xff]  ;;  %v4644_v18 = vld [vmem:[#allocation3 + $0x31] sm:$0xff]  ;;  %v13706_v4 = vld [vmem:[#allocation3 + $0x1a] sm:$0xff] }
 0x39e   : > { %v4261_v28 = vmul.f32 %v4196_v58, %v4009_v7  ;;  %v3975_v29 = vadd.f32 %v13617_v48, %v3765_v26  ;;  %v5086_v58 = vld [vmem:[#allocation4 + $0x128] sm:$0xff]  ;;  %v5089_v15 = vld [vmem:[#allocation4 + $0x140] sm:$0xff]  ;;  %v5091_v19 = vld [vmem:[#allocation4 + $0x150] sm:$0xff] }
 0x39f   : > { %4298 = vst [vmem:[#allocation3 + $0xfb] sm:$0xff] %v4262_v23  ;;  %v4012_v24 = vmax.f32 %v3976_v25, 0.0  ;;  %v4331_v30 = vld [vmem:[#allocation3 + $0xd0] sm:$0xff]  ;;  %v4332_v31 = vld [vmem:[#allocation3 + $0xd8] sm:$0xff]  ;;  %v11436_v6 = vpack.c.bf16 %v5086_v58, %v5085_v17  ;;  %v4646_v7 = vld [vmem:[#allocation3 + $0x41] sm:$0xff] }
 0x3a0   : > { %4297 = vst [vmem:[#allocation3 + $0xf3] sm:$0xff] %v4261_v28  ;;  %v4011_v32 = vmax.f32 %v3975_v29, 0.0  ;;  %v10298_v27 = vpop.f32.mrb[32].mxu0  ;;  %10373 = vmatprep.mubr.f32.mxu1 %v4331_v30  ;;  %v5093_v23 = vld [vmem:[#allocation4 + $0x160] sm:$0xff]  ;;  %v5094_v25 = vld [vmem:[#allocation4 + $0x168] sm:$0xff]  ;;  %v4649_v29 = vld [vmem:[#allocation3 + $0x59] sm:$0xff] }
 0x3a1   : > { %v4264_v33 = vmul.f32 %v4211_v20, %v4012_v24  ;;  %v3978_v35 = vadd.f32 %v10298_v27, %v13617_v48  ;;  %v3775_v36 = vpop.f32.mrb[33].mxu0  ;;  %10374 = vmatmul.mubr.f32.gmra.mrb[26].mxu1 %v4332_v31  ;;  %v5092_v20 = vld [vmem:[#allocation4 + $0x158] sm:$0xff]  ;;  %v4648_v26 = vld [vmem:[#allocation3 + $0x51] sm:$0xff]  ;;  %v11452_v28 = vpack.c.bf16 %v5094_v25, %v5093_v23  ;;  %v4651_v27 = vld [vmem:[#allocation3 + $0x69] sm:$0xff] }
 0x3a2   : > { %v13684_v38 = vmul.f32 %v4206_v22, %v4011_v32  ;;  %v3977_v39 = vadd.f32 %v13617_v48, %v3775_v36  ;;  %v11448_v21 = vpack.c.bf16 %v5092_v20, %v5091_v19  ;;  %v4647_v22 = vld [vmem:[#allocation3 + $0x49] sm:$0xff]  ;;  %v5095_v24 = vld [vmem:[#allocation4 + $0x170] sm:$0xff]  ;;  %v5096_v30 = vld [vmem:[#allocation4 + $0x178] sm:$0xff] }
 0x3a3   : > { %4300 = vst [vmem:[#allocation3 + $0x10b] sm:$0xff] %v4264_v33  ;;  %v4014_v42 = vmax.f32 %v3978_v35, 0.0  ;;  %v4333_v43 = vld [vmem:[#allocation3 + $0xe0] sm:$0xff]  ;;  %v4334_v52 = vld [vmem:[#allocation3 + $0xe8] sm:$0xff]  ;;  %v11456_v32 = vpack.c.bf16 %v5096_v30, %v5095_v24  ;;  %v5488_v35 = vld [vmem:[#allocation4 + $0x188] sm:$0xff] }
 0x3a4   : > { %4299 = vst [vmem:[#allocation3 + $0x103] sm:$0xff] %v13684_v38  ;;  %v4013_v54 = vmax.f32 %v3977_v39, 0.0  ;;  %v10301_v57 = vpop.f32.mrb[34].mxu0  ;;  %10376 = vmatprep.mubr.f32.mxu1 %v4333_v43  ;;  %v4650_v31 = vld [vmem:[#allocation3 + $0x61] sm:$0xff]  ;;  %v4652_v36 = vld [vmem:[#allocation3 + $0x71] sm:$0xff]  ;;  %v4653_v39 = vld [vmem:[#allocation3 + $0x79] sm:$0xff] }
 0x3a5   : > { %v13688_v44 = vmul.f32 %v4221_v37, %v4014_v42  ;;  %v3980_v62 = vadd.f32 %v10301_v57, %v13617_v48  ;;  %v3785_v63 = vpop.f32.mrb[35].mxu0  ;;  %10377 = vmatmul.mubr.f32.gmra.mrb[28].mxu1 %v4334_v52  ;;  %v5487_v33 = vld [vmem:[#allocation4 + $0x180] sm:$0xff]  ;;  %v4656_v43 = vld [vmem:[#allocation3 + $0x91] sm:$0xff]  ;;  %v4657_v52 = vld [vmem:[#allocation3 + $0x99] sm:$0xff] }
 0x3a6   : > { %v13691_v47 = vmul.f32 %v4216_v40, %v4013_v54  ;;  %v3979_v41 = vadd.f32 %v13617_v48, %v3785_v63  ;;  %v11460_v37 = vpack.c.bf16 %v5488_v35, %v5487_v33  ;;  %v4654_v40 = vld [vmem:[#allocation3 + $0x81] sm:$0xff]  ;;  %v4655_v42 = vld [vmem:[#allocation3 + $0x89] sm:$0xff]  ;;  %v4661_v63 = vld [vmem:[#allocation3 + $0xb9] sm:$0xff] }
 0x3a7   : > { %4302 = vst [vmem:[#allocation3 + $0x11b] sm:$0xff] %v13688_v44  ;;  %v4016_v5 = vmax.f32 %v3980_v62, 0.0  ;;  %v4335_v10 = vld [vmem:[#allocation3 + $0xf0] sm:$0xff]  ;;  %v4336_v13 = vld [vmem:[#allocation3 + $0xf8] sm:$0xff]  ;;  %v4658_v54 = vld [vmem:[#allocation3 + $0xa1] sm:$0xff] }
 0x3a8   : > { %4301 = vst [vmem:[#allocation3 + $0x113] sm:$0xff] %v13691_v47  ;;  %v4015_v56 = vmax.f32 %v3979_v41, 0.0  ;;  %10379 = vmatprep.mubr.f32.mxu1 %v4335_v10  ;;  %v4659_v57 = vld [vmem:[#allocation3 + $0xa9] sm:$0xff]  ;;  %v4660_v62 = vld [vmem:[#allocation3 + $0xb1] sm:$0xff]  ;;  %v4662_v41 = vld [vmem:[#allocation3 + $0xc1] sm:$0xff] }
 0x3a9   : > { %v13696_v49 = vmul.f32 %v4231_v51, %v4016_v5  ;;  %10380 = vmatmul.mubr.f32.gmra.mrb[30].mxu1 %v4336_v13  ;;  %v4663_v5 = vld [vmem:[#allocation3 + $0xc9] sm:$0xff]  ;;  %v4664_v10 = vld [vmem:[#allocation3 + $0xd1] sm:$0xff]  ;;  %v4665_v13 = vld [vmem:[#allocation3 + $0xd9] sm:$0xff] }
 0x3aa   : > { %v13698_v8 = vmul.f32 %v4226_v3, %v4015_v56  ;;  %v4666_v51 = vld [vmem:[#allocation3 + $0xe1] sm:$0xff]  ;;  %v4667_v56 = vld [vmem:[#allocation3 + $0xe9] sm:$0xff]  ;;  %v4668_v3 = vld [vmem:[#allocation3 + $0xf1] sm:$0xff] }
 0x3ab   : > { %4304 = vst [vmem:[#allocation3 + $0x12b] sm:$0xff] %v13696_v49  ;;  %v4337_v60 = vld [vmem:[#allocation3 + $0x100] sm:$0xff]  ;;  %v4338_v48 = vld [vmem:[#allocation3 + $0x108] sm:$0xff]  ;;  %v5493_v55 = vld [vmem:[#allocation4 + $0x1b0] sm:$0xff] }
 0x3ac   : > { %4303 = vst [vmem:[#allocation3 + $0x123] sm:$0xff] %v13698_v8  ;;  %10382 = vmatprep.mubr.f32.mxu1 %v4337_v60  ;;  %v4669_v60 = vld [vmem:[#allocation3 + $0xf9] sm:$0xff]  ;;  %v5491_v58 = vld [vmem:[#allocation4 + $0x1a0] sm:$0xff] }
 0x3ad   : > { %10383 = vmatmul.mubr.f32.gmra.mrb[32].mxu1 %v4338_v48  ;;  %v4670_v48 = vld [vmem:[#allocation3 + $0x101] sm:$0xff]  ;;  %v5497_v20 = vld [vmem:[#allocation4 + $0x1d0] sm:$0xff]  ;;  %v13724_v23 = vld [vmem:[#allocation3 + $0x4a] sm:$0xff] }
 0x3ae   : > { %v13718_v19 = vld [vmem:[#allocation3 + $0x3a] sm:$0xff]  ;;  %v5499_v25 = vld [vmem:[#allocation4 + $0x1e0] sm:$0xff] }
 0x3af   : > { %v4339_v61 = vld [vmem:[#allocation3 + $0x110] sm:$0xff]  ;;  %v4340_v53 = vld [vmem:[#allocation3 + $0x118] sm:$0xff]  ;;  %v5893_v35 = vld [vmem:[#allocation4 + $0x200] sm:$0xff] }
 0x3b0   : > { %10385 = vmatprep.mubr.f32.mxu1 %v4339_v61  ;;  %v4671_v61 = vld [vmem:[#allocation3 + $0x109] sm:$0xff]  ;;  %v4673_v46 = vld [vmem:[#allocation3 + $0x119] sm:$0xff] }
 0x3b1   : > { %10386 = vmatmul.mubr.f32.gmra.mrb[34].mxu1 %v4340_v53  ;;  %v4672_v53 = vld [vmem:[#allocation3 + $0x111] sm:$0xff]  ;;  %v13730_v24 = vld [vmem:[#allocation3 + $0x5a] sm:$0xff] }
 0x3b2   : > { %10420 = vmatprep.mubr.f32.mxu1 %v4638_v45  ;;  %v5044_v45 = vld [vmem:[#allocation3 + $0x2] sm:$0xff]  ;;  %v5501_v30 = vld [vmem:[#allocation4 + $0x1f0] sm:$0xff]  ;;  %v13736_v33 = vld [vmem:[#allocation3 + $0x6a] sm:$0xff] }
 0x3b5   : > { %10421 = vmatmul.mubr.f32.vlgmr.msra.gmra.mrb[0].mxu1 %v4639_v1  ;;  %v5490_v1 = vld [vmem:[#allocation4 + $0x198] sm:$0xff] }
 0x3b6   : > { %10423 = vmatprep.mubr.f32.mxu1 %v4640_v59  ;;  %11431 = vmatpush3.bf16.msra.mxu1 %v13607_v34  ;;  %v11444_v34 = vpack.c.bf16 %v5090_v16, %v5089_v15  ;;  %v11464_v17 = vpack.c.bf16 %v5490_v1, %v5489_v9  ;;  %v5492_v59 = vld [vmem:[#allocation4 + $0x1a8] sm:$0xff]  ;;  %v5495_v16 = vld [vmem:[#allocation4 + $0x1c0] sm:$0xff]  ;;  %v5895_v9 = vld [vmem:[#allocation4 + $0x210] sm:$0xff] }
 0x3b7   : > { %11433 = vmatprep.subr.bf16.mxu1 %v11432_v2  ;;  %v13712_v15 = vld [vmem:[#allocation3 + $0x2a] sm:$0xff]  ;;  %v5896_v1 = vld [vmem:[#allocation4 + $0x218] sm:$0xff] }
 0x3b9   : > { %10424 = vmatmul.mubr.f32.gmra.mrb[2].mxu1 %v4641_v0  ;;  %v11468_v0 = vpack.c.bf16 %v5492_v59, %v5491_v58  ;;  %v5898_v58 = vld [vmem:[#allocation4 + $0x228] sm:$0xff] }
 0x3ba   : > { %10426 = vmatprep.mubr.f32.mxu1 %v4642_v11  ;;  %11435 = vmatpush3.bf16.msra.mxu1 %v11432_v2  ;;  %v5045_v2 = vld [vmem:[#allocation3 + $0xa] sm:$0xff]  ;;  %v5494_v11 = vld [vmem:[#allocation4 + $0x1b8] sm:$0xff] }
 0x3bb   : > { %11437 = vmatprep.subr.bf16.mxu1 %v11436_v6 }
 0x3bd   : > { %10427 = vmatmul.mubr.f32.gmra.mrb[4].mxu1 %v4643_v14  ;;  %v11472_v14 = vpack.c.bf16 %v5494_v11, %v5493_v55  ;;  %v5900_v55 = vld [vmem:[#allocation4 + $0x238] sm:$0xff] }
 0x3be   : > { %10429 = vmatprep.mubr.f32.mxu1 %v4644_v18  ;;  %11439 = vmatpush3.bf16.msra.mxu1 %v11436_v6  ;;  %v13703_v6 = vld [vmem:[#allocation3 + $0x12] sm:$0xff] }
 0x3bf   : > { %11441 = vmatprep.subr.bf16.mxu1 %v11440_v12  ;;  %v5496_v18 = vld [vmem:[#allocation4 + $0x1c8] sm:$0xff] }
 0x3c1   : > { %10430 = vmatmul.mubr.f32.gmra.mrb[6].mxu1 %v4645_v50  ;;  %v11476_v50 = vpack.c.bf16 %v5496_v18, %v5495_v16  ;;  %v5904_v16 = vld [vmem:[#allocation4 + $0x258] sm:$0xff]  ;;  %v5905_v18 = vld [vmem:[#allocation4 + $0x260] sm:$0xff] }
 0x3c2   : > { %10432 = vmatprep.mubr.f32.mxu1 %v4646_v7  ;;  %11443 = vmatpush3.bf16.msra.mxu1 %v11440_v12  ;;  %v13709_v12 = vld [vmem:[#allocation3 + $0x22] sm:$0xff] }
 0x3c3   : > { %11445 = vmatprep.subr.bf16.mxu1 %v11444_v34  ;;  %v5498_v7 = vld [vmem:[#allocation4 + $0x1d8] sm:$0xff] }
 0x3c5   : > { %10433 = vmatmul.mubr.f32.gmra.mrb[8].mxu1 %v4647_v22  ;;  %v11480_v22 = vpack.c.bf16 %v5498_v7, %v5497_v20  ;;  %v5908_v20 = vld [vmem:[#allocation4 + $0x278] sm:$0xff] }
 0x3c6   : > { %10435 = vmatprep.mubr.f32.mxu1 %v4648_v26  ;;  %11447 = vmatpush3.bf16.msra.mxu1 %v11444_v34  ;;  %v13715_v34 = vld [vmem:[#allocation3 + $0x32] sm:$0xff] }
 0x3c7   : > { %11449 = vmatprep.subr.bf16.mxu1 %v11448_v21  ;;  %v5500_v26 = vld [vmem:[#allocation4 + $0x1e8] sm:$0xff] }
 0x3c9   : > { %10436 = vmatmul.mubr.f32.gmra.mrb[10].mxu1 %v4649_v29  ;;  %v11484_v29 = vpack.c.bf16 %v5500_v26, %v5499_v25  ;;  %v5484_v25 = vld [vmem:[#allocation3 + $0x122] sm:$0xff]  ;;  %v5485_v26 = vld [vmem:[#allocation3 + $0x12a] sm:$0xff] }
 0x3ca   : > { %10438 = vmatprep.mubr.f32.mxu1 %v4650_v31  ;;  %11451 = vmatpush3.bf16.msra.mxu1 %v11448_v21  ;;  %v13721_v21 = vld [vmem:[#allocation3 + $0x42] sm:$0xff] }
 0x3cb   : > { %11453 = vmatprep.subr.bf16.mxu1 %v11452_v28  ;;  %v5502_v31 = vld [vmem:[#allocation4 + $0x1f8] sm:$0xff] }
 0x3cd   : > { %10439 = vmatmul.mubr.f32.gmra.mrb[12].mxu1 %v4651_v27  ;;  %v11488_v27 = vpack.c.bf16 %v5502_v31, %v5501_v30  ;;  %v5857_v31 = vld [vmem:[#allocation3 + $0x1b] sm:$0xff] }
 0x3ce   : > { %10441 = vmatprep.mubr.f32.mxu1 %v4652_v36  ;;  %11455 = vmatpush3.bf16.msra.mxu1 %v11452_v28  ;;  %v13727_v28 = vld [vmem:[#allocation3 + $0x52] sm:$0xff] }
 0x3cf   : > { %11457 = vmatprep.subr.bf16.mxu1 %v11456_v32  ;;  %v5894_v36 = vld [vmem:[#allocation4 + $0x208] sm:$0xff] }
 0x3d1   : > { %10442 = vmatmul.mubr.f32.gmra.mrb[14].mxu1 %v4653_v39  ;;  %v11492_v39 = vpack.c.bf16 %v5894_v36, %v5893_v35  ;;  %v5859_v36 = vld [vmem:[#allocation3 + $0x2b] sm:$0xff] }
 0x3d2   : > { %10444 = vmatprep.mubr.f32.mxu1 %v4654_v40  ;;  %11459 = vmatpush3.bf16.msra.mxu1 %v11456_v32  ;;  %v13733_v32 = vld [vmem:[#allocation3 + $0x62] sm:$0xff]  ;;  %v13742_v40 = vld [vmem:[#allocation3 + $0x7a] sm:$0xff] }
 0x3d3   : > { %11461 = vmatprep.subr.bf16.mxu1 %v11460_v37 }
 0x3d5   : > { %10445 = vmatmul.mubr.f32.gmra.mrb[16].mxu1 %v4655_v42  ;;  %v13745_v42 = vld [vmem:[#allocation3 + $0x82] sm:$0xff] }
 0x3d6   : > { %10447 = vmatprep.mubr.f32.mxu1 %v4656_v43  ;;  %v13748_v43 = vld [vmem:[#allocation3 + $0x8a] sm:$0xff] }
 0x3d9   : > { %10448 = vmatmul.mubr.f32.gmra.mrb[18].mxu1 %v4657_v52  ;;  %v13751_v52 = vld [vmem:[#allocation3 + $0x92] sm:$0xff] }
 0x3da   : > { %10450 = vmatprep.mubr.f32.mxu1 %v4658_v54  ;;  %v13754_v54 = vld [vmem:[#allocation3 + $0x9a] sm:$0xff] }
 0x3dd   : > { %10451 = vmatmul.mubr.f32.gmra.mrb[20].mxu1 %v4659_v57  ;;  %v13757_v57 = vld [vmem:[#allocation3 + $0xa2] sm:$0xff] }
 0x3de   : > { %10453 = vmatprep.mubr.f32.mxu1 %v4660_v62  ;;  %v13760_v62 = vld [vmem:[#allocation3 + $0xaa] sm:$0xff] }
 0x3e1   : > { %10454 = vmatmul.mubr.f32.gmra.mrb[22].mxu1 %v4661_v63  ;;  %v13763_v63 = vld [vmem:[#allocation3 + $0xb2] sm:$0xff] }
 0x3e2   : > { %10456 = vmatprep.mubr.f32.mxu1 %v4662_v41  ;;  %v13766_v41 = vld [vmem:[#allocation3 + $0xba] sm:$0xff] }
 0x3e5   : > { %10457 = vmatmul.mubr.f32.gmra.mrb[24].mxu1 %v4663_v5  ;;  %v13769_v5 = vld [vmem:[#allocation3 + $0xc2] sm:$0xff] }
 0x3e6   : > { %10459 = vmatprep.mubr.f32.mxu1 %v4664_v10  ;;  %v13772_v10 = vld [vmem:[#allocation3 + $0xca] sm:$0xff] }
 0x3e9   : > { %10460 = vmatmul.mubr.f32.gmra.mrb[26].mxu1 %v4665_v13  ;;  %v13775_v13 = vld [vmem:[#allocation3 + $0xd2] sm:$0xff] }
 0x3ea   : > { %10462 = vmatprep.mubr.f32.mxu1 %v4666_v51  ;;  %v13778_v51 = vld [vmem:[#allocation3 + $0xda] sm:$0xff] }
 0x3ed   : > { %10463 = vmatmul.mubr.f32.gmra.mrb[28].mxu1 %v4667_v56  ;;  %v13781_v56 = vld [vmem:[#allocation3 + $0xe2] sm:$0xff] }
 0x3ee   : > { %10465 = vmatprep.mubr.f32.mxu1 %v4668_v3  ;;  %v13784_v3 = vld [vmem:[#allocation3 + $0xea] sm:$0xff] }
 0x3f1   : > { %10466 = vmatmul.mubr.f32.gmra.mrb[30].mxu1 %v4669_v60  ;;  %v13787_v60 = vld [vmem:[#allocation3 + $0xf2] sm:$0xff] }
 0x3f2   : > { %10468 = vmatprep.mubr.f32.mxu1 %v4670_v48  ;;  %v13790_v48 = vld [vmem:[#allocation3 + $0xfa] sm:$0xff] }
 0x3f5   : > { %10469 = vmatmul.mubr.f32.gmra.mrb[32].mxu1 %v4671_v61  ;;  %v13793_v61 = vld [vmem:[#allocation3 + $0x102] sm:$0xff] }
 0x3f6   : > { %10471 = vmatprep.mubr.f32.mxu1 %v4672_v53  ;;  %v13796_v53 = vld [vmem:[#allocation3 + $0x10a] sm:$0xff] }
 0x3f9   : > { %10472 = vmatmul.mubr.f32.gmra.mrb[34].mxu1 %v4673_v46  ;;  %v13802_v46 = vld [vmem:[#allocation3 + $0x11a] sm:$0xff] }
 0x3fa   : > { %10506 = vmatprep.mubr.f32.mxu1 %v5044_v45  ;;  %v13799_v45 = vld [vmem:[#allocation3 + $0x112] sm:$0xff] }
 0x3fd   : > { %10507 = vmatmul.mubr.f32.vlgmr.msra.gmra.mrb[0].mxu1 %v5045_v2  ;;  %v11496_v2 = vpack.c.bf16 %v5896_v1, %v5895_v9  ;;  %v5869_v1 = vld [vmem:[#allocation3 + $0x7b] sm:$0xff] }
 0x3fe   : > { %10509 = vmatprep.mubr.f32.mxu1 %v13703_v6  ;;  %11463 = vmatpush3.bf16.msra.mxu1 %v11460_v37  ;;  %v13739_v37 = vld [vmem:[#allocation3 + $0x72] sm:$0xff] }
 0x3ff   : > { %11465 = vmatprep.subr.bf16.mxu1 %v11464_v17 }
 0x401   : > { %10510 = vmatmul.mubr.f32.gmra.mrb[2].mxu1 %v13706_v4 }
 0x402   : > { %10512 = vmatprep.mubr.f32.mxu1 %v13709_v12  ;;  %11467 = vmatpush3.bf16.msra.mxu1 %v11464_v17  ;;  %v5897_v17 = vld [vmem:[#allocation4 + $0x220] sm:$0xff] }
 0x403   : > { %11469 = vmatprep.subr.bf16.mxu1 %v11468_v0  ;;  %v11500_v59 = vpack.c.bf16 %v5898_v58, %v5897_v17  ;;  %v6706_v17 = vld [vmem:[#allocation4 + $0x308] sm:$0xff]  ;;  %v5870_v58 = vld [vmem:[#allocation3 + $0x83] sm:$0xff] }
 0x405   : > { %10513 = vmatmul.mubr.f32.gmra.mrb[4].mxu1 %v13712_v15 }
 0x406   : > { %10515 = vmatprep.mubr.f32.mxu1 %v13715_v34  ;;  %11471 = vmatpush3.bf16.msra.mxu1 %v11468_v0  ;;  %v5899_v0 = vld [vmem:[#allocation4 + $0x230] sm:$0xff] }
 0x407   : > { %11473 = vmatprep.subr.bf16.mxu1 %v11472_v14  ;;  %v11504_v11 = vpack.c.bf16 %v5900_v55, %v5899_v0  ;;  %v5871_v0 = vld [vmem:[#allocation3 + $0x8b] sm:$0xff]  ;;  %v5872_v55 = vld [vmem:[#allocation3 + $0x93] sm:$0xff] }
 0x409   : > { %10516 = vmatmul.mubr.f32.gmra.mrb[6].mxu1 %v13718_v19 }
 0x40a   : > { %10518 = vmatprep.mubr.f32.mxu1 %v13721_v21  ;;  %11475 = vmatpush3.bf16.msra.mxu1 %v11472_v14  ;;  %v5902_v14 = vld [vmem:[#allocation4 + $0x248] sm:$0xff] }
 0x40b   : > { %11477 = vmatprep.subr.bf16.mxu1 %v11476_v50 }
 0x40d   : > { %10519 = vmatmul.mubr.f32.gmra.mrb[8].mxu1 %v13724_v23 }
 0x40e   : > { %10521 = vmatprep.mubr.f32.mxu1 %v13727_v28  ;;  %11479 = vmatpush3.bf16.msra.mxu1 %v11476_v50 }
 0x40f   : > { %11481 = vmatprep.subr.bf16.mxu1 %v11480_v22 }
 0x411   : > { %10522 = vmatmul.mubr.f32.gmra.mrb[10].mxu1 %v13730_v24 }
 0x412   : > { %10524 = vmatprep.mubr.f32.mxu1 %v13733_v32  ;;  %11483 = vmatpush3.bf16.msra.mxu1 %v11480_v22  ;;  %v6300_v22 = vld [vmem:[#allocation4 + $0x288] sm:$0xff] }
 0x413   : > { %11485 = vmatprep.subr.bf16.mxu1 %v11484_v29 }
 0x415   : > { %10525 = vmatmul.mubr.f32.gmra.mrb[12].mxu1 %v13736_v33 }
 0x416   : > { %10527 = vmatprep.mubr.f32.mxu1 %v13739_v37  ;;  %11487 = vmatpush3.bf16.msra.mxu1 %v11484_v29  ;;  %v6302_v29 = vld [vmem:[#allocation4 + $0x298] sm:$0xff] }
 0x417   : > { %11489 = vmatprep.subr.bf16.mxu1 %v11488_v27 }
 0x419   : > { %10528 = vmatmul.mubr.f32.gmra.mrb[14].mxu1 %v13742_v40 }
 0x41a   : > { %10530 = vmatprep.mubr.f32.mxu1 %v13745_v42  ;;  %11491 = vmatpush3.bf16.msra.mxu1 %v11488_v27  ;;  %v6304_v27 = vld [vmem:[#allocation4 + $0x2a8] sm:$0xff] }
 0x41b   : > { %11493 = vmatprep.subr.bf16.mxu1 %v11492_v39 }
 0x41d   : > { %10531 = vmatmul.mubr.f32.gmra.mrb[16].mxu1 %v13748_v43 }
 0x41e   : > { %10533 = vmatprep.mubr.f32.mxu1 %v13751_v52 }
 0x421   : > { %10534 = vmatmul.mubr.f32.gmra.mrb[18].mxu1 %v13754_v54 }
 0x422   : > { %10536 = vmatprep.mubr.f32.mxu1 %v13757_v57 }
 0x425   : > { %10537 = vmatmul.mubr.f32.gmra.mrb[20].mxu1 %v13760_v62 }
 0x426   : > { %10539 = vmatprep.mubr.f32.mxu1 %v13763_v63 }
 0x429   : > { %10540 = vmatmul.mubr.f32.gmra.mrb[22].mxu1 %v13766_v41 }
 0x42a   : > { %10542 = vmatprep.mubr.f32.mxu1 %v13769_v5 }
 0x42d   : > { %10543 = vmatmul.mubr.f32.gmra.mrb[24].mxu1 %v13772_v10 }
 0x42e   : > { %10545 = vmatprep.mubr.f32.mxu1 %v13775_v13 }
 0x431   : > { %10546 = vmatmul.mubr.f32.gmra.mrb[26].mxu1 %v13778_v51 }
 0x432   : > { %10548 = vmatprep.mubr.f32.mxu1 %v13781_v56 }
 0x435   : > { %10549 = vmatmul.mubr.f32.gmra.mrb[28].mxu1 %v13784_v3 }
 0x436   : > { %10551 = vmatprep.mubr.f32.mxu1 %v13787_v60 }
 0x439   : > { %10552 = vmatmul.mubr.f32.gmra.mrb[30].mxu1 %v13790_v48 }
 0x43a   : > { %10554 = vmatprep.mubr.f32.mxu1 %v13793_v61 }
 0x43d   : > { %10555 = vmatmul.mubr.f32.gmra.mrb[32].mxu1 %v13796_v53 }
 0x43e   : > { %10557 = vmatprep.mubr.f32.mxu1 %v13799_v45 }
 0x441   : > { %10558 = vmatmul.mubr.f32.gmra.mrb[34].mxu1 %v13802_v46 }
 0x442   : > { %10592 = vmatprep.mubr.f32.mxu1 %v13703_v6  ;;  %v5901_v6 = vld [vmem:[#allocation4 + $0x240] sm:$0xff] }
 0x445   : > { %10593 = vmatmul.mubr.f32.vlgmr.msra.gmra.mrb[0].mxu1 %v13706_v4  ;;  %v11508_v4 = vpack.c.bf16 %v5902_v14, %v5901_v6  ;;  %v5874_v6 = vld [vmem:[#allocation3 + $0xa3] sm:$0xff]  ;;  %v5875_v14 = vld [vmem:[#allocation3 + $0xab] sm:$0xff] }
 0x446   : > { %10595 = vmatprep.mubr.f32.mxu1 %v13709_v12  ;;  %11495 = vmatpush3.bf16.msra.mxu1 %v11492_v39  ;;  %v5903_v12 = vld [vmem:[#allocation4 + $0x250] sm:$0xff]  ;;  %v6306_v39 = vld [vmem:[#allocation4 + $0x2b8] sm:$0xff] }
 0x447   : > { %11497 = vmatprep.subr.bf16.mxu1 %v11496_v2 }
 0x449   : > { %10596 = vmatmul.mubr.f32.gmra.mrb[2].mxu1 %v13712_v15  ;;  %v11512_v15 = vpack.c.bf16 %v5904_v16, %v5903_v12  ;;  %v5877_v12 = vld [vmem:[#allocation3 + $0xbb] sm:$0xff]  ;;  %v5878_v16 = vld [vmem:[#allocation3 + $0xc3] sm:$0xff] }
 0x44a   : > { %10598 = vmatprep.mubr.f32.mxu1 %v13715_v34  ;;  %11499 = vmatpush3.bf16.msra.mxu1 %v11496_v2  ;;  %v5906_v34 = vld [vmem:[#allocation4 + $0x268] sm:$0xff]  ;;  %v6705_v2 = vld [vmem:[#allocation4 + $0x300] sm:$0xff] }
 0x44b   : > { %11501 = vmatprep.subr.bf16.mxu1 %v11500_v59  ;;  %v11516_v50 = vpack.c.bf16 %v5906_v34, %v5905_v18  ;;  %v5880_v18 = vld [vmem:[#allocation3 + $0xd3] sm:$0xff]  ;;  %v5881_v34 = vld [vmem:[#allocation3 + $0xdb] sm:$0xff] }
 0x44d   : > { %10599 = vmatmul.mubr.f32.gmra.mrb[4].mxu1 %v13718_v19  ;;  %v5907_v19 = vld [vmem:[#allocation4 + $0x270] sm:$0xff] }
 0x44e   : > { %10601 = vmatprep.mubr.f32.mxu1 %v13721_v21  ;;  %11503 = vmatpush3.bf16.msra.mxu1 %v11500_v59  ;;  %v11520_v7 = vpack.c.bf16 %v5908_v20, %v5907_v19  ;;  %v6299_v21 = vld [vmem:[#allocation4 + $0x280] sm:$0xff]  ;;  %v11556_v59 = vpack.c.bf16 %v6706_v17, %v6705_v2  ;;  %v5884_v20 = vld [vmem:[#allocation3 + $0xf3] sm:$0xff]  ;;  %v13901_v17 = vld [vmem:[#allocation3 + $0xbc] sm:$0xff] }
 0x44f   : > { %11505 = vmatprep.subr.bf16.mxu1 %v11504_v11  ;;  %v5883_v19 = vld [vmem:[#allocation3 + $0xeb] sm:$0xff]  ;;  %v13898_v2 = vld [vmem:[#allocation3 + $0xb4] sm:$0xff] }
 0x451   : > { %10602 = vmatmul.mubr.f32.gmra.mrb[6].mxu1 %v13724_v23  ;;  %v11524_v23 = vpack.c.bf16 %v6300_v22, %v6299_v21  ;;  %v5887_v21 = vld [vmem:[#allocation3 + $0x10b] sm:$0xff]  ;;  %v6707_v22 = vld [vmem:[#allocation4 + $0x310] sm:$0xff] }
 0x452   : > { %10604 = vmatprep.mubr.f32.mxu1 %v13727_v28  ;;  %11507 = vmatpush3.bf16.msra.mxu1 %v11504_v11  ;;  %v6301_v28 = vld [vmem:[#allocation4 + $0x290] sm:$0xff] }
 0x453   : > { %11509 = vmatprep.subr.bf16.mxu1 %v11508_v4  ;;  %v11528_v30 = vpack.c.bf16 %v6302_v29, %v6301_v28  ;;  %v5873_v11 = vld [vmem:[#allocation3 + $0x9b] sm:$0xff]  ;;  %v6709_v29 = vld [vmem:[#allocation4 + $0x320] sm:$0xff] }
 0x454   : > { %v6263_v28 = vld [vmem:[#allocation3 + $0x1c] sm:$0xff] }
 0x455   : > { %10605 = vmatmul.mubr.f32.gmra.mrb[8].mxu1 %v13730_v24  ;;  %v5856_v24 = vld [vmem:[#allocation3 + $0x13] sm:$0xff] }
 0x456   : > { %10607 = vmatprep.mubr.f32.mxu1 %v13733_v32  ;;  %11511 = vmatpush3.bf16.msra.mxu1 %v11508_v4  ;;  %v6303_v32 = vld [vmem:[#allocation4 + $0x2a0] sm:$0xff]  ;;  %v5876_v4 = vld [vmem:[#allocation3 + $0xb3] sm:$0xff] }
 0x457   : > { %11513 = vmatprep.subr.bf16.mxu1 %v11512_v15  ;;  %v11532_v35 = vpack.c.bf16 %v6304_v27, %v6303_v32  ;;  %v13853_v32 = vld [vmem:[#allocation3 + $0x3c] sm:$0xff]  ;;  %v6713_v27 = vld [vmem:[#allocation4 + $0x340] sm:$0xff] }
 0x459   : > { %10608 = vmatmul.mubr.f32.gmra.mrb[10].mxu1 %v13736_v33  ;;  %v5858_v33 = vld [vmem:[#allocation3 + $0x23] sm:$0xff] }
 0x45a   : > { %10610 = vmatprep.mubr.f32.mxu1 %v13739_v37  ;;  %11515 = vmatpush3.bf16.msra.mxu1 %v11512_v15  ;;  %v6305_v37 = vld [vmem:[#allocation4 + $0x2b0] sm:$0xff]  ;;  %v5879_v15 = vld [vmem:[#allocation3 + $0xcb] sm:$0xff] }
 0x45b   : > { %11517 = vmatprep.subr.bf16.mxu1 %v11516_v50 }
 0x45d   : > { %10611 = vmatmul.mubr.f32.gmra.mrb[12].mxu1 %v13742_v40  ;;  %v5860_v40 = vld [vmem:[#allocation3 + $0x33] sm:$0xff] }
 0x45e   : > { %10613 = vmatprep.mubr.f32.mxu1 %v13745_v42  ;;  %11519 = vmatpush3.bf16.msra.mxu1 %v11516_v50  ;;  %v11536_v42 = vpack.c.bf16 %v6306_v39, %v6305_v37  ;;  %v5882_v50 = vld [vmem:[#allocation3 + $0xe3] sm:$0xff]  ;;  %v13859_v37 = vld [vmem:[#allocation3 + $0x4c] sm:$0xff]  ;;  %v6715_v39 = vld [vmem:[#allocation4 + $0x350] sm:$0xff] }
 0x45f   : > { %11521 = vmatprep.subr.bf16.mxu1 %v11520_v7 }
 0x461   : > { %10614 = vmatmul.mubr.f32.gmra.mrb[14].mxu1 %v13748_v43  ;;  %v5861_v43 = vld [vmem:[#allocation3 + $0x3b] sm:$0xff] }
 0x462   : > { %10616 = vmatprep.mubr.f32.mxu1 %v13751_v52  ;;  %11523 = vmatpush3.bf16.msra.mxu1 %v11520_v7  ;;  %v6307_v52 = vld [vmem:[#allocation4 + $0x2c0] sm:$0xff]  ;;  %v5885_v7 = vld [vmem:[#allocation3 + $0xfb] sm:$0xff] }
 0x463   : > { %11525 = vmatprep.subr.bf16.mxu1 %v11524_v23 }
 0x465   : > { %10617 = vmatmul.mubr.f32.gmra.mrb[16].mxu1 %v13754_v54  ;;  %v6308_v54 = vld [vmem:[#allocation4 + $0x2c8] sm:$0xff] }
 0x466   : > { %10619 = vmatprep.mubr.f32.mxu1 %v13757_v57  ;;  %v5862_v57 = vld [vmem:[#allocation3 + $0x43] sm:$0xff] }
 0x469   : > { %10620 = vmatmul.mubr.f32.gmra.mrb[18].mxu1 %v13760_v62  ;;  %v11540_v62 = vpack.c.bf16 %v6308_v54, %v6307_v52  ;;  %v13865_v52 = vld [vmem:[#allocation3 + $0x5c] sm:$0xff]  ;;  %v6717_v54 = vld [vmem:[#allocation4 + $0x360] sm:$0xff] }
 0x46a   : > { %10622 = vmatprep.mubr.f32.mxu1 %v13763_v63  ;;  %v5863_v63 = vld [vmem:[#allocation3 + $0x4b] sm:$0xff] }
 0x46d   : > { %10623 = vmatmul.mubr.f32.gmra.mrb[20].mxu1 %v13766_v41  ;;  %v6309_v41 = vld [vmem:[#allocation4 + $0x2d0] sm:$0xff] }
 0x46e   : > { %10625 = vmatprep.mubr.f32.mxu1 %v13769_v5  ;;  %v6310_v5 = vld [vmem:[#allocation4 + $0x2d8] sm:$0xff] }
 0x471   : > { %10626 = vmatmul.mubr.f32.gmra.mrb[22].mxu1 %v13772_v10  ;;  %v5864_v10 = vld [vmem:[#allocation3 + $0x53] sm:$0xff] }
 0x472   : > { %10628 = vmatprep.mubr.f32.mxu1 %v13775_v13  ;;  %v11544_v13 = vpack.c.bf16 %v6310_v5, %v6309_v41  ;;  %v13871_v41 = vld [vmem:[#allocation3 + $0x6c] sm:$0xff]  ;;  %v6719_v5 = vld [vmem:[#allocation4 + $0x370] sm:$0xff] }
 0x475   : > { %10629 = vmatmul.mubr.f32.gmra.mrb[24].mxu1 %v13778_v51  ;;  %v5865_v51 = vld [vmem:[#allocation3 + $0x5b] sm:$0xff] }
 0x476   : > { %10631 = vmatprep.mubr.f32.mxu1 %v13781_v56  ;;  %v6311_v56 = vld [vmem:[#allocation4 + $0x2e0] sm:$0xff] }
 0x479   : > { %10632 = vmatmul.mubr.f32.gmra.mrb[26].mxu1 %v13784_v3  ;;  %v6312_v3 = vld [vmem:[#allocation4 + $0x2e8] sm:$0xff] }
 0x47a   : > { %10634 = vmatprep.mubr.f32.mxu1 %v13787_v60  ;;  %v5866_v60 = vld [vmem:[#allocation3 + $0x63] sm:$0xff] }
 0x47d   : > { %10635 = vmatmul.mubr.f32.gmra.mrb[28].mxu1 %v13790_v48  ;;  %v11548_v48 = vpack.c.bf16 %v6312_v3, %v6311_v56  ;;  %v13877_v56 = vld [vmem:[#allocation3 + $0x7c] sm:$0xff]  ;;  %v7111_v3 = vld [vmem:[#allocation4 + $0x380] sm:$0xff] }
 0x47e   : > { %10637 = vmatprep.mubr.f32.mxu1 %v13793_v61  ;;  %v5867_v61 = vld [vmem:[#allocation3 + $0x6b] sm:$0xff] }
 0x481   : > { %10638 = vmatmul.mubr.f32.gmra.mrb[30].mxu1 %v13796_v53  ;;  %v6313_v53 = vld [vmem:[#allocation4 + $0x2f0] sm:$0xff] }
 0x482   : > { %10640 = vmatprep.mubr.f32.mxu1 %v13799_v45  ;;  %v6314_v45 = vld [vmem:[#allocation4 + $0x2f8] sm:$0xff] }
 0x483   : > { %v11552_v9 = vpack.c.bf16 %v6314_v45, %v6313_v53  ;;  %v13883_v53 = vld [vmem:[#allocation3 + $0x8c] sm:$0xff]  ;;  %v13886_v45 = vld [vmem:[#allocation3 + $0x94] sm:$0xff] }
 0x485   : > { %10641 = vmatmul.mubr.f32.gmra.mrb[32].mxu1 %v13802_v46  ;;  %v5868_v46 = vld [vmem:[#allocation3 + $0x73] sm:$0xff] }
 0x486   : > { %10643 = vmatprep.mubr.f32.mxu1 %v5484_v25  ;;  %v6262_v25 = vld [vmem:[#allocation3 + $0x14] sm:$0xff] }
 0x489   : > { %10644 = vmatmul.mubr.f32.gmra.mrb[34].mxu1 %v5485_v26 }
 0x48a   : > { %10678 = vmatprep.mubr.f32.mxu1 %v5856_v24  ;;  %v6710_v24 = vld [vmem:[#allocation4 + $0x328] sm:$0xff] }
 0x48d   : > { %10679 = vmatmul.mubr.f32.vlgmr.msra.gmra.mrb[0].mxu1 %v5857_v31 }
 0x48e   : > { %10681 = vmatprep.mubr.f32.mxu1 %v5858_v33  ;;  %11527 = vmatpush3.bf16.msra.mxu1 %v11524_v23  ;;  %v6708_v23 = vld [vmem:[#allocation4 + $0x318] sm:$0xff]  ;;  %v6714_v33 = vld [vmem:[#allocation4 + $0x348] sm:$0xff] }
 0x48f   : > { %11529 = vmatprep.subr.bf16.mxu1 %v11528_v30  ;;  %v11560_v26 = vpack.c.bf16 %v6708_v23, %v6707_v22  ;;  %v7116_v22 = vld [vmem:[#allocation4 + $0x3a8] sm:$0xff] }
 0x491   : > { %10682 = vmatmul.mubr.f32.gmra.mrb[2].mxu1 %v5859_v36  ;;  %v11572_v36 = vpack.c.bf16 %v6714_v33, %v6713_v27  ;;  %v7126_v27 = vld [vmem:[#allocation4 + $0x3f8] sm:$0xff] }
 0x492   : > { %10684 = vmatprep.mubr.f32.mxu1 %v5860_v40  ;;  %11531 = vmatpush3.bf16.msra.mxu1 %v11528_v30  ;;  %v6712_v30 = vld [vmem:[#allocation4 + $0x338] sm:$0xff] }
 0x493   : > { %11533 = vmatprep.subr.bf16.mxu1 %v11532_v35  ;;  %v6716_v40 = vld [vmem:[#allocation4 + $0x358] sm:$0xff] }
 0x495   : > { %10685 = vmatmul.mubr.f32.gmra.mrb[4].mxu1 %v5861_v43  ;;  %v11576_v43 = vpack.c.bf16 %v6716_v40, %v6715_v39  ;;  %v6702_v39 = vld [vmem:[#allocation3 + $0x134] sm:$0xff]  ;;  %v6703_v40 = vld [vmem:[#allocation3 + $0x13c] sm:$0xff] }
 0x496   : > { %10687 = vmatprep.mubr.f32.mxu1 %v5862_v57  ;;  %11535 = vmatpush3.bf16.msra.mxu1 %v11532_v35  ;;  %v13856_v35 = vld [vmem:[#allocation3 + $0x44] sm:$0xff]  ;;  %v6718_v57 = vld [vmem:[#allocation4 + $0x368] sm:$0xff] }
 0x497   : > { %11537 = vmatprep.subr.bf16.mxu1 %v11536_v42 }
 0x499   : > { %10688 = vmatmul.mubr.f32.gmra.mrb[6].mxu1 %v5863_v63  ;;  %v11580_v63 = vpack.c.bf16 %v6718_v57, %v6717_v54  ;;  %v7075_v57 = vld [vmem:[#allocation3 + $0x2d] sm:$0xff] }
 0x49a   : > { %10690 = vmatprep.mubr.f32.mxu1 %v5864_v10  ;;  %11539 = vmatpush3.bf16.msra.mxu1 %v11536_v42  ;;  %v13862_v42 = vld [vmem:[#allocation3 + $0x54] sm:$0xff]  ;;  %v6720_v10 = vld [vmem:[#allocation4 + $0x378] sm:$0xff] }
 0x49b   : > { %11541 = vmatprep.subr.bf16.mxu1 %v11540_v62 }
 0x49d   : > { %10691 = vmatmul.mubr.f32.gmra.mrb[8].mxu1 %v5865_v51  ;;  %v11584_v51 = vpack.c.bf16 %v6720_v10, %v6719_v5  ;;  %v7077_v10 = vld [vmem:[#allocation3 + $0x3d] sm:$0xff] }
 0x49e   : > { %10693 = vmatprep.mubr.f32.mxu1 %v5866_v60  ;;  %11543 = vmatpush3.bf16.msra.mxu1 %v11540_v62  ;;  %v13868_v62 = vld [vmem:[#allocation3 + $0x64] sm:$0xff]  ;;  %v7112_v60 = vld [vmem:[#allocation4 + $0x388] sm:$0xff] }
 0x49f   : > { %11545 = vmatprep.subr.bf16.mxu1 %v11544_v13 }
 0x4a1   : > { %10694 = vmatmul.mubr.f32.gmra.mrb[10].mxu1 %v5867_v61  ;;  %v11588_v61 = vpack.c.bf16 %v7112_v60, %v7111_v3  ;;  %v7079_v60 = vld [vmem:[#allocation3 + $0x4d] sm:$0xff] }
 0x4a2   : > { %10696 = vmatprep.mubr.f32.mxu1 %v5868_v46  ;;  %11547 = vmatpush3.bf16.msra.mxu1 %v11544_v13  ;;  %v13874_v13 = vld [vmem:[#allocation3 + $0x74] sm:$0xff]  ;;  %v13889_v46 = vld [vmem:[#allocation3 + $0x9c] sm:$0xff] }
 0x4a3   : > { %11549 = vmatprep.subr.bf16.mxu1 %v11548_v48 }
 0x4a5   : > { %10697 = vmatmul.mubr.f32.gmra.mrb[12].mxu1 %v5869_v1  ;;  %v13895_v1 = vld [vmem:[#allocation3 + $0xac] sm:$0xff] }
 0x4a6   : > { %10699 = vmatprep.mubr.f32.mxu1 %v5870_v58  ;;  %11551 = vmatpush3.bf16.msra.mxu1 %v11548_v48  ;;  %v13880_v48 = vld [vmem:[#allocation3 + $0x84] sm:$0xff] }
 0x4a7   : > { %11553 = vmatprep.subr.bf16.mxu1 %v11552_v9  ;;  %v13904_v58 = vld [vmem:[#allocation3 + $0xc4] sm:$0xff] }
 0x4a9   : > { %10700 = vmatmul.mubr.f32.gmra.mrb[14].mxu1 %v5871_v0  ;;  %v13910_v0 = vld [vmem:[#allocation3 + $0xd4] sm:$0xff] }
 0x4aa   : > { %10702 = vmatprep.mubr.f32.mxu1 %v5872_v55  ;;  %11555 = vmatpush3.bf16.msra.mxu1 %v11552_v9  ;;  %v13892_v9 = vld [vmem:[#allocation3 + $0xa4] sm:$0xff]  ;;  %v13913_v55 = vld [vmem:[#allocation3 + $0xdc] sm:$0xff] }
 0x4ab   : > { %11557 = vmatprep.subr.bf16.mxu1 %v11556_v59 }
 0x4ad   : > { %10703 = vmatmul.mubr.f32.gmra.mrb[16].mxu1 %v5873_v11  ;;  %v13916_v11 = vld [vmem:[#allocation3 + $0xe4] sm:$0xff] }
 0x4ae   : > { %10705 = vmatprep.mubr.f32.mxu1 %v5874_v6  ;;  %v13919_v6 = vld [vmem:[#allocation3 + $0xec] sm:$0xff] }
 0x4b1   : > { %10706 = vmatmul.mubr.f32.gmra.mrb[18].mxu1 %v5875_v14  ;;  %v13922_v14 = vld [vmem:[#allocation3 + $0xf4] sm:$0xff] }
 0x4b2   : > { %10708 = vmatprep.mubr.f32.mxu1 %v5876_v4  ;;  %v13925_v4 = vld [vmem:[#allocation3 + $0xfc] sm:$0xff] }
 0x4b5   : > { %10709 = vmatmul.mubr.f32.gmra.mrb[20].mxu1 %v5877_v12  ;;  %v13928_v12 = vld [vmem:[#allocation3 + $0x104] sm:$0xff] }
 0x4b6   : > { %10711 = vmatprep.mubr.f32.mxu1 %v5878_v16  ;;  %v13931_v16 = vld [vmem:[#allocation3 + $0x10c] sm:$0xff] }
 0x4b9   : > { %10712 = vmatmul.mubr.f32.gmra.mrb[22].mxu1 %v5879_v15  ;;  %v13934_v15 = vld [vmem:[#allocation3 + $0x114] sm:$0xff] }
 0x4ba   : > { %10714 = vmatprep.mubr.f32.mxu1 %v5880_v18  ;;  %v13937_v18 = vld [vmem:[#allocation3 + $0x11c] sm:$0xff] }
 0x4bd   : > { %10715 = vmatmul.mubr.f32.gmra.mrb[24].mxu1 %v5881_v34  ;;  %v13940_v34 = vld [vmem:[#allocation3 + $0x124] sm:$0xff] }
 0x4be   : > { %10717 = vmatprep.mubr.f32.mxu1 %v5882_v50  ;;  %v13943_v50 = vld [vmem:[#allocation3 + $0x12c] sm:$0xff] }
 0x4c1   : > { %10718 = vmatmul.mubr.f32.gmra.mrb[26].mxu1 %v5883_v19  ;;  %v7113_v19 = vld [vmem:[#allocation4 + $0x390] sm:$0xff] }
 0x4c2   : > { %10720 = vmatprep.mubr.f32.mxu1 %v5884_v20  ;;  %v7114_v20 = vld [vmem:[#allocation4 + $0x398] sm:$0xff] }
 0x4c5   : > { %10721 = vmatmul.mubr.f32.gmra.mrb[28].mxu1 %v5885_v7  ;;  %v11592_v7 = vpack.c.bf16 %v7114_v20, %v7113_v19  ;;  %v7091_v19 = vld [vmem:[#allocation3 + $0xad] sm:$0xff]  ;;  %v7092_v20 = vld [vmem:[#allocation3 + $0xb5] sm:$0xff] }
 0x4c6   : > { %10723 = vmatprep.mubr.f32.mxu1 %v13684_v38  ;;  %v13844_v38 = vld [vmem:[#allocation3 + $0x24] sm:$0xff] }
 0x4c9   : > { %10724 = vmatmul.mubr.f32.gmra.mrb[30].mxu1 %v5887_v21  ;;  %v7115_v21 = vld [vmem:[#allocation4 + $0x3a0] sm:$0xff] }
 0x4ca   : > { %10726 = vmatprep.mubr.f32.mxu1 %v13691_v47  ;;  %v13847_v47 = vld [vmem:[#allocation3 + $0x2c] sm:$0xff]  ;;  %v11596_v23 = vpack.c.bf16 %v7116_v22, %v7115_v21 }
 0x4cb   : > { %v7094_v21 = vld [vmem:[#allocation3 + $0xc5] sm:$0xff]  ;;  %v7095_v22 = vld [vmem:[#allocation3 + $0xcd] sm:$0xff] }
 0x4cd   : > { %10727 = vmatmul.mubr.f32.gmra.mrb[32].mxu1 %v13688_v44  ;;  %v11564_v44 = vpack.c.bf16 %v6710_v24, %v6709_v29  ;;  %v7119_v29 = vld [vmem:[#allocation4 + $0x3c0] sm:$0xff]  ;;  %v7120_v24 = vld [vmem:[#allocation4 + $0x3c8] sm:$0xff] }
 0x4ce   : > { %10729 = vmatprep.mubr.f32.mxu1 %v13698_v8  ;;  %v6711_v8 = vld [vmem:[#allocation4 + $0x330] sm:$0xff] }
 0x4cf   : > { %v11568_v31 = vpack.c.bf16 %v6712_v30, %v6711_v8  ;;  %v7123_v30 = vld [vmem:[#allocation4 + $0x3e0] sm:$0xff] }
 0x4d1   : > { %10730 = vmatmul.mubr.f32.gmra.mrb[34].mxu1 %v13696_v49  ;;  %v13850_v49 = vld [vmem:[#allocation3 + $0x34] sm:$0xff] }
 0x4d2   : > { %10764 = vmatprep.mubr.f32.mxu1 %v6262_v25  ;;  %v7117_v25 = vld [vmem:[#allocation4 + $0x3b0] sm:$0xff] }
 0x4d5   : > { %10765 = vmatmul.mubr.f32.vlgmr.msra.gmra.mrb[0].mxu1 %v6263_v28 }
 0x4d6   : > { %10767 = vmatprep.mubr.f32.mxu1 %v13844_v38  ;;  %11559 = vmatpush3.bf16.msra.mxu1 %v11556_v59  ;;  %v13907_v59 = vld [vmem:[#allocation3 + $0xcc] sm:$0xff] }
 0x4d7   : > { %11561 = vmatprep.subr.bf16.mxu1 %v11560_v26 }
 0x4d9   : > { %10768 = vmatmul.mubr.f32.gmra.mrb[2].mxu1 %v13847_v47 }
 0x4da   : > { %10770 = vmatprep.mubr.f32.mxu1 %v13850_v49  ;;  %11563 = vmatpush3.bf16.msra.mxu1 %v11560_v26  ;;  %v7118_v26 = vld [vmem:[#allocation4 + $0x3b8] sm:$0xff] }
 0x4db   : > { %11565 = vmatprep.subr.bf16.mxu1 %v11564_v44  ;;  %v11600_v28 = vpack.c.bf16 %v7118_v26, %v7117_v25  ;;  %v7097_v25 = vld [vmem:[#allocation3 + $0xdd] sm:$0xff]  ;;  %v7098_v26 = vld [vmem:[#allocation3 + $0xe5] sm:$0xff] }
 0x4dd   : > { %10771 = vmatmul.mubr.f32.gmra.mrb[4].mxu1 %v13853_v32 }
 0x4de   : > { %10773 = vmatprep.mubr.f32.mxu1 %v13856_v35  ;;  %11567 = vmatpush3.bf16.msra.mxu1 %v11564_v44  ;;  %v7121_v44 = vld [vmem:[#allocation4 + $0x3d0] sm:$0xff] }
 0x4df   : > { %11569 = vmatprep.subr.bf16.mxu1 %v11568_v31 }
 0x4e1   : > { %10774 = vmatmul.mubr.f32.gmra.mrb[6].mxu1 %v13859_v37 }
 0x4e2   : > { %10776 = vmatprep.mubr.f32.mxu1 %v13862_v42  ;;  %11571 = vmatpush3.bf16.msra.mxu1 %v11568_v31 }
 0x4e3   : > { %11573 = vmatprep.subr.bf16.mxu1 %v11572_v36 }
 0x4e5   : > { %10777 = vmatmul.mubr.f32.gmra.mrb[8].mxu1 %v13865_v52 }
 0x4e6   : > { %10779 = vmatprep.mubr.f32.mxu1 %v13868_v62  ;;  %11575 = vmatpush3.bf16.msra.mxu1 %v11572_v36  ;;  %v7518_v36 = vld [vmem:[#allocation4 + $0x408] sm:$0xff] }
 0x4e7   : > { %11577 = vmatprep.subr.bf16.mxu1 %v11576_v43 }
 0x4e9   : > { %10780 = vmatmul.mubr.f32.gmra.mrb[10].mxu1 %v13871_v41 }
 0x4ea   : > { %10782 = vmatprep.mubr.f32.mxu1 %v13874_v13  ;;  %11579 = vmatpush3.bf16.msra.mxu1 %v11576_v43  ;;  %v7520_v43 = vld [vmem:[#allocation4 + $0x418] sm:$0xff] }
 0x4eb   : > { %11581 = vmatprep.subr.bf16.mxu1 %v11580_v63 }
 0x4ed   : > { %10783 = vmatmul.mubr.f32.gmra.mrb[12].mxu1 %v13877_v56 }
 0x4ee   : > { %10785 = vmatprep.mubr.f32.mxu1 %v13880_v48  ;;  %11583 = vmatpush3.bf16.msra.mxu1 %v11580_v63  ;;  %v7522_v63 = vld [vmem:[#allocation4 + $0x428] sm:$0xff] }
 0x4ef   : > { %11585 = vmatprep.subr.bf16.mxu1 %v11584_v51 }
 0x4f1   : > { %10786 = vmatmul.mubr.f32.gmra.mrb[14].mxu1 %v13883_v53 }
 0x4f2   : > { %10788 = vmatprep.mubr.f32.mxu1 %v13886_v45  ;;  %11587 = vmatpush3.bf16.msra.mxu1 %v11584_v51  ;;  %v7524_v51 = vld [vmem:[#allocation4 + $0x438] sm:$0xff] }
 0x4f3   : > { %11589 = vmatprep.subr.bf16.mxu1 %v11588_v61 }
 0x4f5   : > { %10789 = vmatmul.mubr.f32.gmra.mrb[16].mxu1 %v13889_v46 }
 0x4f6   : > { %10791 = vmatprep.mubr.f32.mxu1 %v13892_v9 }
 0x4f9   : > { %10792 = vmatmul.mubr.f32.gmra.mrb[18].mxu1 %v13895_v1 }
 0x4fa   : > { %10794 = vmatprep.mubr.f32.mxu1 %v13898_v2 }
 0x4fd   : > { %10795 = vmatmul.mubr.f32.gmra.mrb[20].mxu1 %v13901_v17 }
 0x4fe   : > { %10797 = vmatprep.mubr.f32.mxu1 %v13904_v58 }
 0x501   : > { %10798 = vmatmul.mubr.f32.gmra.mrb[22].mxu1 %v13907_v59 }
 0x502   : > { %10800 = vmatprep.mubr.f32.mxu1 %v13910_v0 }
 0x505   : > { %10801 = vmatmul.mubr.f32.gmra.mrb[24].mxu1 %v13913_v55 }
 0x506   : > { %10803 = vmatprep.mubr.f32.mxu1 %v13916_v11 }
 0x509   : > { %10804 = vmatmul.mubr.f32.gmra.mrb[26].mxu1 %v13919_v6 }
 0x50a   : > { %10806 = vmatprep.mubr.f32.mxu1 %v13922_v14 }
 0x50d   : > { %10807 = vmatmul.mubr.f32.gmra.mrb[28].mxu1 %v13925_v4 }
 0x50e   : > { %10809 = vmatprep.mubr.f32.mxu1 %v13928_v12 }
 0x511   : > { %10810 = vmatmul.mubr.f32.gmra.mrb[30].mxu1 %v13931_v16 }
 0x512   : > { %10812 = vmatprep.mubr.f32.mxu1 %v13934_v15 }
 0x515   : > { %10813 = vmatmul.mubr.f32.gmra.mrb[32].mxu1 %v13937_v18 }
 0x516   : > { %10815 = vmatprep.mubr.f32.mxu1 %v13940_v34 }
 0x519   : > { %10816 = vmatmul.mubr.f32.gmra.mrb[34].mxu1 %v13943_v50 }
 0x51a   : > { %10850 = vmatprep.mubr.f32.mxu1 %v13844_v38  ;;  %v11604_v38 = vpack.c.bf16 %v7120_v24, %v7119_v29  ;;  %v7100_v29 = vld [vmem:[#allocation3 + $0xf5] sm:$0xff]  ;;  %v7101_v24 = vld [vmem:[#allocation3 + $0xfd] sm:$0xff] }
 0x51d   : > { %10851 = vmatmul.mubr.f32.vlgmr.msra.gmra.mrb[0].mxu1 %v13847_v47  ;;  %v7122_v47 = vld [vmem:[#allocation4 + $0x3d8] sm:$0xff] }
 0x51e   : > { %10853 = vmatprep.mubr.f32.mxu1 %v13850_v49  ;;  %11591 = vmatpush3.bf16.msra.mxu1 %v11588_v61  ;;  %v11608_v8 = vpack.c.bf16 %v7122_v47, %v7121_v44  ;;  %v7124_v49 = vld [vmem:[#allocation4 + $0x3e8] sm:$0xff] }
 0x51f   : > { %11593 = vmatprep.subr.bf16.mxu1 %v11592_v7  ;;  %v11612_v31 = vpack.c.bf16 %v7124_v49, %v7123_v30  ;;  %v7526_v61 = vld [vmem:[#allocation4 + $0x448] sm:$0xff]  ;;  %v7106_v30 = vld [vmem:[#allocation3 + $0x125] sm:$0xff] }
 0x520   : > { %v7103_v44 = vld [vmem:[#allocation3 + $0x10d] sm:$0xff]  ;;  %v7104_v47 = vld [vmem:[#allocation3 + $0x115] sm:$0xff] }
 0x521   : > { %10854 = vmatmul.mubr.f32.gmra.mrb[2].mxu1 %v13853_v32  ;;  %v7125_v32 = vld [vmem:[#allocation4 + $0x3f0] sm:$0xff] }
 0x522   : > { %10856 = vmatprep.mubr.f32.mxu1 %v13856_v35  ;;  %11595 = vmatpush3.bf16.msra.mxu1 %v11592_v7  ;;  %v11616_v33 = vpack.c.bf16 %v7126_v27, %v7125_v32  ;;  %v7517_v35 = vld [vmem:[#allocation4 + $0x400] sm:$0xff]  ;;  %v7093_v7 = vld [vmem:[#allocation3 + $0xbd] sm:$0xff]  ;;  %v7108_v49 = vld [vmem:[#allocation3 + $0x135] sm:$0xff] }
 0x523   : > { %11597 = vmatprep.subr.bf16.mxu1 %v11596_v23  ;;  %v7109_v32 = vld [vmem:[#allocation3 + $0x13d] sm:$0xff]  ;;  %v7480_v27 = vld [vmem:[#allocation3 + $0x26] sm:$0xff] }
 0x525   : > { %10857 = vmatmul.mubr.f32.gmra.mrb[4].mxu1 %v13859_v37  ;;  %v11620_v37 = vpack.c.bf16 %v7518_v36, %v7517_v35  ;;  %v7482_v35 = vld [vmem:[#allocation3 + $0x36] sm:$0xff]  ;;  %v7483_v36 = vld [vmem:[#allocation3 + $0x3e] sm:$0xff] }
 0x526   : > { %10859 = vmatprep.mubr.f32.mxu1 %v13862_v42  ;;  %11599 = vmatpush3.bf16.msra.mxu1 %v11596_v23  ;;  %v7519_v42 = vld [vmem:[#allocation4 + $0x410] sm:$0xff] }
 0x527   : > { %11601 = vmatprep.subr.bf16.mxu1 %v11600_v28  ;;  %v11624_v54 = vpack.c.bf16 %v7520_v43, %v7519_v42  ;;  %v7096_v23 = vld [vmem:[#allocation3 + $0xd5] sm:$0xff]  ;;  %v7487_v42 = vld [vmem:[#allocation3 + $0x5e] sm:$0xff]  ;;  %v7488_v43 = vld [vmem:[#allocation3 + $0x66] sm:$0xff] }
 0x529   : > { %10860 = vmatmul.mubr.f32.gmra.mrb[6].mxu1 %v13865_v52  ;;  %v7074_v52 = vld [vmem:[#allocation3 + $0x25] sm:$0xff] }
 0x52a   : > { %10862 = vmatprep.mubr.f32.mxu1 %v13868_v62  ;;  %11603 = vmatpush3.bf16.msra.mxu1 %v11600_v28  ;;  %v7521_v62 = vld [vmem:[#allocation4 + $0x420] sm:$0xff] }
 0x52b   : > { %11605 = vmatprep.subr.bf16.mxu1 %v11604_v38  ;;  %v11628_v5 = vpack.c.bf16 %v7522_v63, %v7521_v62  ;;  %v7099_v28 = vld [vmem:[#allocation3 + $0xed] sm:$0xff] }
 0x52c   : > { %v7492_v62 = vld [vmem:[#allocation3 + $0x86] sm:$0xff]  ;;  %v7493_v63 = vld [vmem:[#allocation3 + $0x8e] sm:$0xff] }
 0x52d   : > { %10863 = vmatmul.mubr.f32.gmra.mrb[8].mxu1 %v13871_v41  ;;  %v7076_v41 = vld [vmem:[#allocation3 + $0x35] sm:$0xff] }
 0x52e   : > { %10865 = vmatprep.mubr.f32.mxu1 %v13874_v13  ;;  %11607 = vmatpush3.bf16.msra.mxu1 %v11604_v38  ;;  %v7523_v13 = vld [vmem:[#allocation4 + $0x430] sm:$0xff]  ;;  %v7102_v38 = vld [vmem:[#allocation3 + $0x105] sm:$0xff] }
 0x52f   : > { %11609 = vmatprep.subr.bf16.mxu1 %v11608_v8  ;;  %v11632_v3 = vpack.c.bf16 %v7524_v51, %v7523_v13  ;;  %v7497_v13 = vld [vmem:[#allocation3 + $0xae] sm:$0xff]  ;;  %v7498_v51 = vld [vmem:[#allocation3 + $0xb6] sm:$0xff] }
 0x531   : > { %10866 = vmatmul.mubr.f32.gmra.mrb[10].mxu1 %v13877_v56  ;;  %v7078_v56 = vld [vmem:[#allocation3 + $0x45] sm:$0xff] }
 0x532   : > { %10868 = vmatprep.mubr.f32.mxu1 %v13880_v48  ;;  %11611 = vmatpush3.bf16.msra.mxu1 %v11608_v8  ;;  %v7525_v48 = vld [vmem:[#allocation4 + $0x440] sm:$0xff]  ;;  %v7105_v8 = vld [vmem:[#allocation3 + $0x11d] sm:$0xff] }
 0x533   : > { %11613 = vmatprep.subr.bf16.mxu1 %v11612_v31 }
 0x535   : > { %10869 = vmatmul.mubr.f32.gmra.mrb[12].mxu1 %v13883_v53  ;;  %v7080_v53 = vld [vmem:[#allocation3 + $0x55] sm:$0xff] }
 0x536   : > { %10871 = vmatprep.mubr.f32.mxu1 %v13886_v45  ;;  %11615 = vmatpush3.bf16.msra.mxu1 %v11612_v31  ;;  %v11636_v45 = vpack.c.bf16 %v7526_v61, %v7525_v48  ;;  %v7107_v31 = vld [vmem:[#allocation3 + $0x12d] sm:$0xff]  ;;  %v7502_v48 = vld [vmem:[#allocation3 + $0xd6] sm:$0xff]  ;;  %v7503_v61 = vld [vmem:[#allocation3 + $0xde] sm:$0xff] }
 0x537   : > { %11617 = vmatprep.subr.bf16.mxu1 %v11616_v33 }
 0x539   : > { %10872 = vmatmul.mubr.f32.gmra.mrb[14].mxu1 %v13889_v46  ;;  %v7081_v46 = vld [vmem:[#allocation3 + $0x5d] sm:$0xff] }
 0x53a   : > { %10874 = vmatprep.mubr.f32.mxu1 %v13892_v9  ;;  %11619 = vmatpush3.bf16.msra.mxu1 %v11616_v33  ;;  %v7527_v9 = vld [vmem:[#allocation4 + $0x450] sm:$0xff]  ;;  %v7481_v33 = vld [vmem:[#allocation3 + $0x2e] sm:$0xff] }
 0x53b   : > { %11621 = vmatprep.subr.bf16.mxu1 %v11620_v37 }
 0x53d   : > { %10875 = vmatmul.mubr.f32.gmra.mrb[16].mxu1 %v13895_v1  ;;  %v7528_v1 = vld [vmem:[#allocation4 + $0x458] sm:$0xff] }
 0x53e   : > { %10877 = vmatprep.mubr.f32.mxu1 %v13898_v2  ;;  %v7082_v2 = vld [vmem:[#allocation3 + $0x65] sm:$0xff] }
 0x541   : > { %10878 = vmatmul.mubr.f32.gmra.mrb[18].mxu1 %v13901_v17  ;;  %v11640_v17 = vpack.c.bf16 %v7528_v1, %v7527_v9  ;;  %v7507_v9 = vld [vmem:[#allocation3 + $0xfe] sm:$0xff]  ;;  %v7508_v1 = vld [vmem:[#allocation3 + $0x106] sm:$0xff] }
 0x542   : > { %10880 = vmatprep.mubr.f32.mxu1 %v13904_v58  ;;  %v7083_v58 = vld [vmem:[#allocation3 + $0x6d] sm:$0xff] }
 0x545   : > { %10881 = vmatmul.mubr.f32.gmra.mrb[20].mxu1 %v13907_v59  ;;  %v7529_v59 = vld [vmem:[#allocation4 + $0x460] sm:$0xff] }
 0x546   : > { %10883 = vmatprep.mubr.f32.mxu1 %v13910_v0  ;;  %v7530_v0 = vld [vmem:[#allocation4 + $0x468] sm:$0xff] }
 0x549   : > { %10884 = vmatmul.mubr.f32.gmra.mrb[22].mxu1 %v13913_v55  ;;  %v7084_v55 = vld [vmem:[#allocation3 + $0x75] sm:$0xff] }
 0x54a   : > { %10886 = vmatprep.mubr.f32.mxu1 %v13916_v11  ;;  %v11644_v11 = vpack.c.bf16 %v7530_v0, %v7529_v59  ;;  %v7512_v59 = vld [vmem:[#allocation3 + $0x126] sm:$0xff]  ;;  %v7514_v0 = vld [vmem:[#allocation3 + $0x136] sm:$0xff] }
 0x54d   : > { %10887 = vmatmul.mubr.f32.gmra.mrb[24].mxu1 %v13919_v6  ;;  %v7085_v6 = vld [vmem:[#allocation3 + $0x7d] sm:$0xff] }
 0x54e   : > { %10889 = vmatprep.mubr.f32.mxu1 %v13922_v14  ;;  %v7531_v14 = vld [vmem:[#allocation4 + $0x470] sm:$0xff] }
 0x551   : > { %10890 = vmatmul.mubr.f32.gmra.mrb[26].mxu1 %v13925_v4  ;;  %v7532_v4 = vld [vmem:[#allocation4 + $0x478] sm:$0xff] }
 0x552   : > { %10892 = vmatprep.mubr.f32.mxu1 %v13928_v12  ;;  %v7086_v12 = vld [vmem:[#allocation3 + $0x85] sm:$0xff] }
 0x555   : > { %10893 = vmatmul.mubr.f32.gmra.mrb[28].mxu1 %v13931_v16  ;;  %v11648_v16 = vpack.c.bf16 %v7532_v4, %v7531_v14  ;;  %v8045_v14 = vpop.permute.xlu1 %8044  ;;  %v8040_v4 = vpop.permute.xlu0 %8039 }
 0x556   : > { %10895 = vmatprep.mubr.f32.mxu1 %v13934_v15  ;;  %v7087_v15 = vld [vmem:[#allocation3 + $0x8d] sm:$0xff] }
 0x559   : > { %10896 = vmatmul.mubr.f32.gmra.mrb[30].mxu1 %v13937_v18  ;;  %v7088_v18 = vld [vmem:[#allocation3 + $0x95] sm:$0xff] }
 0x55a   : > { %10898 = vmatprep.mubr.f32.mxu1 %v13940_v34  ;;  %v7089_v34 = vld [vmem:[#allocation3 + $0x9d] sm:$0xff] }
 0x55d   : > { %10899 = vmatmul.mubr.f32.gmra.mrb[32].mxu1 %v13943_v50  ;;  %v7090_v50 = vld [vmem:[#allocation3 + $0xa5] sm:$0xff] }
 0x55e   : > { %10901 = vmatprep.mubr.f32.mxu1 %v6702_v39  ;;  %v7485_v39 = vld [vmem:[#allocation3 + $0x4e] sm:$0xff] }
 0x561   : > { %10902 = vmatmul.mubr.f32.gmra.mrb[34].mxu1 %v6703_v40  ;;  %v7486_v40 = vld [vmem:[#allocation3 + $0x56] sm:$0xff] }
 0x562   : > { %10936 = vmatprep.mubr.f32.mxu1 %v7074_v52  ;;  %v7489_v52 = vld [vmem:[#allocation3 + $0x6e] sm:$0xff] }
 0x565   : > { %10937 = vmatmul.mubr.f32.vlgmr.msra.gmra.mrb[0].mxu1 %v7075_v57  ;;  %v7491_v57 = vld [vmem:[#allocation3 + $0x7e] sm:$0xff] }
 0x566   : > { %10939 = vmatprep.mubr.f32.mxu1 %v7076_v41  ;;  %11623 = vmatpush3.bf16.msra.mxu1 %v11620_v37  ;;  %v7484_v37 = vld [vmem:[#allocation3 + $0x46] sm:$0xff]  ;;  %v7494_v41 = vld [vmem:[#allocation3 + $0x96] sm:$0xff] }
 0x567   : > { %11625 = vmatprep.subr.bf16.mxu1 %v11624_v54 }
 0x569   : > { %10940 = vmatmul.mubr.f32.gmra.mrb[2].mxu1 %v7077_v10  ;;  %v7496_v10 = vld [vmem:[#allocation3 + $0xa6] sm:$0xff] }
 0x56a   : > { %10942 = vmatprep.mubr.f32.mxu1 %v7078_v56  ;;  %11627 = vmatpush3.bf16.msra.mxu1 %v11624_v54  ;;  %v7490_v54 = vld [vmem:[#allocation3 + $0x76] sm:$0xff]  ;;  %v7499_v56 = vld [vmem:[#allocation3 + $0xbe] sm:$0xff] }
 0x56b   : > { %11629 = vmatprep.subr.bf16.mxu1 %v11628_v5 }
 0x56d   : > { %10943 = vmatmul.mubr.f32.gmra.mrb[4].mxu1 %v7079_v60  ;;  %v7501_v60 = vld [vmem:[#allocation3 + $0xce] sm:$0xff] }
 0x56e   : > { %10945 = vmatprep.mubr.f32.mxu1 %v7080_v53  ;;  %11631 = vmatpush3.bf16.msra.mxu1 %v11628_v5  ;;  %v7495_v5 = vld [vmem:[#allocation3 + $0x9e] sm:$0xff]  ;;  %v7504_v53 = vld [vmem:[#allocation3 + $0xe6] sm:$0xff] }
 0x56f   : > { %11633 = vmatprep.subr.bf16.mxu1 %v11632_v3 }
 0x571   : > { %10946 = vmatmul.mubr.f32.gmra.mrb[6].mxu1 %v7081_v46  ;;  %v7506_v46 = vld [vmem:[#allocation3 + $0xf6] sm:$0xff] }
 0x572   : > { %10948 = vmatprep.mubr.f32.mxu1 %v7082_v2  ;;  %11635 = vmatpush3.bf16.msra.mxu1 %v11632_v3  ;;  %v7500_v3 = vld [vmem:[#allocation3 + $0xc6] sm:$0xff]  ;;  %v7509_v2 = vld [vmem:[#allocation3 + $0x10e] sm:$0xff] }
 0x573   : > { %11637 = vmatprep.subr.bf16.mxu1 %v11636_v45 }
 0x575   : > { %10949 = vmatmul.mubr.f32.gmra.mrb[8].mxu1 %v7083_v58  ;;  %v7511_v58 = vld [vmem:[#allocation3 + $0x11e] sm:$0xff] }
 0x576   : > { %10951 = vmatprep.mubr.f32.mxu1 %v7084_v55  ;;  %11639 = vmatpush3.bf16.msra.mxu1 %v11636_v45  ;;  %v7505_v45 = vld [vmem:[#allocation3 + $0xee] sm:$0xff] }
 0x577   : > { %11641 = vmatprep.subr.bf16.mxu1 %v11640_v17  ;;  %v7513_v55 = vld [vmem:[#allocation3 + $0x12e] sm:$0xff] }
 0x579   : > { %10952 = vmatmul.mubr.f32.gmra.mrb[10].mxu1 %v7085_v6  ;;  %v12255_v6 = vld [vmem:[#allocation3] sm:$0xff] }
 0x57a   : > { %10954 = vmatprep.mubr.f32.mxu1 %v7086_v12  ;;  %11643 = vmatpush3.bf16.msra.mxu1 %v11640_v17  ;;  %v7510_v17 = vld [vmem:[#allocation3 + $0x116] sm:$0xff]  ;;  %308 = vst [vmem:[%s13984_s27] sm:$0xff] %v12255_v6  ;;  %309 = vst [vmem:[%s13984_s27 + $0x8] sm:$0xff] %v12255_v6  ;;  %v8055_v12 = vpop.permute.xlu1 %8054 }
 0x57b   : > { %11645 = vmatprep.subr.bf16.mxu1 %v11644_v11  ;;  %310 = vst [vmem:[%s13984_s27 + $0x10] sm:$0xff] %v12255_v6  ;;  %320 = vst [vmem:[%s13984_s27 + $0x60] sm:$0x3f] %v12255_v6 }
 0x57c   : > { %311 = vst [vmem:[%s13984_s27 + $0x18] sm:$0xff] %v12255_v6  ;;  %312 = vst [vmem:[%s13984_s27 + $0x20] sm:$0xff] %v12255_v6 }
 0x57d   : > { %10955 = vmatmul.mubr.f32.gmra.mrb[12].mxu1 %v7087_v15  ;;  %313 = vst [vmem:[%s13984_s27 + $0x28] sm:$0xff] %v12255_v6  ;;  %314 = vst [vmem:[%s13984_s27 + $0x30] sm:$0xff] %v12255_v6 }
 0x57e   : > { %10957 = vmatprep.mubr.f32.mxu1 %v7088_v18  ;;  %11647 = vmatpush3.bf16.msra.mxu1 %v11644_v11  ;;  %v7515_v11 = vld [vmem:[#allocation3 + $0x13e] sm:$0xff]  ;;  %315 = vst [vmem:[%s13984_s27 + $0x38] sm:$0xff] %v12255_v6  ;;  %316 = vst [vmem:[%s13984_s27 + $0x40] sm:$0xff] %v12255_v6  ;;  %v8065_v15 = vpop.permute.xlu1 %8064 }
 0x57f   : > { %11649 = vmatprep.subr.bf16.mxu1 %v11648_v16  ;;  %317 = vst [vmem:[%s13984_s27 + $0x48] sm:$0xff] %v12255_v6  ;;  %318 = vst [vmem:[%s13984_s27 + $0x50] sm:$0xff] %v12255_v6 }
 0x580   : > { %319 = vst [vmem:[%s13984_s27 + $0x58] sm:$0xff] %v12255_v6 }
 0x581   : > { %10958 = vmatmul.mubr.f32.gmra.mrb[14].mxu1 %v7089_v34 }
 0x582   : > { %10960 = vmatprep.mubr.f32.mxu1 %v7090_v50  ;;  %11651 = vmatpush3.bf16.msra.mxu1 %v11648_v16  ;;  %v8050_v16 = vpop.permute.xlu0 %8049  ;;  %v8075_v34 = vpop.permute.xlu1 %8074 }
 0x585   : > { %10961 = vmatmul.mubr.f32.gmra.mrb[16].mxu1 %v7091_v19 }
 0x586   : > { %10963 = vmatprep.mubr.f32.mxu1 %v7092_v20  ;;  %v8060_v18 = vpop.permute.xlu0 %8059  ;;  %v8085_v19 = vpop.permute.xlu1 %8084 }
 0x589   : > { %10964 = vmatmul.mubr.f32.gmra.mrb[18].mxu1 %v7093_v7  ;;  %v14002_v7 = vld [vmem:[%s14086_s5] ss:$0 sm:$0xff] }
 0x58a   : > { %10966 = vmatprep.mubr.f32.mxu1 %v7094_v21  ;;  %v8070_v50 = vpop.permute.xlu0 %8069  ;;  %v14004_v21 = vpop.permute.xlu1 %8094 }
 0x58d   : > { %10967 = vmatmul.mubr.f32.gmra.mrb[20].mxu1 %v7095_v22 }
 0x58e   : > { %10969 = vmatprep.mubr.f32.mxu1 %v7096_v23  ;;  %v8080_v20 = vpop.permute.xlu0 %8079 }
 0x591   : > { %10970 = vmatmul.mubr.f32.gmra.mrb[22].mxu1 %v7097_v25 }
 0x592   : > { %10972 = vmatprep.mubr.f32.mxu1 %v7098_v26  ;;  %v14006_v23 = vpop.permute.xlu0 %8089 }
 0x595   : > { %10973 = vmatmul.mubr.f32.gmra.mrb[24].mxu1 %v7099_v28 }
 0x596   : > { %10975 = vmatprep.mubr.f32.mxu1 %v7100_v29 }
 0x599   : > { %10976 = vmatmul.mubr.f32.gmra.mrb[26].mxu1 %v7101_v24 }
 0x59a   : > { %10978 = vmatprep.mubr.f32.mxu1 %v7102_v38 }
 0x59d   : > { %10979 = vmatmul.mubr.f32.gmra.mrb[28].mxu1 %v7103_v44 }
 0x59e   : > { %10981 = vmatprep.mubr.f32.mxu1 %v7104_v47 }
 0x5a1   : > { %10982 = vmatmul.mubr.f32.gmra.mrb[30].mxu1 %v7105_v8 }
 0x5a2   : > { %10984 = vmatprep.mubr.f32.mxu1 %v7106_v30  ;;  %v14011_v30 = vpop.permute.xlu1 %8104 }
 0x5a5   : > { %10985 = vmatmul.mubr.f32.gmra.mrb[32].mxu1 %v7107_v31 }
 0x5a6   : > { %10987 = vmatprep.mubr.f32.mxu1 %v7108_v49 }
 0x5a9   : > { %10988 = vmatmul.mubr.f32.gmra.mrb[34].mxu1 %v7109_v32  ;;  %v14014_v32 = vpop.permute.xlu0 %8099 }
 0x5aa   : > { %11022 = vmatprep.mubr.f32.mxu1 %v7480_v27 }
 0x5ad   : > { %11023 = vmatmul.mubr.f32.vlgmr.msra.gmra.mrb[0].mxu1 %v7481_v33 }
 0x5ae   : > { %11025 = vmatprep.mubr.f32.mxu1 %v7482_v35 }
 0x5b1   : > { %11026 = vmatmul.mubr.f32.gmra.mrb[2].mxu1 %v7483_v36 }
 0x5b2   : > { %11028 = vmatprep.mubr.f32.mxu1 %v7484_v37 }
 0x5b5   : > { %11029 = vmatmul.mubr.f32.gmra.mrb[4].mxu1 %v7485_v39 }
 0x5b6   : > { %11031 = vmatprep.mubr.f32.mxu1 %v7486_v40 }
 0x5b9   : > { %11032 = vmatmul.mubr.f32.gmra.mrb[6].mxu1 %v7487_v42 }
 0x5ba   : > { %11034 = vmatprep.mubr.f32.mxu1 %v7488_v43 }
 0x5bd   : > { %11035 = vmatmul.mubr.f32.gmra.mrb[8].mxu1 %v7489_v52  ;;  %v14018_v52 = vpop.permute.xlu1 %8114 }
 0x5be   : > { %11037 = vmatprep.mubr.f32.mxu1 %v7490_v54 }
 0x5c1   : > { %11038 = vmatmul.mubr.f32.gmra.mrb[10].mxu1 %v7491_v57 }
 0x5c2   : > { %11040 = vmatprep.mubr.f32.mxu1 %v7492_v62  ;;  %v14020_v62 = vpop.permute.xlu0 %8109 }
 0x5c5   : > { %11041 = vmatmul.mubr.f32.gmra.mrb[12].mxu1 %v7493_v63 }
 0x5c6   : > { %11043 = vmatprep.mubr.f32.mxu1 %v7494_v41 }
 0x5c9   : > { %11044 = vmatmul.mubr.f32.gmra.mrb[14].mxu1 %v7495_v5 }
 0x5ca   : > { %11046 = vmatprep.mubr.f32.mxu1 %v7496_v10 }
 0x5cd   : > { %11047 = vmatmul.mubr.f32.gmra.mrb[16].mxu1 %v7497_v13 }
 0x5ce   : > { %11049 = vmatprep.mubr.f32.mxu1 %v7498_v51 }
 0x5d1   : > { %11050 = vmatmul.mubr.f32.gmra.mrb[18].mxu1 %v7499_v56 }
 0x5d2   : > { %11052 = vmatprep.mubr.f32.mxu1 %v7500_v3 }
 0x5d5   : > { %11053 = vmatmul.mubr.f32.gmra.mrb[20].mxu1 %v7501_v60 }
 0x5d6   : > { %11055 = vmatprep.mubr.f32.mxu1 %v7502_v48 }
 0x5d9   : > { %11056 = vmatmul.mubr.f32.gmra.mrb[22].mxu1 %v7503_v61 }
 0x5da   : > { %11058 = vmatprep.mubr.f32.mxu1 %v7504_v53  ;;  %v14025_v53 = vpop.permute.xlu1 %8124 }
 0x5dd   : > { %11059 = vmatmul.mubr.f32.gmra.mrb[24].mxu1 %v7505_v45 }
 0x5de   : > { %11061 = vmatprep.mubr.f32.mxu1 %v7506_v46 }
 0x5e1   : > { %11062 = vmatmul.mubr.f32.gmra.mrb[26].mxu1 %v7507_v9  ;;  %v14028_v9 = vpop.permute.xlu0 %8119 }
 0x5e2   : > { %11064 = vmatprep.mubr.f32.mxu1 %v7508_v1 }
 0x5e5   : > { %11065 = vmatmul.mubr.f32.gmra.mrb[28].mxu1 %v7509_v2 }
 0x5e6   : > { %11067 = vmatprep.mubr.f32.mxu1 %v7510_v17 }
 0x5e9   : > { %11068 = vmatmul.mubr.f32.gmra.mrb[30].mxu1 %v7511_v58 }
 0x5ea   : > { %11070 = vmatprep.mubr.f32.mxu1 %v7512_v59 }
 0x5ed   : > { %11071 = vmatmul.mubr.f32.gmra.mrb[32].mxu1 %v7513_v55 }
 0x5ee   : > { %11073 = vmatprep.mubr.f32.mxu1 %v7514_v0 }
 0x5f1   : > { %11074 = vmatmul.mubr.f32.gmra.mrb[34].mxu1 %v7515_v11 }
 0x680   : > { %v11024_v22 = vpop.f32.mrb[0].mxu1 }
 0x681   : > { %v7930_v25 = vadd.f32 %v11024_v22, %v14002_v7  ;;  %v7599_v26 = vpop.f32.mrb[1].mxu1 }
 0x682   : > { %v7929_v28 = vadd.f32 %v14002_v7, %v7599_v26 }
 0x683   : > { %v7966_v29 = vmax.f32 %v7930_v25, 0.0  ;;  %v14034_v25 = vpop.permute.xlu0 %8129 }
 0x684   : > { %v7965_v24 = vmax.f32 %v7929_v28, 0.0  ;;  %v11027_v38 = vpop.f32.mrb[2].mxu1 }
 0x685   : > { %v8218_v44 = vmul.f32 %v8045_v14, %v7966_v29  ;;  %v7932_v47 = vadd.f32 %v11027_v38, %v14002_v7  ;;  %v7609_v8 = vpop.f32.mrb[3].mxu1 }
 0x686   : > { %v8217_v49 = vmul.f32 %v8040_v4, %v7965_v24  ;;  %v7931_v31 = vadd.f32 %v14002_v7, %v7609_v8 }
 0x687   : > { %8254 = vst [vmem:[#allocation2 + $0x8] sm:$0xff] %v8218_v44  ;;  %v7968_v27 = vmax.f32 %v7932_v47, 0.0 }
 0x688   : > { %8253 = vst [vmem:[#allocation2] sm:$0xff] %v8217_v49  ;;  %v7967_v33 = vmax.f32 %v7931_v31, 0.0  ;;  %v11030_v35 = vpop.f32.mrb[4].mxu1 }
 0x689   : > { %v8220_v36 = vmul.f32 %v8055_v12, %v7968_v27  ;;  %v7934_v37 = vadd.f32 %v11030_v35, %v14002_v7  ;;  %v7619_v39 = vpop.f32.mrb[5].mxu1 }
 0x68a   : > { %v8219_v40 = vmul.f32 %v8050_v16, %v7967_v33  ;;  %v7933_v42 = vadd.f32 %v14002_v7, %v7619_v39 }
 0x68b   : > { %8256 = vst [vmem:[#allocation2 + $0x18] sm:$0xff] %v8220_v36  ;;  %v7970_v43 = vmax.f32 %v7934_v37, 0.0  ;;  %v8140_v36 = vpop.permute.xlu0 %8139 }
 0x68c   : > { %8255 = vst [vmem:[#allocation2 + $0x10] sm:$0xff] %v8219_v40  ;;  %v7969_v54 = vmax.f32 %v7933_v42, 0.0  ;;  %v11033_v57 = vpop.f32.mrb[6].mxu1 }
 0x68d   : > { %v8222_v63 = vmul.f32 %v8065_v15, %v7970_v43  ;;  %v7936_v41 = vadd.f32 %v11033_v57, %v14002_v7  ;;  %v7629_v5 = vpop.f32.mrb[7].mxu1  ;;  %v14032_v15 = vpop.permute.xlu1 %8134 }
 0x68e   : > { %v8221_v10 = vmul.f32 %v8060_v18, %v7969_v54  ;;  %v7935_v13 = vadd.f32 %v14002_v7, %v7629_v5 }
 0x68f   : > { %8258 = vst [vmem:[#allocation2 + $0x28] sm:$0xff] %v8222_v63  ;;  %v7972_v51 = vmax.f32 %v7936_v41, 0.0  ;;  %v8289_v58 = vld [vmem:[#allocation2] ss:$2 sm:$0xff]  ;;  %v8291_v59 = vld [vmem:[#allocation2 + $0x1] ss:$2 sm:$0xff] }
 0x690   : > { %8257 = vst [vmem:[#allocation2 + $0x20] sm:$0xff] %v8221_v10  ;;  %v7971_v56 = vmax.f32 %v7935_v13, 0.0  ;;  %v11036_v3 = vpop.f32.mrb[8].mxu1  ;;  %v8292_v18 = vmax.f32 %v8289_v58, %v8291_v59 }
 0x691   : > { %v8224_v60 = vmul.f32 %v8075_v34, %v7972_v51  ;;  %v7938_v48 = vadd.f32 %v11036_v3, %v14002_v7  ;;  %v7639_v61 = vpop.f32.mrb[9].mxu1  ;;  %v8145_v33 = vpop.permute.xlu1 %8144 }
 0x692   : > { %v8223_v45 = vmul.f32 %v8070_v50, %v7971_v56  ;;  %v7937_v46 = vadd.f32 %v14002_v7, %v7639_v61 }
 0x693   : > { %8260 = vst [vmem:[#allocation2 + $0x38] sm:$0xff] %v8224_v60  ;;  %v7974_v1 = vmax.f32 %v7938_v48, 0.0  ;;  %v8150_v60 = vpop.permute.xlu0 %8149 }
 0x694   : > { %8259 = vst [vmem:[#allocation2 + $0x30] sm:$0xff] %v8223_v45  ;;  %v7973_v2 = vmax.f32 %v7937_v46, 0.0  ;;  %v11039_v17 = vpop.f32.mrb[10].mxu1 }
 0x695   : > { %v8226_v0 = vmul.f32 %v8085_v19, %v7974_v1  ;;  %v7940_v55 = vadd.f32 %v11039_v17, %v14002_v7  ;;  %v7649_v11 = vpop.f32.mrb[11].mxu1  ;;  %v8155_v51 = vpop.permute.xlu1 %8154 }
 0x696   : > { %v8225_v6 = vmul.f32 %v8080_v20, %v7973_v2  ;;  %v7939_v14 = vadd.f32 %v14002_v7, %v7649_v11 }
 0x697   : > { %v8294_v4 = vld [vmem:[#allocation2 + $0x12] ss:$2 sm:$0xff]  ;;  %v8296_v12 = vld [vmem:[#allocation2 + $0x13] ss:$2 sm:$0xff]  ;;  %8262 = vst [vmem:[#allocation2 + $0x48] sm:$0xff] %v8226_v0  ;;  %v7976_v16 = vmax.f32 %v7940_v55, 0.0 }
 0x698   : > { %v8297_v34 = vmax.f32 %v8294_v4, %v8296_v12  ;;  %8261 = vst [vmem:[#allocation2 + $0x40] sm:$0xff] %v8225_v6  ;;  %v7975_v50 = vmax.f32 %v7939_v14, 0.0  ;;  %v11042_v22 = vpop.f32.mrb[12].mxu1 }
 0x699   : > { %v8228_v19 = vmul.f32 %v14004_v21, %v7976_v16  ;;  %v7942_v20 = vadd.f32 %v11042_v22, %v14002_v7  ;;  %v7659_v26 = vpop.f32.mrb[13].mxu1  ;;  %v8165_v4 = vpop.permute.xlu1 %8164 }
 0x69a   : > { %v8298_v28 = vmax.f32 %v8292_v18, %v8297_v34  ;;  %v8227_v29 = vmul.f32 %v14006_v23, %v7975_v50  ;;  %v7941_v24 = vadd.f32 %v14002_v7, %v7659_v26  ;;  %v8160_v18 = vpop.permute.xlu0 %8159 }
 0x69b   : > { %8264 = vst [vmem:[#allocation2 + $0x58] sm:$0xff] %v8228_v19  ;;  %v7978_v38 = vmax.f32 %v7942_v20, 0.0  ;;  %v8301_v8 = vld [vmem:[#allocation2 + $0x24] ss:$2 sm:$0xff]  ;;  %v8303_v49 = vld [vmem:[#allocation2 + $0x25] ss:$2 sm:$0xff] }
 0x69c   : > { %8299 = vst [vmem:[%s13984_s27 + $0xb] sm:$0xff] %v8298_v28  ;;  %8263 = vst [vmem:[#allocation2 + $0x50] sm:$0xff] %v8227_v29  ;;  %v7977_v44 = vmax.f32 %v7941_v24, 0.0  ;;  %v11045_v47 = vpop.f32.mrb[14].mxu1  ;;  %v8304_v42 = vmax.f32 %v8301_v8, %v8303_v49 }
 0x69d   : > { %v8230_v31 = vmul.f32 %v14011_v30, %v7978_v38  ;;  %v7944_v21 = vadd.f32 %v11045_v47, %v14002_v7  ;;  %v7669_v27 = vpop.f32.mrb[15].mxu1  ;;  %v8175_v47 = vpop.permute.xlu1 %8174 }
 0x69e   : > { %v8229_v35 = vmul.f32 %v14014_v32, %v7977_v44  ;;  %v7943_v23 = vadd.f32 %v14002_v7, %v7669_v27  ;;  %v8170_v27 = vpop.permute.xlu0 %8169 }
 0x69f   : > { %v8306_v37 = vld [vmem:[#allocation2 + $0x36] ss:$2 sm:$0xff]  ;;  %v8308_v39 = vld [vmem:[#allocation2 + $0x37] ss:$2 sm:$0xff]  ;;  %8266 = vst [vmem:[#allocation2 + $0x68] sm:$0xff] %v8230_v31  ;;  %v7980_v40 = vmax.f32 %v7944_v21, 0.0 }
 0x6a0   : > { %v8309_v43 = vmax.f32 %v8306_v37, %v8308_v39  ;;  %8265 = vst [vmem:[#allocation2 + $0x60] sm:$0xff] %v8229_v35  ;;  %v7979_v54 = vmax.f32 %v7943_v23, 0.0  ;;  %v11048_v57 = vpop.f32.mrb[16].mxu1 }
 0x6a1   : > { %v8232_v30 = vmul.f32 %v14018_v52, %v7980_v40  ;;  %v7946_v63 = vadd.f32 %v11048_v57, %v14002_v7  ;;  %v7679_v41 = vpop.f32.mrb[17].mxu1 }
 0x6a2   : > { %v8310_v5 = vmax.f32 %v8304_v42, %v8309_v43  ;;  %v8231_v32 = vmul.f32 %v14020_v62, %v7979_v54  ;;  %v7945_v10 = vadd.f32 %v14002_v7, %v7679_v41 }
 0x6a3   : > { %8268 = vst [vmem:[#allocation2 + $0x78] sm:$0xff] %v8232_v30  ;;  %v7982_v13 = vmax.f32 %v7946_v63, 0.0  ;;  %v8313_v48 = vld [vmem:[#allocation2 + $0x48] ss:$2 sm:$0xff]  ;;  %v8315_v61 = vld [vmem:[#allocation2 + $0x49] ss:$2 sm:$0xff]  ;;  %v8185_v63 = vpop.permute.xlu1 %8184 }
 0x6a4   : > { %8311 = vst [vmem:[%s13984_s27 + $0x15] sm:$0xff] %v8310_v5  ;;  %8267 = vst [vmem:[#allocation2 + $0x70] sm:$0xff] %v8231_v32  ;;  %v7981_v56 = vmax.f32 %v7945_v10, 0.0  ;;  %v11051_v3 = vpop.f32.mrb[18].mxu1  ;;  %v8316_v59 = vmax.f32 %v8313_v48, %v8315_v61  ;;  %v8180_v32 = vpop.permute.xlu0 %8179 }
 0x6a5   : > { %v8234_v52 = vmul.f32 %v14025_v53, %v7982_v13  ;;  %v7948_v45 = vadd.f32 %v11051_v3, %v14002_v7  ;;  %v7689_v46 = vpop.f32.mrb[19].mxu1 }
 0x6a6   : > { %v8233_v1 = vmul.f32 %v14028_v9, %v7981_v56  ;;  %v7947_v62 = vadd.f32 %v14002_v7, %v7689_v46 }
 0x6a7   : > { %v8318_v2 = vld [vmem:[#allocation2 + $0x5a] ss:$2 sm:$0xff]  ;;  %v8320_v17 = vld [vmem:[#allocation2 + $0x5b] ss:$2 sm:$0xff]  ;;  %8270 = vst [vmem:[#allocation2 + $0x88] sm:$0xff] %v8234_v52  ;;  %v7984_v58 = vmax.f32 %v7948_v45, 0.0 }
 0x6a8   : > { %v8321_v0 = vmax.f32 %v8318_v2, %v8320_v17  ;;  %8269 = vst [vmem:[#allocation2 + $0x80] sm:$0xff] %v8233_v1  ;;  %v7983_v55 = vmax.f32 %v7947_v62, 0.0  ;;  %v11054_v11 = vpop.f32.mrb[20].mxu1  ;;  %v8195_v2 = vpop.permute.xlu1 %8194 }
 0x6a9   : > { %v8236_v6 = vmul.f32 %v14032_v15, %v7984_v58  ;;  %v7950_v53 = vadd.f32 %v11054_v11, %v14002_v7  ;;  %v7699_v14 = vpop.f32.mrb[21].mxu1 }
 0x6aa   : > { %v8322_v12 = vmax.f32 %v8316_v59, %v8321_v0  ;;  %v8235_v9 = vmul.f32 %v14034_v25, %v7983_v55  ;;  %v7949_v16 = vadd.f32 %v14002_v7, %v7699_v14  ;;  %v8190_v55 = vpop.permute.xlu0 %8189 }
 0x6ab   : > { %8272 = vst [vmem:[#allocation2 + $0x98] sm:$0xff] %v8236_v6  ;;  %v7986_v34 = vmax.f32 %v7950_v53, 0.0  ;;  %v8325_v19 = vld [vmem:[#allocation2 + $0x6c] ss:$2 sm:$0xff]  ;;  %v8327_v20 = vld [vmem:[#allocation2 + $0x6d] ss:$2 sm:$0xff] }
 0x6ac   : > { %8323 = vst [vmem:[%s13984_s27 + $0x1f] sm:$0xff] %v8322_v12  ;;  %8271 = vst [vmem:[#allocation2 + $0x90] sm:$0xff] %v8235_v9  ;;  %v7985_v50 = vmax.f32 %v7949_v16, 0.0  ;;  %v11057_v22 = vpop.f32.mrb[22].mxu1  ;;  %v8328_v8 = vmax.f32 %v8325_v19, %v8327_v20 }
 0x6ad   : > { %v8238_v26 = vmul.f32 %v8145_v33, %v7986_v34  ;;  %v7952_v15 = vadd.f32 %v11057_v22, %v14002_v7  ;;  %v7709_v28 = vpop.f32.mrb[23].mxu1 }
 0x6ae   : > { %v8237_v29 = vmul.f32 %v8140_v36, %v7985_v50  ;;  %v7951_v24 = vadd.f32 %v14002_v7, %v7709_v28 }
 0x6af   : > { %v8330_v38 = vld [vmem:[#allocation2 + $0x7e] ss:$2 sm:$0xff]  ;;  %v8332_v25 = vld [vmem:[#allocation2 + $0x7f] ss:$2 sm:$0xff]  ;;  %8274 = vst [vmem:[#allocation2 + $0xa8] sm:$0xff] %v8238_v26  ;;  %v7988_v44 = vmax.f32 %v7952_v15, 0.0  ;;  %v8205_v26 = vpop.permute.xlu1 %8204 }
 0x6b0   : > { %v8333_v49 = vmax.f32 %v8330_v38, %v8332_v25  ;;  %8273 = vst [vmem:[#allocation2 + $0xa0] sm:$0xff] %v8237_v29  ;;  %v7987_v31 = vmax.f32 %v7951_v24, 0.0  ;;  %v11060_v21 = vpop.f32.mrb[24].mxu1  ;;  %v8200_v29 = vpop.permute.xlu0 %8199 }
 0x6b1   : > { %v8240_v35 = vmul.f32 %v8155_v51, %v7988_v44  ;;  %v7954_v33 = vadd.f32 %v11060_v21, %v14002_v7  ;;  %v7719_v23 = vpop.f32.mrb[25].mxu1 }
 0x6b2   : > { %v8334_v37 = vmax.f32 %v8328_v8, %v8333_v49  ;;  %v8239_v36 = vmul.f32 %v8150_v60, %v7987_v31  ;;  %v7953_v39 = vadd.f32 %v14002_v7, %v7719_v23 }
 0x6b3   : > { %8276 = vst [vmem:[#allocation2 + $0xb8] sm:$0xff] %v8240_v35  ;;  %v7990_v40 = vmax.f32 %v7954_v33, 0.0  ;;  %v8337_v56 = vld [vmem:[#allocation2 + $0x90] ss:$2 sm:$0xff]  ;;  %v8339_v3 = vld [vmem:[#allocation2 + $0x91] ss:$2 sm:$0xff] }
 0x6b4   : > { %8335 = vst [vmem:[%s13984_s27 + $0x29] sm:$0xff] %v8334_v37  ;;  %8275 = vst [vmem:[#allocation2 + $0xb0] sm:$0xff] %v8239_v36  ;;  %v7989_v42 = vmax.f32 %v7953_v39, 0.0  ;;  %v11063_v43 = vpop.f32.mrb[26].mxu1  ;;  %v8340_v17 = vmax.f32 %v8337_v56, %v8339_v3  ;;  %v8215_v36 = vpop.permute.xlu1 %8214 }
 0x6b5   : > { %v8242_v54 = vmul.f32 %v8165_v4, %v7990_v40  ;;  %v7956_v57 = vadd.f32 %v11063_v43, %v14002_v7  ;;  %v7729_v30 = vpop.f32.mrb[27].mxu1  ;;  %v8210_v40 = vpop.permute.xlu0 %8209 }
 0x6b6   : > { %v8241_v41 = vmul.f32 %v8160_v18, %v7989_v42  ;;  %v7955_v5 = vadd.f32 %v14002_v7, %v7729_v30 }
 0x6b7   : > { %8278 = vst [vmem:[#allocation2 + $0xc8] sm:$0xff] %v8242_v54  ;;  %v7992_v10 = vmax.f32 %v7956_v57, 0.0 }
 0x6b8   : > { %8277 = vst [vmem:[#allocation2 + $0xc0] sm:$0xff] %v8241_v41  ;;  %v7991_v13 = vmax.f32 %v7955_v5, 0.0  ;;  %v11066_v51 = vpop.f32.mrb[28].mxu1 }
 0x6b9   : > { %v8244_v60 = vmul.f32 %v8175_v47, %v7992_v10  ;;  %v7958_v48 = vadd.f32 %v11066_v51, %v14002_v7  ;;  %v7739_v61 = vpop.f32.mrb[29].mxu1 }
 0x6ba   : > { %v8243_v52 = vmul.f32 %v8170_v27, %v7991_v13  ;;  %v7957_v45 = vadd.f32 %v14002_v7, %v7739_v61 }
 0x6bb   : > { %v8342_v46 = vld [vmem:[#allocation2 + $0xa2] ss:$2 sm:$0xff]  ;;  %v8344_v1 = vld [vmem:[#allocation2 + $0xa3] ss:$2 sm:$0xff]  ;;  %8280 = vst [vmem:[#allocation2 + $0xd8] sm:$0xff] %v8244_v60  ;;  %v7994_v62 = vmax.f32 %v7958_v48, 0.0 }
 0x6bc   : > { %v8345_v58 = vmax.f32 %v8342_v46, %v8344_v1  ;;  %8279 = vst [vmem:[#allocation2 + $0xd0] sm:$0xff] %v8243_v52  ;;  %v7993_v59 = vmax.f32 %v7957_v45, 0.0  ;;  %v11069_v0 = vpop.f32.mrb[30].mxu1 }
 0x6bd   : > { %v8246_v11 = vmul.f32 %v8185_v63, %v7994_v62  ;;  %v7960_v6 = vadd.f32 %v11069_v0, %v14002_v7  ;;  %v7749_v53 = vpop.f32.mrb[31].mxu1 }
 0x6be   : > { %v8346_v14 = vmax.f32 %v8340_v17, %v8345_v58  ;;  %v8245_v4 = vmul.f32 %v8180_v32, %v7993_v59  ;;  %v7959_v12 = vadd.f32 %v14002_v7, %v7749_v53 }
 0x6bf   : > { %8282 = vst [vmem:[#allocation2 + $0xe8] sm:$0xff] %v8246_v11  ;;  %v7996_v9 = vmax.f32 %v7960_v6, 0.0  ;;  %v8349_v34 = vld [vmem:[#allocation2 + $0xb4] ss:$2 sm:$0xff]  ;;  %v8351_v50 = vld [vmem:[#allocation2 + $0xb5] ss:$2 sm:$0xff] }
 0x6c0   : > { %8347 = vst [vmem:[%s13984_s27 + $0x33] sm:$0xff] %v8346_v14  ;;  %8281 = vst [vmem:[#allocation2 + $0xe0] sm:$0xff] %v8245_v4  ;;  %v7995_v16 = vmax.f32 %v7959_v12, 0.0  ;;  %v11072_v18 = vpop.f32.mrb[32].mxu1  ;;  %v8352_v44 = vmax.f32 %v8349_v34, %v8351_v50 }
 0x6c1   : > { %v8248_v22 = vmul.f32 %v8195_v2, %v7996_v9  ;;  %v7962_v19 = vadd.f32 %v11072_v18, %v14002_v7  ;;  %v7759_v20 = vpop.f32.mrb[33].mxu1 }
 0x6c2   : > { %v8247_v15 = vmul.f32 %v8190_v55, %v7995_v16  ;;  %v7961_v28 = vadd.f32 %v14002_v7, %v7759_v20 }
 0x6c3   : > { %v8354_v24 = vld [vmem:[#allocation2 + $0xc6] ss:$2 sm:$0xff]  ;;  %v8356_v38 = vld [vmem:[#allocation2 + $0xc7] ss:$2 sm:$0xff]  ;;  %8284 = vst [vmem:[#allocation2 + $0xf8] sm:$0xff] %v8248_v22  ;;  %v7998_v25 = vmax.f32 %v7962_v19, 0.0 }
 0x6c4   : > { %v8357_v47 = vmax.f32 %v8354_v24, %v8356_v38  ;;  %8283 = vst [vmem:[#allocation2 + $0xf0] sm:$0xff] %v8247_v15  ;;  %v7997_v8 = vmax.f32 %v7961_v28, 0.0  ;;  %v11075_v49 = vpop.f32.mrb[34].mxu1 }
 0x6c5   : > { %v8250_v31 = vmul.f32 %v8205_v26, %v7998_v25  ;;  %v7964_v21 = vadd.f32 %v11075_v49, %v14002_v7  ;;  %v7769_v27 = vpop.f32.mrb[35].mxu1 }
 0x6c6   : > { %v8358_v35 = vmax.f32 %v8352_v44, %v8357_v47  ;;  %v8249_v33 = vmul.f32 %v8200_v29, %v7997_v8  ;;  %v7963_v23 = vadd.f32 %v14002_v7, %v7769_v27 }
 0x6c7   : > { %8286 = vst [vmem:[#allocation2 + $0x108] sm:$0xff] %v8250_v31  ;;  %v8000_v37 = vmax.f32 %v7964_v21, 0.0  ;;  %v8361_v42 = vld [vmem:[#allocation2 + $0xd8] ss:$2 sm:$0xff]  ;;  %v8363_v43 = vld [vmem:[#allocation2 + $0xd9] ss:$2 sm:$0xff] }
 0x6c8   : > { %8359 = vst [vmem:[%s13984_s27 + $0x3d] sm:$0xff] %v8358_v35  ;;  %8285 = vst [vmem:[#allocation2 + $0x100] sm:$0xff] %v8249_v33  ;;  %v7999_v39 = vmax.f32 %v7963_v23, 0.0  ;;  %v8364_v41 = vmax.f32 %v8361_v42, %v8363_v43 }
 0x6c9   : > { %v8252_v54 = vmul.f32 %v8215_v36, %v8000_v37 }
 0x6ca   : > { %v8251_v57 = vmul.f32 %v8210_v40, %v7999_v39 }
 0x6cb   : > { %v8366_v30 = vld [vmem:[#allocation2 + $0xea] ss:$2 sm:$0xff]  ;;  %v8368_v63 = vld [vmem:[#allocation2 + $0xeb] ss:$2 sm:$0xff]  ;;  %8288 = vst [vmem:[#allocation2 + $0x118] sm:$0xff] %v8252_v54 }
 0x6cc   : > { %v8369_v5 = vmax.f32 %v8366_v30, %v8368_v63  ;;  %8287 = vst [vmem:[#allocation2 + $0x110] sm:$0xff] %v8251_v57 }
 0x6ce   : > { %v8370_v7 = vmax.f32 %v8364_v41, %v8369_v5 }
 0x6cf   : > { %v8373_v32 = vld [vmem:[#allocation2 + $0xfc] ss:$2 sm:$0xff]  ;;  %v8375_v10 = vld [vmem:[#allocation2 + $0xfd] ss:$2 sm:$0xff] }
 0x6d0   : > { %8371 = vst [vmem:[%s13984_s27 + $0x47] sm:$0xff] %v8370_v7  ;;  %v8376_v56 = vmax.f32 %v8373_v32, %v8375_v10 }
 0x6d3   : > { %v8378_v13 = vld [vmem:[#allocation2 + $0x10e] ss:$2 sm:$0xff]  ;;  %v8380_v51 = vld [vmem:[#allocation2 + $0x10f] ss:$2 sm:$0xff] }
 0x6d4   : > { %v8381_v3 = vmax.f32 %v8378_v13, %v8380_v51 }
 0x6d6   : > { %v8382_v60 = vmax.f32 %v8376_v56, %v8381_v3 }
 0x6d8   : > { %8383 = vst [vmem:[%s13984_s27 + $0x51] sm:$0xff] %v8382_v60 }
 0x6d9 PF: > { %s17_s21 = sadd.s32 1, %s12294_s21  }
 0x6da   : > { %p14_p3 = scmp.ge.s32.totalorder %s17_s21, 4  }
 0x6dc   :  { %16 = sbr.rel (!%p14_p3) target bundleno = 1 (0x1), region = 126 }
 0x6e3   :  { %8405 = vsyncpa [#allocation5], 1 }
 0x6e4   :  { %8407 = vsyncpa [#allocation5 + $0x1], 1 }

</bundles_post_ra>
